<compile_context>
chip_gen: v6e
topology: v6e:2x2x1
jax: 0.10.0
libtpu: 0.0.40
codegen_flags: <defaults>
</compile_context>

<pallas_src>
import functools
import math

import jax
import jax.numpy as jnp
import numpy as np
from jax.experimental import pallas as pl
from jax.experimental.pallas import tpu as pltpu

EPS = 1e-5      # nn.BatchNorm2d default
KSIZE = 5
STRIDE = 2


def _round_up(v, m):
    return ((v + m - 1) // m) * m


def _conv_out(n):
    return (n - KSIZE) // STRIDE + 1


def _pick_len(idx_max, shift_max, src_cols):
    """Width of the shifted lane-slices / rows of the gather matrix."""
    need = idx_max + 1
    aligned = _round_up(need, 128)
    return aligned if aligned + shift_max <= src_cols else need


# ---------------------------------------------------------------------------
# The fused Pallas kernel (whole network, single grid point).
# ---------------------------------------------------------------------------
def _dqn_kernel(p1_ref, w1_ref, b1_ref, w2_ref, b2_ref, sel2_ref,
                w3_ref, b3_ref, sel3_ref, hw_ref, hb_ref,
                out_ref, y1_ref, p2_ref, y2_ref, p3_ref, *, cfg):
    f32 = jnp.float32
    k = KSIZE
    C1, C2 = cfg["C1"], cfg["C2"]
    L2, L3 = cfg["L2"], cfg["L3"]
    n_b, P3, Q = cfg["N"], cfg["P3"], cfg["Q"]

    # ---- stage 1: conv1 + bn1 + relu as one lane-dense GEMM ----------------
    y1 = jnp.dot(w1_ref[...], p1_ref[...], preferred_element_type=f32)
    y1_ref[...] = jnp.maximum(y1 + b1_ref[...], 0.0)          # [C1, M1P]

    # ---- stage 2: stacked-K im2col -> one GEMM -> bias+relu -> gather GEMM --
    # Each of the 25 shifted lane-slices of y1 is written exactly once into the
    # stacked im2col scratch; the conv is then a single [C2, 25*C1] GEMM.
    for t in range(k * k):
        i, j = divmod(t, k)
        s = i * cfg["OW1"] + j
        p2_ref[t * C1:(t + 1) * C1, :] = y1_ref[:, s:s + L2]
    z2 = jnp.dot(w2_ref[...], p2_ref[...], preferred_element_type=f32)
    a2 = jnp.maximum(z2 + b2_ref[...], 0.0)                   # [C2, L2]
    # Host-precomputed stride-2 selection (padded columns are all-zero).
    y2_ref[...] = jnp.dot(a2, sel2_ref[...], preferred_element_type=f32)

    # ---- stage 3: same structure -------------------------------------------
    for t in range(k * k):
        i, j = divmod(t, k)
        s = i * cfg["OW2"] + j
        p3_ref[t * C2:(t + 1) * C2, :] = y2_ref[:, s:s + L3]
    z3 = jnp.dot(w3_ref[...], p3_ref[...], preferred_element_type=f32)
    a3 = jnp.maximum(z3 + b3_ref[...], 0.0)                   # [C3, L3]
    y3 = jnp.dot(a3, sel3_ref[...], preferred_element_type=f32)  # [C3, P3*N]

    # ---- head: per-spatial-position accumulation (no concat relayout) ------
    acc = jnp.zeros((Q, n_b), f32)
    for pos in range(P3):
        acc = acc + jnp.dot(hw_ref[pos], y3[:, pos * n_b:(pos + 1) * n_b],
                            preferred_element_type=f32)
    out_ref[...] = acc + hb_ref[...]


# ---------------------------------------------------------------------------
# Host-side parameter folding + static geometry (done once).
# ---------------------------------------------------------------------------
def _prepare(p, x_shape):
    N, Cin, H, W = x_shape
    OH1, OW1 = _conv_out(H), _conv_out(W)
    OH2, OW2 = _conv_out(OH1), _conv_out(OW1)
    OH3, OW3 = _conv_out(OH2), _conv_out(OW2)
    C1, C2, C3 = p["w1"].shape[0], p["w2"].shape[0], p["w3"].shape[0]
    K = KSIZE
    Q = p["head_w"].shape[0]

    M1, M2 = N * OH1 * OW1, N * OH2 * OW2
    M1P, M2P = _round_up(M1, 128), _round_up(M2, 128)
    S1, S2 = OH1 * OW1, OH2 * OW2
    P3 = OH3 * OW3

    s2_max = (K - 1) * OW1 + (K - 1)
    idx2_max = (N - 1) * S1 + 2 * (OH2 - 1) * OW1 + 2 * (OW2 - 1)
    L2 = _pick_len(idx2_max, s2_max, M1P)
    s3_max = (K - 1) * OW2 + (K - 1)
    idx3_max = (N - 1) * S2 + 2 * (OH3 - 1) * OW2 + 2 * (OW3 - 1)
    L3 = _pick_len(idx3_max, s3_max, M2P)

    # Correctness guards (review): windows must stay inside VALID data, and
    # slice reads must stay inside the padded buffers.
    assert idx2_max + s2_max < M1, (idx2_max, s2_max, M1)
    assert idx2_max < L2 and L2 + s2_max <= M1P, (idx2_max, L2, s2_max, M1P)
    assert idx3_max + s3_max < M2, (idx3_max, s3_max, M2)
    assert idx3_max < L3 and L3 + s3_max <= M2P, (idx3_max, L3, s3_max, M2P)
    assert C3 * P3 == p["head_w"].shape[1], "head expects C3*OH3*OW3 features"

    # Fold eval-mode BN into the conv weights / bias.
    def fold(w, b, g, be, m, v):
        s = g / jnp.sqrt(v + EPS)
        return w * s[:, None, None, None], (b - m) * s + be

    w1f, b1f = fold(p["w1"], p["b1"], p["g1"], p["be1"], p["m1"], p["v1"])
    w2f, b2f = fold(p["w2"], p["b2"], p["g2"], p["be2"], p["m2"], p["v2"])
    w3f, b3f = fold(p["w3"], p["b3"], p["g3"], p["be3"], p["m3"], p["v3"])

    K1 = Cin * K * K
    K1P = _round_up(K1, 8)
    w1m = jnp.zeros((C1, K1P), jnp.float32).at[:, :K1].set(w1f.reshape(C1, K1))

    # Stacked-K conv weights: row order of the im2col scratch is (tap, cin).
    w2s = jnp.transpose(w2f, (0, 2, 3, 1)).reshape(C2, K * K * C1)
    w3s = jnp.transpose(w3f, (0, 2, 3, 1)).reshape(C3, K * K * C2)

    # Host-precomputed stride-2 gather matrices (one-hot columns).
    sel2 = np.zeros((L2, M2P), np.float32)
    for n in range(N):
        for oh in range(OH2):
            for ow in range(OW2):
                m = n * S2 + oh * OW2 + ow
                sel2[n * S1 + 2 * oh * OW1 + 2 * ow, m] = 1.0
    sel3 = np.zeros((L3, P3 * N), np.float32)      # column order (p, n)
    for n in range(N):
        for oh in range(OH3):
            for ow in range(OW3):
                pos = oh * OW3 + ow
                sel3[n * S2 + 2 * oh * OW2 + 2 * ow, pos * N + n] = 1.0

    # Head weights split per spatial position: hw3[p, q, c] = W[q, c*P3 + p].
    hw3 = p["head_w"].reshape(Q, C3, P3).transpose(2, 0, 1)
    hb = p["head_b"][:, None]

    arrs = dict(w1=w1m, b1=b1f[:, None], w2s=w2s, b2=b2f[:, None],
                sel2=jnp.asarray(sel2), w3s=w3s, b3=b3f[:, None],
                sel3=jnp.asarray(sel3), hw3=hw3, hb=hb)
    cfg = dict(N=N, Cin=Cin, C1=C1, C2=C2, C3=C3, Q=Q,
               OH1=OH1, OW1=OW1, OH2=OH2, OW2=OW2, OH3=OH3, OW3=OW3,
               K1P=K1P, M1P=M1P, M2P=M2P, L2=L2, L3=L3, P3=P3)
    return arrs, cfg


def _im2col_stage1(x, cfg):
    """Raw-input patches [K1P, M1P] (K order (ci,kh,kw), M order (n,oh,ow))."""
    N, C, H, W = x.shape
    OH, OW = cfg["OH1"], cfg["OW1"]
    cols = []
    for i in range(KSIZE):
        for j in range(KSIZE):
            cols.append(x[:, :, i:i + STRIDE * OH:STRIDE, j:j + STRIDE * OW:STRIDE])
    cols = jnp.stack(cols, axis=2)                       # [N, C, 25, OH, OW]
    cols = cols.reshape(N, C * KSIZE * KSIZE, OH * OW)
    cols = cols.transpose(1, 0, 2).reshape(C * KSIZE * KSIZE, N * OH * OW)
    p1 = jnp.zeros((cfg["K1P"], cfg["M1P"]), jnp.float32)
    return p1.at[:C * KSIZE * KSIZE, :N * OH * OW].set(cols)


def build_dqn_forward(params, x_shape):
    arrs, cfg = _prepare(params, x_shape)
    kernel = functools.partial(_dqn_kernel, cfg=cfg)
    Q = cfg["Q"]

    flops = 2 * (cfg["C1"] * cfg["K1P"] * cfg["M1P"]
                 + cfg["C2"] * KSIZE * KSIZE * cfg["C1"] * cfg["L2"]
                 + cfg["C2"] * cfg["L2"] * cfg["M2P"]
                 + cfg["C3"] * KSIZE * KSIZE * cfg["C2"] * cfg["L3"]
                 + cfg["C3"] * cfg["L3"] * cfg["P3"] * cfg["N"]
                 + Q * cfg["C3"] * cfg["P3"] * cfg["N"])
    in_bytes = (cfg["K1P"] * cfg["M1P"] * 4
                + sum(int(np.prod(a.shape)) * 4 for a in arrs.values()))

    call = pl.pallas_call(
        kernel,
        out_shape=jax.ShapeDtypeStruct((Q, cfg["N"]), jnp.float32),
        in_specs=[pl.BlockSpec(memory_space=pltpu.MemorySpace.VMEM)] * 11,
        out_specs=pl.BlockSpec(memory_space=pltpu.MemorySpace.VMEM),
        scratch_shapes=[
            pltpu.VMEM((cfg["C1"], cfg["M1P"]), jnp.float32),              # y1
            pltpu.VMEM((KSIZE * KSIZE * cfg["C1"], cfg["L2"]), jnp.float32),  # im2col2
            pltpu.VMEM((cfg["C2"], cfg["M2P"]), jnp.float32),              # y2
            pltpu.VMEM((KSIZE * KSIZE * cfg["C2"], cfg["L3"]), jnp.float32),  # im2col3
        ],
        cost_estimate=pl.CostEstimate(
            flops=int(flops), transcendentals=0,
            bytes_accessed=int(in_bytes + Q * cfg["N"] * 4)),
    )
    # TODO(synk): for replay batches >= ~64, switch to per-sample sel/idx and a
    # leading "parallel" grid axis over batch so v7x's two TensorCores split
    # the work; at batch=2 one grid point is best.
    # TODO(synk): allow_input_fusion (or an in-kernel stage-1 im2col) would
    # remove the one ~280 KiB HBM round trip for p1; omitted to keep compile
    # risk low.

    @jax.jit
    def fwd(x):
        p1 = _im2col_stage1(x, cfg)
        out_t = call(p1, arrs["w1"], arrs["b1"], arrs["w2s"], arrs["b2"],
                     arrs["sel2"], arrs["w3s"], arrs["b3"], arrs["sel3"],
                     arrs["hw3"], arrs["hb"])
        return out_t.T                                   # [N, num_classes]

    return fwd


# ---------------------------------------------------------------------------
# Parameter init (deterministic, PyTorch-like fan-in uniform) + JAX reference
# ---------------------------------------------------------------------------
def init_params(key, num_classes=14):
    ks = iter(jax.random.split(key, 32))

    def conv(cout, cin, k):
        bound = 1.0 / math.sqrt(cin * k * k)
        w = jax.random.uniform(next(ks), (cout, cin, k, k), jnp.float32, -bound, bound)
        b = jax.random.uniform(next(ks), (cout,), jnp.float32, -bound, bound)
        return w, b

    def bn(c):
        g = 1.0 + 0.1 * jax.random.normal(next(ks), (c,), jnp.float32)
        be = 0.1 * jax.random.normal(next(ks), (c,), jnp.float32)
        m = 0.1 * jax.random.normal(next(ks), (c,), jnp.float32)
        v = jnp.abs(1.0 + 0.1 * jax.random.normal(next(ks), (c,), jnp.float32))
        return g, be, m, v

    p = {}
    p["w1"], p["b1"] = conv(16, 3, 5)
    p["g1"], p["be1"], p["m1"], p["v1"] = bn(16)
    p["w2"], p["b2"] = conv(32, 16, 5)
    p["g2"], p["be2"], p["m2"], p["v2"] = bn(32)
    p["w3"], p["b3"] = conv(32, 32, 5)
    p["g3"], p["be3"], p["m3"], p["v3"] = bn(32)
    bound = 1.0 / math.sqrt(256)
    p["head_w"] = jax.random.uniform(next(ks), (num_classes, 256), jnp.float32,
                                     -bound, bound)
    p["head_b"] = jax.random.uniform(next(ks), (num_classes,), jnp.float32,
                                     -bound, bound)
    return p


def ref_forward(x, p):
    def stage(x, w, b, g, be, m, v):
        y = jax.lax.conv_general_dilated(
            x, w, (2, 2), "VALID",
            dimension_numbers=("NCHW", "OIHW", "NCHW"))
        y = y + b[None, :, None, None]
        y = g[None, :, None, None] * (y - m[None, :, None, None]) \
            / jnp.sqrt(v[None, :, None, None] + EPS) + be[None, :, None, None]
        return jnp.maximum(y, 0.0)

    x = stage(x, p["w1"], p["b1"], p["g1"], p["be1"], p["m1"], p["v1"])
    x = stage(x, p["w2"], p["b2"], p["g2"], p["be2"], p["m2"], p["v2"])
    x = stage(x, p["w3"], p["b3"], p["g3"], p["be3"], p["m3"], p["v3"])
    return x.reshape(x.shape[0], -1) @ p["head_w"].T + p["head_b"][None, :]


if __name__ == "__main__":
    key = jax.random.PRNGKey(0)
    kx, kp = jax.random.split(key)
    # Input spatial size dictated by head = Linear(256, 14):
    # 38x54 -> 17x25 -> 7x11 -> 2x4, and 32*2*4 = 256.
    x = jax.random.normal(kx, (2, 3, 38, 54), jnp.float32)
    params = init_params(kp, num_classes=14)

    fwd = build_dqn_forward(params, x.shape)
    out = jax.block_until_ready(fwd(x))
    ref = jax.block_until_ready(ref_forward(x, params))

    assert out.shape == (2, 14), out.shape
    np.testing.assert_allclose(np.asarray(out), np.asarray(ref),
                               rtol=1e-4, atol=1e-4)
    print("KERNEL_OK")
</pallas_src>

<mosaic_0001>
module attributes {stable_mosaic.version = 11 : i64} {
  func.func @_dqn_kernel(%arg0: memref<80x896xf32, #tpu.memory_space<vmem>>, %arg1: memref<16x80xf32, #tpu.memory_space<vmem>>, %arg2: memref<16x1xf32, #tpu.memory_space<vmem>>, %arg3: memref<32x400xf32, #tpu.memory_space<vmem>>, %arg4: memref<32x1xf32, #tpu.memory_space<vmem>>, %arg5: memref<768x256xf32, #tpu.memory_space<vmem>>, %arg6: memref<32x800xf32, #tpu.memory_space<vmem>>, %arg7: memref<32x1xf32, #tpu.memory_space<vmem>>, %arg8: memref<128x16xf32, #tpu.memory_space<vmem>>, %arg9: memref<8x14x32xf32, #tpu.memory_space<vmem>>, %arg10: memref<14x1xf32, #tpu.memory_space<vmem>>, %arg11: memref<14x2xf32, #tpu.memory_space<vmem>>, %arg12: memref<16x896xf32, #tpu.memory_space<vmem>>, %arg13: memref<400x768xf32, #tpu.memory_space<vmem>>, %arg14: memref<32x256xf32, #tpu.memory_space<vmem>>, %arg15: memref<800x128xf32, #tpu.memory_space<vmem>>) attributes {dimension_semantics = [], scalar_prefetch = 0 : i64, scratch_operands = 4 : i64, tpu.core_type = #tpu.core_type<tc>} {
    %c0 = arith.constant 0 : index
    %c0_0 = arith.constant 0 : index
    %0 = vector.load %arg1[%c0, %c0_0] : memref<16x80xf32, #tpu.memory_space<vmem>>, vector<16x80xf32>
    %c0_1 = arith.constant 0 : index
    %c0_2 = arith.constant 0 : index
    %1 = vector.load %arg0[%c0_1, %c0_2] : memref<80x896xf32, #tpu.memory_space<vmem>>, vector<80x896xf32>
    %cst = arith.constant dense<0.000000e+00> : vector<16x896xf32>
    %2 = tpu.matmul %0, %1, %cst {dimension_numbers = #tpu.dot_dimension_numbers<[1], [0], [0], [1], [0, 0, 1, 1], [], []>} : vector<16x80xf32>, vector<80x896xf32>, vector<16x896xf32> -> vector<16x896xf32>
    %c0_3 = arith.constant 0 : index
    %c0_4 = arith.constant 0 : index
    %3 = vector.load %arg2[%c0_3, %c0_4] : memref<16x1xf32, #tpu.memory_space<vmem>>, vector<16x1xf32>
    %4 = vector.broadcast %3 : vector<16x1xf32> to vector<16x896xf32>
    %5 = arith.addf %2, %4 : vector<16x896xf32>
    %cst_5 = arith.constant 0.000000e+00 : f32
    %6 = vector.broadcast %cst_5 : f32 to vector<16x896xf32>
    %7 = arith.maximumf %5, %6 : vector<16x896xf32>
    %c0_6 = arith.constant 0 : index
    %c0_7 = arith.constant 0 : index
    %8 = vector.load %arg12[%c0_6, %c0_7] : memref<16x896xf32, #tpu.memory_space<vmem>>, vector<16x896xf32>
    tpu.vector_store %arg12[%c0_6, %c0_7], %7 {strides = array<i32>} : memref<16x896xf32, #tpu.memory_space<vmem>>, vector<16x896xf32>,
    %c0_8 = arith.constant 0 : index
    %c0_9 = arith.constant 0 : index
    %9 = vector.load %arg12[%c0_8, %c0_9] : memref<16x896xf32, #tpu.memory_space<vmem>>, vector<16x768xf32>
    %c0_10 = arith.constant 0 : index
    %c0_11 = arith.constant 0 : index
    %10 = vector.load %arg13[%c0_10, %c0_11] : memref<400x768xf32, #tpu.memory_space<vmem>>, vector<16x768xf32>
    tpu.vector_store %arg13[%c0_10, %c0_11], %9 {strides = array<i32>} : memref<400x768xf32, #tpu.memory_space<vmem>>, vector<16x768xf32>,
    %c0_12 = arith.constant 0 : index
    %c1 = arith.constant 1 : index
    %11 = vector.load %arg12[%c0_12, %c1] : memref<16x896xf32, #tpu.memory_space<vmem>>, vector<16x768xf32>
    %c16 = arith.constant 16 : index
    %c0_13 = arith.constant 0 : index
    %12 = vector.load %arg13[%c16, %c0_13] : memref<400x768xf32, #tpu.memory_space<vmem>>, vector<16x768xf32>
    tpu.vector_store %arg13[%c16, %c0_13], %11 {strides = array<i32>} : memref<400x768xf32, #tpu.memory_space<vmem>>, vector<16x768xf32>,
    %c0_14 = arith.constant 0 : index
    %c2 = arith.constant 2 : index
    %13 = vector.load %arg12[%c0_14, %c2] : memref<16x896xf32, #tpu.memory_space<vmem>>, vector<16x768xf32>
    %c32 = arith.constant 32 : index
    %c0_15 = arith.constant 0 : index
    %14 = vector.load %arg13[%c32, %c0_15] : memref<400x768xf32, #tpu.memory_space<vmem>>, vector<16x768xf32>
    tpu.vector_store %arg13[%c32, %c0_15], %13 {strides = array<i32>} : memref<400x768xf32, #tpu.memory_space<vmem>>, vector<16x768xf32>,
    %c0_16 = arith.constant 0 : index
    %c3 = arith.constant 3 : index
    %15 = vector.load %arg12[%c0_16, %c3] : memref<16x896xf32, #tpu.memory_space<vmem>>, vector<16x768xf32>
    %c48 = arith.constant 48 : index
    %c0_17 = arith.constant 0 : index
    %16 = vector.load %arg13[%c48, %c0_17] : memref<400x768xf32, #tpu.memory_space<vmem>>, vector<16x768xf32>
    tpu.vector_store %arg13[%c48, %c0_17], %15 {strides = array<i32>} : memref<400x768xf32, #tpu.memory_space<vmem>>, vector<16x768xf32>,
    %c0_18 = arith.constant 0 : index
    %c4 = arith.constant 4 : index
    %17 = vector.load %arg12[%c0_18, %c4] : memref<16x896xf32, #tpu.memory_space<vmem>>, vector<16x768xf32>
    %c64 = arith.constant 64 : index
    %c0_19 = arith.constant 0 : index
    %18 = vector.load %arg13[%c64, %c0_19] : memref<400x768xf32, #tpu.memory_space<vmem>>, vector<16x768xf32>
    tpu.vector_store %arg13[%c64, %c0_19], %17 {strides = array<i32>} : memref<400x768xf32, #tpu.memory_space<vmem>>, vector<16x768xf32>,
    %c0_20 = arith.constant 0 : index
    %c25 = arith.constant 25 : index
    %19 = vector.load %arg12[%c0_20, %c25] : memref<16x896xf32, #tpu.memory_space<vmem>>, vector<16x768xf32>
    %c80 = arith.constant 80 : index
    %c0_21 = arith.constant 0 : index
    %20 = vector.load %arg13[%c80, %c0_21] : memref<400x768xf32, #tpu.memory_space<vmem>>, vector<16x768xf32>
    tpu.vector_store %arg13[%c80, %c0_21], %19 {strides = array<i32>} : memref<400x768xf32, #tpu.memory_space<vmem>>, vector<16x768xf32>,
    %c0_22 = arith.constant 0 : index
    %c26 = arith.constant 26 : index
    %21 = vector.load %arg12[%c0_22, %c26] : memref<16x896xf32, #tpu.memory_space<vmem>>, vector<16x768xf32>
    %c96 = arith.constant 96 : index
    %c0_23 = arith.constant 0 : index
    %22 = vector.load %arg13[%c96, %c0_23] : memref<400x768xf32, #tpu.memory_space<vmem>>, vector<16x768xf32>
    tpu.vector_store %arg13[%c96, %c0_23], %21 {strides = array<i32>} : memref<400x768xf32, #tpu.memory_space<vmem>>, vector<16x768xf32>,
    %c0_24 = arith.constant 0 : index
    %c27 = arith.constant 27 : index
    %23 = vector.load %arg12[%c0_24, %c27] : memref<16x896xf32, #tpu.memory_space<vmem>>, vector<16x768xf32>
    %c112 = arith.constant 112 : index
    %c0_25 = arith.constant 0 : index
    %24 = vector.load %arg13[%c112, %c0_25] : memref<400x768xf32, #tpu.memory_space<vmem>>, vector<16x768xf32>
    tpu.vector_store %arg13[%c112, %c0_25], %23 {strides = array<i32>} : memref<400x768xf32, #tpu.memory_space<vmem>>, vector<16x768xf32>,
    %c0_26 = arith.constant 0 : index
    %c28 = arith.constant 28 : index
    %25 = vector.load %arg12[%c0_26, %c28] : memref<16x896xf32, #tpu.memory_space<vmem>>, vector<16x768xf32>
    %c128 = arith.constant 128 : index
    %c0_27 = arith.constant 0 : index
    %26 = vector.load %arg13[%c128, %c0_27] : memref<400x768xf32, #tpu.memory_space<vmem>>, vector<16x768xf32>
    tpu.vector_store %arg13[%c128, %c0_27], %25 {strides = array<i32>} : memref<400x768xf32, #tpu.memory_space<vmem>>, vector<16x768xf32>,
    %c0_28 = arith.constant 0 : index
    %c29 = arith.constant 29 : index
    %27 = vector.load %arg12[%c0_28, %c29] : memref<16x896xf32, #tpu.memory_space<vmem>>, vector<16x768xf32>
    %c144 = arith.constant 144 : index
    %c0_29 = arith.constant 0 : index
    %28 = vector.load %arg13[%c144, %c0_29] : memref<400x768xf32, #tpu.memory_space<vmem>>, vector<16x768xf32>
    tpu.vector_store %arg13[%c144, %c0_29], %27 {strides = array<i32>} : memref<400x768xf32, #tpu.memory_space<vmem>>, vector<16x768xf32>,
    %c0_30 = arith.constant 0 : index
    %c50 = arith.constant 50 : index
    %29 = vector.load %arg12[%c0_30, %c50] : memref<16x896xf32, #tpu.memory_space<vmem>>, vector<16x768xf32>
    %c160 = arith.constant 160 : index
    %c0_31 = arith.constant 0 : index
    %30 = vector.load %arg13[%c160, %c0_31] : memref<400x768xf32, #tpu.memory_space<vmem>>, vector<16x768xf32>
    tpu.vector_store %arg13[%c160, %c0_31], %29 {strides = array<i32>} : memref<400x768xf32, #tpu.memory_space<vmem>>, vector<16x768xf32>,
    %c0_32 = arith.constant 0 : index
    %c51 = arith.constant 51 : index
    %31 = vector.load %arg12[%c0_32, %c51] : memref<16x896xf32, #tpu.memory_space<vmem>>, vector<16x768xf32>
    %c176 = arith.constant 176 : index
    %c0_33 = arith.constant 0 : index
    %32 = vector.load %arg13[%c176, %c0_33] : memref<400x768xf32, #tpu.memory_space<vmem>>, vector<16x768xf32>
    tpu.vector_store %arg13[%c176, %c0_33], %31 {strides = array<i32>} : memref<400x768xf32, #tpu.memory_space<vmem>>, vector<16x768xf32>,
    %c0_34 = arith.constant 0 : index
    %c52 = arith.constant 52 : index
    %33 = vector.load %arg12[%c0_34, %c52] : memref<16x896xf32, #tpu.memory_space<vmem>>, vector<16x768xf32>
    %c192 = arith.constant 192 : index
    %c0_35 = arith.constant 0 : index
    %34 = vector.load %arg13[%c192, %c0_35] : memref<400x768xf32, #tpu.memory_space<vmem>>, vector<16x768xf32>
    tpu.vector_store %arg13[%c192, %c0_35], %33 {strides = array<i32>} : memref<400x768xf32, #tpu.memory_space<vmem>>, vector<16x768xf32>,
    %c0_36 = arith.constant 0 : index
    %c53 = arith.constant 53 : index
    %35 = vector.load %arg12[%c0_36, %c53] : memref<16x896xf32, #tpu.memory_space<vmem>>, vector<16x768xf32>
    %c208 = arith.constant 208 : index
    %c0_37 = arith.constant 0 : index
    %36 = vector.load %arg13[%c208, %c0_37] : memref<400x768xf32, #tpu.memory_space<vmem>>, vector<16x768xf32>
    tpu.vector_store %arg13[%c208, %c0_37], %35 {strides = array<i32>} : memref<400x768xf32, #tpu.memory_space<vmem>>, vector<16x768xf32>,
    %c0_38 = arith.constant 0 : index
    %c54 = arith.constant 54 : index
    %37 = vector.load %arg12[%c0_38, %c54] : memref<16x896xf32, #tpu.memory_space<vmem>>, vector<16x768xf32>
    %c224 = arith.constant 224 : index
    %c0_39 = arith.constant 0 : index
    %38 = vector.load %arg13[%c224, %c0_39] : memref<400x768xf32, #tpu.memory_space<vmem>>, vector<16x768xf32>
    tpu.vector_store %arg13[%c224, %c0_39], %37 {strides = array<i32>} : memref<400x768xf32, #tpu.memory_space<vmem>>, vector<16x768xf32>,
    %c0_40 = arith.constant 0 : index
    %c75 = arith.constant 75 : index
    %39 = vector.load %arg12[%c0_40, %c75] : memref<16x896xf32, #tpu.memory_space<vmem>>, vector<16x768xf32>
    %c240 = arith.constant 240 : index
    %c0_41 = arith.constant 0 : index
    %40 = vector.load %arg13[%c240, %c0_41] : memref<400x768xf32, #tpu.memory_space<vmem>>, vector<16x768xf32>
    tpu.vector_store %arg13[%c240, %c0_41], %39 {strides = array<i32>} : memref<400x768xf32, #tpu.memory_space<vmem>>, vector<16x768xf32>,
    %c0_42 = arith.constant 0 : index
    %c76 = arith.constant 76 : index
    %41 = vector.load %arg12[%c0_42, %c76] : memref<16x896xf32, #tpu.memory_space<vmem>>, vector<16x768xf32>
    %c256 = arith.constant 256 : index
    %c0_43 = arith.constant 0 : index
    %42 = vector.load %arg13[%c256, %c0_43] : memref<400x768xf32, #tpu.memory_space<vmem>>, vector<16x768xf32>
    tpu.vector_store %arg13[%c256, %c0_43], %41 {strides = array<i32>} : memref<400x768xf32, #tpu.memory_space<vmem>>, vector<16x768xf32>,
    %c0_44 = arith.constant 0 : index
    %c77 = arith.constant 77 : index
    %43 = vector.load %arg12[%c0_44, %c77] : memref<16x896xf32, #tpu.memory_space<vmem>>, vector<16x768xf32>
    %c272 = arith.constant 272 : index
    %c0_45 = arith.constant 0 : index
    %44 = vector.load %arg13[%c272, %c0_45] : memref<400x768xf32, #tpu.memory_space<vmem>>, vector<16x768xf32>
    tpu.vector_store %arg13[%c272, %c0_45], %43 {strides = array<i32>} : memref<400x768xf32, #tpu.memory_space<vmem>>, vector<16x768xf32>,
    %c0_46 = arith.constant 0 : index
    %c78 = arith.constant 78 : index
    %45 = vector.load %arg12[%c0_46, %c78] : memref<16x896xf32, #tpu.memory_space<vmem>>, vector<16x768xf32>
    %c288 = arith.constant 288 : index
    %c0_47 = arith.constant 0 : index
    %46 = vector.load %arg13[%c288, %c0_47] : memref<400x768xf32, #tpu.memory_space<vmem>>, vector<16x768xf32>
    tpu.vector_store %arg13[%c288, %c0_47], %45 {strides = array<i32>} : memref<400x768xf32, #tpu.memory_space<vmem>>, vector<16x768xf32>,
    %c0_48 = arith.constant 0 : index
    %c79 = arith.constant 79 : index
    %47 = vector.load %arg12[%c0_48, %c79] : memref<16x896xf32, #tpu.memory_space<vmem>>, vector<16x768xf32>
    %c304 = arith.constant 304 : index
    %c0_49 = arith.constant 0 : index
    %48 = vector.load %arg13[%c304, %c0_49] : memref<400x768xf32, #tpu.memory_space<vmem>>, vector<16x768xf32>
    tpu.vector_store %arg13[%c304, %c0_49], %47 {strides = array<i32>} : memref<400x768xf32, #tpu.memory_space<vmem>>, vector<16x768xf32>,
    %c0_50 = arith.constant 0 : index
    %c100 = arith.constant 100 : index
    %49 = vector.load %arg12[%c0_50, %c100] : memref<16x896xf32, #tpu.memory_space<vmem>>, vector<16x768xf32>
    %c320 = arith.constant 320 : index
    %c0_51 = arith.constant 0 : index
    %50 = vector.load %arg13[%c320, %c0_51] : memref<400x768xf32, #tpu.memory_space<vmem>>, vector<16x768xf32>
    tpu.vector_store %arg13[%c320, %c0_51], %49 {strides = array<i32>} : memref<400x768xf32, #tpu.memory_space<vmem>>, vector<16x768xf32>,
    %c0_52 = arith.constant 0 : index
    %c101 = arith.constant 101 : index
    %51 = vector.load %arg12[%c0_52, %c101] : memref<16x896xf32, #tpu.memory_space<vmem>>, vector<16x768xf32>
    %c336 = arith.constant 336 : index
    %c0_53 = arith.constant 0 : index
    %52 = vector.load %arg13[%c336, %c0_53] : memref<400x768xf32, #tpu.memory_space<vmem>>, vector<16x768xf32>
    tpu.vector_store %arg13[%c336, %c0_53], %51 {strides = array<i32>} : memref<400x768xf32, #tpu.memory_space<vmem>>, vector<16x768xf32>,
    %c0_54 = arith.constant 0 : index
    %c102 = arith.constant 102 : index
    %53 = vector.load %arg12[%c0_54, %c102] : memref<16x896xf32, #tpu.memory_space<vmem>>, vector<16x768xf32>
    %c352 = arith.constant 352 : index
    %c0_55 = arith.constant 0 : index
    %54 = vector.load %arg13[%c352, %c0_55] : memref<400x768xf32, #tpu.memory_space<vmem>>, vector<16x768xf32>
    tpu.vector_store %arg13[%c352, %c0_55], %53 {strides = array<i32>} : memref<400x768xf32, #tpu.memory_space<vmem>>, vector<16x768xf32>,
    %c0_56 = arith.constant 0 : index
    %c103 = arith.constant 103 : index
    %55 = vector.load %arg12[%c0_56, %c103] : memref<16x896xf32, #tpu.memory_space<vmem>>, vector<16x768xf32>
    %c368 = arith.constant 368 : index
    %c0_57 = arith.constant 0 : index
    %56 = vector.load %arg13[%c368, %c0_57] : memref<400x768xf32, #tpu.memory_space<vmem>>, vector<16x768xf32>
    tpu.vector_store %arg13[%c368, %c0_57], %55 {strides = array<i32>} : memref<400x768xf32, #tpu.memory_space<vmem>>, vector<16x768xf32>,
    %c0_58 = arith.constant 0 : index
    %c104 = arith.constant 104 : index
    %57 = vector.load %arg12[%c0_58, %c104] : memref<16x896xf32, #tpu.memory_space<vmem>>, vector<16x768xf32>
    %c384 = arith.constant 384 : index
    %c0_59 = arith.constant 0 : index
    %58 = vector.load %arg13[%c384, %c0_59] : memref<400x768xf32, #tpu.memory_space<vmem>>, vector<16x768xf32>
    tpu.vector_store %arg13[%c384, %c0_59], %57 {strides = array<i32>} : memref<400x768xf32, #tpu.memory_space<vmem>>, vector<16x768xf32>,
    %c0_60 = arith.constant 0 : index
    %c0_61 = arith.constant 0 : index
    %59 = vector.load %arg3[%c0_60, %c0_61] : memref<32x400xf32, #tpu.memory_space<vmem>>, vector<32x400xf32>
    %c0_62 = arith.constant 0 : index
    %c0_63 = arith.constant 0 : index
    %60 = vector.load %arg13[%c0_62, %c0_63] : memref<400x768xf32, #tpu.memory_space<vmem>>, vector<400x768xf32>
    %cst_64 = arith.constant dense<0.000000e+00> : vector<32x768xf32>
    %61 = tpu.matmul %59, %60, %cst_64 {dimension_numbers = #tpu.dot_dimension_numbers<[1], [0], [0], [1], [0, 0, 1, 1], [], []>} : vector<32x400xf32>, vector<400x768xf32>, vector<32x768xf32> -> vector<32x768xf32>
    %c0_65 = arith.constant 0 : index
    %c0_66 = arith.constant 0 : index
    %62 = vector.load %arg4[%c0_65, %c0_66] : memref<32x1xf32, #tpu.memory_space<vmem>>, vector<32x1xf32>
    %63 = vector.broadcast %62 : vector<32x1xf32> to vector<32x768xf32>
    %64 = arith.addf %61, %63 : vector<32x768xf32>
    %cst_67 = arith.constant 0.000000e+00 : f32
    %65 = vector.broadcast %cst_67 : f32 to vector<32x768xf32>
    %66 = arith.maximumf %64, %65 : vector<32x768xf32>
    %c0_68 = arith.constant 0 : index
    %c0_69 = arith.constant 0 : index
    %67 = vector.load %arg5[%c0_68, %c0_69] : memref<768x256xf32, #tpu.memory_space<vmem>>, vector<768x256xf32>
    %cst_70 = arith.constant dense<0.000000e+00> : vector<32x256xf32>
    %68 = tpu.matmul %66, %67, %cst_70 {dimension_numbers = #tpu.dot_dimension_numbers<[1], [0], [0], [1], [0, 0, 1, 1], [], []>} : vector<32x768xf32>, vector<768x256xf32>, vector<32x256xf32> -> vector<32x256xf32>
    %c0_71 = arith.constant 0 : index
    %c0_72 = arith.constant 0 : index
    %69 = vector.load %arg14[%c0_71, %c0_72] : memref<32x256xf32, #tpu.memory_space<vmem>>, vector<32x256xf32>
    tpu.vector_store %arg14[%c0_71, %c0_72], %68 {strides = array<i32>} : memref<32x256xf32, #tpu.memory_space<vmem>>, vector<32x256xf32>,
    %c0_73 = arith.constant 0 : index
    %c0_74 = arith.constant 0 : index
    %70 = vector.load %arg14[%c0_73, %c0_74] : memref<32x256xf32, #tpu.memory_space<vmem>>, vector<32x128xf32>
    %c0_75 = arith.constant 0 : index
    %c0_76 = arith.constant 0 : index
    %71 = vector.load %arg15[%c0_75, %c0_76] : memref<800x128xf32, #tpu.memory_space<vmem>>, vector<32x128xf32>
    tpu.vector_store %arg15[%c0_75, %c0_76], %70 {strides = array<i32>} : memref<800x128xf32, #tpu.memory_space<vmem>>, vector<32x128xf32>,
    %c0_77 = arith.constant 0 : index
    %c1_78 = arith.constant 1 : index
    %72 = vector.load %arg14[%c0_77, %c1_78] : memref<32x256xf32, #tpu.memory_space<vmem>>, vector<32x128xf32>
    %c32_79 = arith.constant 32 : index
    %c0_80 = arith.constant 0 : index
    %73 = vector.load %arg15[%c32_79, %c0_80] : memref<800x128xf32, #tpu.memory_space<vmem>>, vector<32x128xf32>
    tpu.vector_store %arg15[%c32_79, %c0_80], %72 {strides = array<i32>} : memref<800x128xf32, #tpu.memory_space<vmem>>, vector<32x128xf32>,
    %c0_81 = arith.constant 0 : index
    %c2_82 = arith.constant 2 : index
    %74 = vector.load %arg14[%c0_81, %c2_82] : memref<32x256xf32, #tpu.memory_space<vmem>>, vector<32x128xf32>
    %c64_83 = arith.constant 64 : index
    %c0_84 = arith.constant 0 : index
    %75 = vector.load %arg15[%c64_83, %c0_84] : memref<800x128xf32, #tpu.memory_space<vmem>>, vector<32x128xf32>
    tpu.vector_store %arg15[%c64_83, %c0_84], %74 {strides = array<i32>} : memref<800x128xf32, #tpu.memory_space<vmem>>, vector<32x128xf32>,
    %c0_85 = arith.constant 0 : index
    %c3_86 = arith.constant 3 : index
    %76 = vector.load %arg14[%c0_85, %c3_86] : memref<32x256xf32, #tpu.memory_space<vmem>>, vector<32x128xf32>
    %c96_87 = arith.constant 96 : index
    %c0_88 = arith.constant 0 : index
    %77 = vector.load %arg15[%c96_87, %c0_88] : memref<800x128xf32, #tpu.memory_space<vmem>>, vector<32x128xf32>
    tpu.vector_store %arg15[%c96_87, %c0_88], %76 {strides = array<i32>} : memref<800x128xf32, #tpu.memory_space<vmem>>, vector<32x128xf32>,
    %c0_89 = arith.constant 0 : index
    %c4_90 = arith.constant 4 : index
    %78 = vector.load %arg14[%c0_89, %c4_90] : memref<32x256xf32, #tpu.memory_space<vmem>>, vector<32x128xf32>
    %c128_91 = arith.constant 128 : index
    %c0_92 = arith.constant 0 : index
    %79 = vector.load %arg15[%c128_91, %c0_92] : memref<800x128xf32, #tpu.memory_space<vmem>>, vector<32x128xf32>
    tpu.vector_store %arg15[%c128_91, %c0_92], %78 {strides = array<i32>} : memref<800x128xf32, #tpu.memory_space<vmem>>, vector<32x128xf32>,
    %c0_93 = arith.constant 0 : index
    %c11 = arith.constant 11 : index
    %80 = vector.load %arg14[%c0_93, %c11] : memref<32x256xf32, #tpu.memory_space<vmem>>, vector<32x128xf32>
    %c160_94 = arith.constant 160 : index
    %c0_95 = arith.constant 0 : index
    %81 = vector.load %arg15[%c160_94, %c0_95] : memref<800x128xf32, #tpu.memory_space<vmem>>, vector<32x128xf32>
    tpu.vector_store %arg15[%c160_94, %c0_95], %80 {strides = array<i32>} : memref<800x128xf32, #tpu.memory_space<vmem>>, vector<32x128xf32>,
    %c0_96 = arith.constant 0 : index
    %c12 = arith.constant 12 : index
    %82 = vector.load %arg14[%c0_96, %c12] : memref<32x256xf32, #tpu.memory_space<vmem>>, vector<32x128xf32>
    %c192_97 = arith.constant 192 : index
    %c0_98 = arith.constant 0 : index
    %83 = vector.load %arg15[%c192_97, %c0_98] : memref<800x128xf32, #tpu.memory_space<vmem>>, vector<32x128xf32>
    tpu.vector_store %arg15[%c192_97, %c0_98], %82 {strides = array<i32>} : memref<800x128xf32, #tpu.memory_space<vmem>>, vector<32x128xf32>,
    %c0_99 = arith.constant 0 : index
    %c13 = arith.constant 13 : index
    %84 = vector.load %arg14[%c0_99, %c13] : memref<32x256xf32, #tpu.memory_space<vmem>>, vector<32x128xf32>
    %c224_100 = arith.constant 224 : index
    %c0_101 = arith.constant 0 : index
    %85 = vector.load %arg15[%c224_100, %c0_101] : memref<800x128xf32, #tpu.memory_space<vmem>>, vector<32x128xf32>
    tpu.vector_store %arg15[%c224_100, %c0_101], %84 {strides = array<i32>} : memref<800x128xf32, #tpu.memory_space<vmem>>, vector<32x128xf32>,
    %c0_102 = arith.constant 0 : index
    %c14 = arith.constant 14 : index
    %86 = vector.load %arg14[%c0_102, %c14] : memref<32x256xf32, #tpu.memory_space<vmem>>, vector<32x128xf32>
    %c256_103 = arith.constant 256 : index
    %c0_104 = arith.constant 0 : index
    %87 = vector.load %arg15[%c256_103, %c0_104] : memref<800x128xf32, #tpu.memory_space<vmem>>, vector<32x128xf32>
    tpu.vector_store %arg15[%c256_103, %c0_104], %86 {strides = array<i32>} : memref<800x128xf32, #tpu.memory_space<vmem>>, vector<32x128xf32>,
    %c0_105 = arith.constant 0 : index
    %c15 = arith.constant 15 : index
    %88 = vector.load %arg14[%c0_105, %c15] : memref<32x256xf32, #tpu.memory_space<vmem>>, vector<32x128xf32>
    %c288_106 = arith.constant 288 : index
    %c0_107 = arith.constant 0 : index
    %89 = vector.load %arg15[%c288_106, %c0_107] : memref<800x128xf32, #tpu.memory_space<vmem>>, vector<32x128xf32>
    tpu.vector_store %arg15[%c288_106, %c0_107], %88 {strides = array<i32>} : memref<800x128xf32, #tpu.memory_space<vmem>>, vector<32x128xf32>,
    %c0_108 = arith.constant 0 : index
    %c22 = arith.constant 22 : index
    %90 = vector.load %arg14[%c0_108, %c22] : memref<32x256xf32, #tpu.memory_space<vmem>>, vector<32x128xf32>
    %c320_109 = arith.constant 320 : index
    %c0_110 = arith.constant 0 : index
    %91 = vector.load %arg15[%c320_109, %c0_110] : memref<800x128xf32, #tpu.memory_space<vmem>>, vector<32x128xf32>
    tpu.vector_store %arg15[%c320_109, %c0_110], %90 {strides = array<i32>} : memref<800x128xf32, #tpu.memory_space<vmem>>, vector<32x128xf32>,
    %c0_111 = arith.constant 0 : index
    %c23 = arith.constant 23 : index
    %92 = vector.load %arg14[%c0_111, %c23] : memref<32x256xf32, #tpu.memory_space<vmem>>, vector<32x128xf32>
    %c352_112 = arith.constant 352 : index
    %c0_113 = arith.constant 0 : index
    %93 = vector.load %arg15[%c352_112, %c0_113] : memref<800x128xf32, #tpu.memory_space<vmem>>, vector<32x128xf32>
    tpu.vector_store %arg15[%c352_112, %c0_113], %92 {strides = array<i32>} : memref<800x128xf32, #tpu.memory_space<vmem>>, vector<32x128xf32>,
    %c0_114 = arith.constant 0 : index
    %c24 = arith.constant 24 : index
    %94 = vector.load %arg14[%c0_114, %c24] : memref<32x256xf32, #tpu.memory_space<vmem>>, vector<32x128xf32>
    %c384_115 = arith.constant 384 : index
    %c0_116 = arith.constant 0 : index
    %95 = vector.load %arg15[%c384_115, %c0_116] : memref<800x128xf32, #tpu.memory_space<vmem>>, vector<32x128xf32>
    tpu.vector_store %arg15[%c384_115, %c0_116], %94 {strides = array<i32>} : memref<800x128xf32, #tpu.memory_space<vmem>>, vector<32x128xf32>,
    %c0_117 = arith.constant 0 : index
    %c25_118 = arith.constant 25 : index
    %96 = vector.load %arg14[%c0_117, %c25_118] : memref<32x256xf32, #tpu.memory_space<vmem>>, vector<32x128xf32>
    %c416 = arith.constant 416 : index
    %c0_119 = arith.constant 0 : index
    %97 = vector.load %arg15[%c416, %c0_119] : memref<800x128xf32, #tpu.memory_space<vmem>>, vector<32x128xf32>
    tpu.vector_store %arg15[%c416, %c0_119], %96 {strides = array<i32>} : memref<800x128xf32, #tpu.memory_space<vmem>>, vector<32x128xf32>,
    %c0_120 = arith.constant 0 : index
    %c26_121 = arith.constant 26 : index
    %98 = vector.load %arg14[%c0_120, %c26_121] : memref<32x256xf32, #tpu.memory_space<vmem>>, vector<32x128xf32>
    %c448 = arith.constant 448 : index
    %c0_122 = arith.constant 0 : index
    %99 = vector.load %arg15[%c448, %c0_122] : memref<800x128xf32, #tpu.memory_space<vmem>>, vector<32x128xf32>
    tpu.vector_store %arg15[%c448, %c0_122], %98 {strides = array<i32>} : memref<800x128xf32, #tpu.memory_space<vmem>>, vector<32x128xf32>,
    %c0_123 = arith.constant 0 : index
    %c33 = arith.constant 33 : index
    %100 = vector.load %arg14[%c0_123, %c33] : memref<32x256xf32, #tpu.memory_space<vmem>>, vector<32x128xf32>
    %c480 = arith.constant 480 : index
    %c0_124 = arith.constant 0 : index
    %101 = vector.load %arg15[%c480, %c0_124] : memref<800x128xf32, #tpu.memory_space<vmem>>, vector<32x128xf32>
    tpu.vector_store %arg15[%c480, %c0_124], %100 {strides = array<i32>} : memref<800x128xf32, #tpu.memory_space<vmem>>, vector<32x128xf32>,
    %c0_125 = arith.constant 0 : index
    %c34 = arith.constant 34 : index
    %102 = vector.load %arg14[%c0_125, %c34] : memref<32x256xf32, #tpu.memory_space<vmem>>, vector<32x128xf32>
    %c512 = arith.constant 512 : index
    %c0_126 = arith.constant 0 : index
    %103 = vector.load %arg15[%c512, %c0_126] : memref<800x128xf32, #tpu.memory_space<vmem>>, vector<32x128xf32>
    tpu.vector_store %arg15[%c512, %c0_126], %102 {strides = array<i32>} : memref<800x128xf32, #tpu.memory_space<vmem>>, vector<32x128xf32>,
    %c0_127 = arith.constant 0 : index
    %c35 = arith.constant 35 : index
    %104 = vector.load %arg14[%c0_127, %c35] : memref<32x256xf32, #tpu.memory_space<vmem>>, vector<32x128xf32>
    %c544 = arith.constant 544 : index
    %c0_128 = arith.constant 0 : index
    %105 = vector.load %arg15[%c544, %c0_128] : memref<800x128xf32, #tpu.memory_space<vmem>>, vector<32x128xf32>
    tpu.vector_store %arg15[%c544, %c0_128], %104 {strides = array<i32>} : memref<800x128xf32, #tpu.memory_space<vmem>>, vector<32x128xf32>,
    %c0_129 = arith.constant 0 : index
    %c36 = arith.constant 36 : index
    %106 = vector.load %arg14[%c0_129, %c36] : memref<32x256xf32, #tpu.memory_space<vmem>>, vector<32x128xf32>
    %c576 = arith.constant 576 : index
    %c0_130 = arith.constant 0 : index
    %107 = vector.load %arg15[%c576, %c0_130] : memref<800x128xf32, #tpu.memory_space<vmem>>, vector<32x128xf32>
    tpu.vector_store %arg15[%c576, %c0_130], %106 {strides = array<i32>} : memref<800x128xf32, #tpu.memory_space<vmem>>, vector<32x128xf32>,
    %c0_131 = arith.constant 0 : index
    %c37 = arith.constant 37 : index
    %108 = vector.load %arg14[%c0_131, %c37] : memref<32x256xf32, #tpu.memory_space<vmem>>, vector<32x128xf32>
    %c608 = arith.constant 608 : index
    %c0_132 = arith.constant 0 : index
    %109 = vector.load %arg15[%c608, %c0_132] : memref<800x128xf32, #tpu.memory_space<vmem>>, vector<32x128xf32>
    tpu.vector_store %arg15[%c608, %c0_132], %108 {strides = array<i32>} : memref<800x128xf32, #tpu.memory_space<vmem>>, vector<32x128xf32>,
    %c0_133 = arith.constant 0 : index
    %c44 = arith.constant 44 : index
    %110 = vector.load %arg14[%c0_133, %c44] : memref<32x256xf32, #tpu.memory_space<vmem>>, vector<32x128xf32>
    %c640 = arith.constant 640 : index
    %c0_134 = arith.constant 0 : index
    %111 = vector.load %arg15[%c640, %c0_134] : memref<800x128xf32, #tpu.memory_space<vmem>>, vector<32x128xf32>
    tpu.vector_store %arg15[%c640, %c0_134], %110 {strides = array<i32>} : memref<800x128xf32, #tpu.memory_space<vmem>>, vector<32x128xf32>,
    %c0_135 = arith.constant 0 : index
    %c45 = arith.constant 45 : index
    %112 = vector.load %arg14[%c0_135, %c45] : memref<32x256xf32, #tpu.memory_space<vmem>>, vector<32x128xf32>
    %c672 = arith.constant 672 : index
    %c0_136 = arith.constant 0 : index
    %113 = vector.load %arg15[%c672, %c0_136] : memref<800x128xf32, #tpu.memory_space<vmem>>, vector<32x128xf32>
    tpu.vector_store %arg15[%c672, %c0_136], %112 {strides = array<i32>} : memref<800x128xf32, #tpu.memory_space<vmem>>, vector<32x128xf32>,
    %c0_137 = arith.constant 0 : index
    %c46 = arith.constant 46 : index
    %114 = vector.load %arg14[%c0_137, %c46] : memref<32x256xf32, #tpu.memory_space<vmem>>, vector<32x128xf32>
    %c704 = arith.constant 704 : index
    %c0_138 = arith.constant 0 : index
    %115 = vector.load %arg15[%c704, %c0_138] : memref<800x128xf32, #tpu.memory_space<vmem>>, vector<32x128xf32>
    tpu.vector_store %arg15[%c704, %c0_138], %114 {strides = array<i32>} : memref<800x128xf32, #tpu.memory_space<vmem>>, vector<32x128xf32>,
    %c0_139 = arith.constant 0 : index
    %c47 = arith.constant 47 : index
    %116 = vector.load %arg14[%c0_139, %c47] : memref<32x256xf32, #tpu.memory_space<vmem>>, vector<32x128xf32>
    %c736 = arith.constant 736 : index
    %c0_140 = arith.constant 0 : index
    %117 = vector.load %arg15[%c736, %c0_140] : memref<800x128xf32, #tpu.memory_space<vmem>>, vector<32x128xf32>
    tpu.vector_store %arg15[%c736, %c0_140], %116 {strides = array<i32>} : memref<800x128xf32, #tpu.memory_space<vmem>>, vector<32x128xf32>,
    %c0_141 = arith.constant 0 : index
    %c48_142 = arith.constant 48 : index
    %118 = vector.load %arg14[%c0_141, %c48_142] : memref<32x256xf32, #tpu.memory_space<vmem>>, vector<32x128xf32>
    %c768 = arith.constant 768 : index
    %c0_143 = arith.constant 0 : index
    %119 = vector.load %arg15[%c768, %c0_143] : memref<800x128xf32, #tpu.memory_space<vmem>>, vector<32x128xf32>
    tpu.vector_store %arg15[%c768, %c0_143], %118 {strides = array<i32>} : memref<800x128xf32, #tpu.memory_space<vmem>>, vector<32x128xf32>,
    %c0_144 = arith.constant 0 : index
    %c0_145 = arith.constant 0 : index
    %120 = vector.load %arg6[%c0_144, %c0_145] : memref<32x800xf32, #tpu.memory_space<vmem>>, vector<32x800xf32>
    %c0_146 = arith.constant 0 : index
    %c0_147 = arith.constant 0 : index
    %121 = vector.load %arg15[%c0_146, %c0_147] : memref<800x128xf32, #tpu.memory_space<vmem>>, vector<800x128xf32>
    %cst_148 = arith.constant dense<0.000000e+00> : vector<32x128xf32>
    %122 = tpu.matmul %120, %121, %cst_148 {dimension_numbers = #tpu.dot_dimension_numbers<[1], [0], [0], [1], [0, 0, 1, 1], [], []>} : vector<32x800xf32>, vector<800x128xf32>, vector<32x128xf32> -> vector<32x128xf32>
    %c0_149 = arith.constant 0 : index
    %c0_150 = arith.constant 0 : index
    %123 = vector.load %arg7[%c0_149, %c0_150] : memref<32x1xf32, #tpu.memory_space<vmem>>, vector<32x1xf32>
    %124 = vector.broadcast %123 : vector<32x1xf32> to vector<32x128xf32>
    %125 = arith.addf %122, %124 : vector<32x128xf32>
    %cst_151 = arith.constant 0.000000e+00 : f32
    %126 = vector.broadcast %cst_151 : f32 to vector<32x128xf32>
    %127 = arith.maximumf %125, %126 : vector<32x128xf32>
    %c0_152 = arith.constant 0 : index
    %c0_153 = arith.constant 0 : index
    %128 = vector.load %arg8[%c0_152, %c0_153] : memref<128x16xf32, #tpu.memory_space<vmem>>, vector<128x16xf32>
    %cst_154 = arith.constant dense<0.000000e+00> : vector<32x16xf32>
    %129 = tpu.matmul %127, %128, %cst_154 {dimension_numbers = #tpu.dot_dimension_numbers<[1], [0], [0], [1], [0, 0, 1, 1], [], []>} : vector<32x128xf32>, vector<128x16xf32>, vector<32x16xf32> -> vector<32x16xf32>
    %cst_155 = arith.constant 0.000000e+00 : f32
    %130 = vector.broadcast %cst_155 : f32 to vector<14x2xf32>
    %c0_156 = arith.constant 0 : index
    %c0_157 = arith.constant 0 : index
    %c0_158 = arith.constant 0 : index
    %131 = vector.load %arg9[%c0_156, %c0_157, %c0_158] : memref<8x14x32xf32, #tpu.memory_space<vmem>>, vector<1x14x32xf32>
    %132 = vector.shape_cast %131 : vector<1x14x32xf32> to vector<14x32xf32>
    %133 = vector.extract_strided_slice %129 {offsets = [0, 0], sizes = [32, 2], strides = [1, 1]} : vector<32x16xf32> to vector<32x2xf32>
    %cst_159 = arith.constant dense<0.000000e+00> : vector<14x2xf32>
    %134 = tpu.matmul %132, %133, %cst_159 {dimension_numbers = #tpu.dot_dimension_numbers<[1], [0], [0], [1], [0, 0, 1, 1], [], []>} : vector<14x32xf32>, vector<32x2xf32>, vector<14x2xf32> -> vector<14x2xf32>
    %135 = arith.addf %130, %134 : vector<14x2xf32>
    %c1_160 = arith.constant 1 : index
    %c0_161 = arith.constant 0 : index
    %c0_162 = arith.constant 0 : index
    %136 = vector.load %arg9[%c1_160, %c0_161, %c0_162] : memref<8x14x32xf32, #tpu.memory_space<vmem>>, vector<1x14x32xf32>
    %137 = vector.shape_cast %136 : vector<1x14x32xf32> to vector<14x32xf32>
    %138 = vector.extract_strided_slice %129 {offsets = [0, 2], sizes = [32, 2], strides = [1, 1]} : vector<32x16xf32> to vector<32x2xf32>
    %cst_163 = arith.constant dense<0.000000e+00> : vector<14x2xf32>
    %139 = tpu.matmul %137, %138, %cst_163 {dimension_numbers = #tpu.dot_dimension_numbers<[1], [0], [0], [1], [0, 0, 1, 1], [], []>} : vector<14x32xf32>, vector<32x2xf32>, vector<14x2xf32> -> vector<14x2xf32>
    %140 = arith.addf %135, %139 : vector<14x2xf32>
    %c2_164 = arith.constant 2 : index
    %c0_165 = arith.constant 0 : index
    %c0_166 = arith.constant 0 : index
    %141 = vector.load %arg9[%c2_164, %c0_165, %c0_166] : memref<8x14x32xf32, #tpu.memory_space<vmem>>, vector<1x14x32xf32>
    %142 = vector.shape_cast %141 : vector<1x14x32xf32> to vector<14x32xf32>
    %143 = vector.extract_strided_slice %129 {offsets = [0, 4], sizes = [32, 2], strides = [1, 1]} : vector<32x16xf32> to vector<32x2xf32>
    %cst_167 = arith.constant dense<0.000000e+00> : vector<14x2xf32>
    %144 = tpu.matmul %142, %143, %cst_167 {dimension_numbers = #tpu.dot_dimension_numbers<[1], [0], [0], [1], [0, 0, 1, 1], [], []>} : vector<14x32xf32>, vector<32x2xf32>, vector<14x2xf32> -> vector<14x2xf32>
    %145 = arith.addf %140, %144 : vector<14x2xf32>
    %c3_168 = arith.constant 3 : index
    %c0_169 = arith.constant 0 : index
    %c0_170 = arith.constant 0 : index
    %146 = vector.load %arg9[%c3_168, %c0_169, %c0_170] : memref<8x14x32xf32, #tpu.memory_space<vmem>>, vector<1x14x32xf32>
    %147 = vector.shape_cast %146 : vector<1x14x32xf32> to vector<14x32xf32>
    %148 = vector.extract_strided_slice %129 {offsets = [0, 6], sizes = [32, 2], strides = [1, 1]} : vector<32x16xf32> to vector<32x2xf32>
    %cst_171 = arith.constant dense<0.000000e+00> : vector<14x2xf32>
    %149 = tpu.matmul %147, %148, %cst_171 {dimension_numbers = #tpu.dot_dimension_numbers<[1], [0], [0], [1], [0, 0, 1, 1], [], []>} : vector<14x32xf32>, vector<32x2xf32>, vector<14x2xf32> -> vector<14x2xf32>
    %150 = arith.addf %145, %149 : vector<14x2xf32>
    %c4_172 = arith.constant 4 : index
    %c0_173 = arith.constant 0 : index
    %c0_174 = arith.constant 0 : index
    %151 = vector.load %arg9[%c4_172, %c0_173, %c0_174] : memref<8x14x32xf32, #tpu.memory_space<vmem>>, vector<1x14x32xf32>
    %152 = vector.shape_cast %151 : vector<1x14x32xf32> to vector<14x32xf32>
    %153 = vector.extract_strided_slice %129 {offsets = [0, 8], sizes = [32, 2], strides = [1, 1]} : vector<32x16xf32> to vector<32x2xf32>
    %cst_175 = arith.constant dense<0.000000e+00> : vector<14x2xf32>
    %154 = tpu.matmul %152, %153, %cst_175 {dimension_numbers = #tpu.dot_dimension_numbers<[1], [0], [0], [1], [0, 0, 1, 1], [], []>} : vector<14x32xf32>, vector<32x2xf32>, vector<14x2xf32> -> vector<14x2xf32>
    %155 = arith.addf %150, %154 : vector<14x2xf32>
    %c5 = arith.constant 5 : index
    %c0_176 = arith.constant 0 : index
    %c0_177 = arith.constant 0 : index
    %156 = vector.load %arg9[%c5, %c0_176, %c0_177] : memref<8x14x32xf32, #tpu.memory_space<vmem>>, vector<1x14x32xf32>
    %157 = vector.shape_cast %156 : vector<1x14x32xf32> to vector<14x32xf32>
    %158 = vector.extract_strided_slice %129 {offsets = [0, 10], sizes = [32, 2], strides = [1, 1]} : vector<32x16xf32> to vector<32x2xf32>
    %cst_178 = arith.constant dense<0.000000e+00> : vector<14x2xf32>
    %159 = tpu.matmul %157, %158, %cst_178 {dimension_numbers = #tpu.dot_dimension_numbers<[1], [0], [0], [1], [0, 0, 1, 1], [], []>} : vector<14x32xf32>, vector<32x2xf32>, vector<14x2xf32> -> vector<14x2xf32>
    %160 = arith.addf %155, %159 : vector<14x2xf32>
    %c6 = arith.constant 6 : index
    %c0_179 = arith.constant 0 : index
    %c0_180 = arith.constant 0 : index
    %161 = vector.load %arg9[%c6, %c0_179, %c0_180] : memref<8x14x32xf32, #tpu.memory_space<vmem>>, vector<1x14x32xf32>
    %162 = vector.shape_cast %161 : vector<1x14x32xf32> to vector<14x32xf32>
    %163 = vector.extract_strided_slice %129 {offsets = [0, 12], sizes = [32, 2], strides = [1, 1]} : vector<32x16xf32> to vector<32x2xf32>
    %cst_181 = arith.constant dense<0.000000e+00> : vector<14x2xf32>
    %164 = tpu.matmul %162, %163, %cst_181 {dimension_numbers = #tpu.dot_dimension_numbers<[1], [0], [0], [1], [0, 0, 1, 1], [], []>} : vector<14x32xf32>, vector<32x2xf32>, vector<14x2xf32> -> vector<14x2xf32>
    %165 = arith.addf %160, %164 : vector<14x2xf32>
    %c7 = arith.constant 7 : index
    %c0_182 = arith.constant 0 : index
    %c0_183 = arith.constant 0 : index
    %166 = vector.load %arg9[%c7, %c0_182, %c0_183] : memref<8x14x32xf32, #tpu.memory_space<vmem>>, vector<1x14x32xf32>
    %167 = vector.shape_cast %166 : vector<1x14x32xf32> to vector<14x32xf32>
    %168 = vector.extract_strided_slice %129 {offsets = [0, 14], sizes = [32, 2], strides = [1, 1]} : vector<32x16xf32> to vector<32x2xf32>
    %cst_184 = arith.constant dense<0.000000e+00> : vector<14x2xf32>
    %169 = tpu.matmul %167, %168, %cst_184 {dimension_numbers = #tpu.dot_dimension_numbers<[1], [0], [0], [1], [0, 0, 1, 1], [], []>} : vector<14x32xf32>, vector<32x2xf32>, vector<14x2xf32> -> vector<14x2xf32>
    %170 = arith.addf %165, %169 : vector<14x2xf32>
    %c0_185 = arith.constant 0 : index
    %c0_186 = arith.constant 0 : index
    %171 = vector.load %arg10[%c0_185, %c0_186] : memref<14x1xf32, #tpu.memory_space<vmem>>, vector<14x1xf32>
    %172 = vector.broadcast %171 : vector<14x1xf32> to vector<14x2xf32>
    %173 = arith.addf %170, %172 : vector<14x2xf32>
    %c0_187 = arith.constant 0 : index
    %c0_188 = arith.constant 0 : index
    %174 = vector.load %arg11[%c0_187, %c0_188] : memref<14x2xf32, #tpu.memory_space<vmem>>, vector<14x2xf32>
    tpu.vector_store %arg11[%c0_187, %c0_188], %173 {strides = array<i32>} : memref<14x2xf32, #tpu.memory_space<vmem>>, vector<14x2xf32>,
    return
  }
}

</mosaic_0001>

<bundles_post_ra>
// kernel: fwd.1
= control target key start
LH: loop header
LB: loop body
LE: loop exit
PB: predicated region body
PF: predicated region fallthrough
CT: control target
= control target key end

     0   :  { %v7083_v3 = vmov 0.0   ;;  %vm10994_vm0 = vcmask 654336   ;;  %s7085_s28 = smov 101   ;;  %s11022_s29 = smov 103   ;;  %vm3059_vm1 = vcmask 130048   ;;  %vm1101_vm2 = vcmask 826368   ;;  %s10941_s0 = inlined_call_operand.vmem [shape: f32[80,896], index: 0, kind: input, shape index: {}]   ;;  %s10942_s1 = inlined_call_operand.vmem [shape: f32[16,80], index: 1, kind: input, shape index: {}]   ;;  %s10943_s2 = inlined_call_operand.vmem [shape: f32[16,1], index: 2, kind: input, shape index: {}]   ;;  %s10944_s3 = inlined_call_operand.vmem [shape: f32[32,400], index: 3, kind: input, shape index: {}]   ;;  %s10945_s4 = inlined_call_operand.vmem [shape: f32[32,1], index: 4, kind: input, shape index: {}]   ;;  %s10946_s5 = inlined_call_operand.vmem [shape: f32[768,256], index: 5, kind: input, shape index: {}]   ;;  %s10947_s6 = inlined_call_operand.vmem [shape: f32[32,800], index: 6, kind: input, shape index: {}]   ;;  %s10948_s7 = inlined_call_operand.vmem [shape: f32[32,1], index: 7, kind: input, shape index: {}]   ;;  %s10949_s8 = inlined_call_operand.vmem [shape: f32[128,16], index: 8, kind: input, shape index: {}]   ;;  %s10950_s9 = inlined_call_operand.vmem [shape: f32[8,14,32], index: 9, kind: input, shape index: {}]   ;;  %s10951_s10 = inlined_call_operand.vmem [shape: f32[14,1], index: 10, kind: input, shape index: {}]   ;;  %s10952_s11 = inlined_call_operand.vmem [shape: f32[14,2], index: 11, kind: output, shape index: {}]  }
   0x1   :  { %v104_v0 = vld [vmem:[%s10941_s0 + $0x200] sm:$0xff]  ;;  %v106_v1 = vld [vmem:[%s10941_s0 + $0x210] sm:$0xff]  ;;  %v103_v2 = vld [vmem:[%s10941_s0 + $0x1f8] sm:$0xff]  ;;  %193 = vmatprep.mubr.f32.mxu0 %v7083_v3  ;;  %270 = vmatprep.mubr.f32.mxu1 %v7083_v3  ;;  %s7088_s30 = smov 124   ;;  %s7089_s12 = smov 125   ;;  %vm1008_vm3 = vcmask 834560  }
   0x2   :  { %141 = vmatprep.subr.mxu0 %v104_v0  ;;  %218 = vmatprep.subr.mxu1 %v106_v1  ;;  %v105_v4 = vld [vmem:[%s10941_s0 + $0x208] sm:$0xff]  ;;  %v99_v6 = vld [vmem:[%s10941_s0 + $0x1d8] sm:$0xff]  ;;  %v96_v7 = vld [vmem:[%s10941_s0 + $0x1c0] sm:$0xff]  ;;  %s7090_s13 = smov 126   ;;  %s7091_s14 = smov 127   ;;  %vm915_vm4 = vcmask 842752  }
   0x3   :  { %v97_v5 = vld [vmem:[%s10941_s0 + $0x1c8] sm:$0xff]  ;;  %142 = vmatpush1.msra.mxu0 %v103_v2  ;;  %219 = vmatpush1.msra.mxu1 %v105_v4  ;;  %v98_v8 = vld [vmem:[%s10941_s0 + $0x1d0] sm:$0xff]  ;;  %v92_v10 = vld [vmem:[%s10941_s0 + $0x1a0] sm:$0xff]  ;;  %s7092_s15 = smov 25   ;;  %s7093_s16 = smov 53   ;;  %vm822_vm5 = vcmask 1014784  }
   0x4   :  { %v90_v9 = vld [vmem:[%s10941_s0 + $0x190] sm:$0xff]  ;;  %143 = vmatprep.subr.mxu0 %v97_v5  ;;  %220 = vmatprep.subr.mxu1 %v99_v6  ;;  %v89_v11 = vld [vmem:[%s10941_s0 + $0x188] sm:$0xff]  ;;  %v91_v12 = vld [vmem:[%s10941_s0 + $0x198] sm:$0xff]  ;;  %s7094_s17 = smov 74   ;;  %s7095_s18 = smov 75   ;;  %vm729_vm6 = vcmask 1022976  }
   0x5   :  { %144 = vmatpush1.msra.mxu0 %v96_v7  ;;  %221 = vmatpush1.msra.mxu1 %v98_v8  ;;  %v83_v13 = vld [vmem:[%s10941_s0 + $0x158] sm:$0xff]  ;;  %v85_v14 = vld [vmem:[%s10941_s0 + $0x168] sm:$0xff]  ;;  %v82_v15 = vld [vmem:[%s10941_s0 + $0x150] sm:$0xff]  ;;  %s7096_s19 = smov 26   ;;  %s10979_s20 = smov 76   ;;  %vm11001_vm7 = vcmask 1031168  }
   0x6   :  { %145 = vmatprep.subr.mxu0 %v90_v9  ;;  %222 = vmatprep.subr.mxu1 %v92_v10  ;;  %v84_v16 = vld [vmem:[%s10941_s0 + $0x160] sm:$0xff]  ;;  %v78_v18 = vld [vmem:[%s10941_s0 + $0x130] sm:$0xff]  ;;  %v75_v19 = vld [vmem:[%s10941_s0 + $0x118] sm:$0xff]  ;;  %s10977_s21 = smov 77   ;;  %s7099_s22 = smov 27   ;;  %vm10999_vm8 = vcmask 1039360  }
   0x7   :  { %146 = vmatpush1.msra.mxu0 %v89_v11  ;;  %223 = vmatpush1.msra.mxu1 %v91_v12  ;;  %v76_v17 = vld [vmem:[%s10941_s0 + $0x120] sm:$0xff]  ;;  %v77_v20 = vld [vmem:[%s10941_s0 + $0x128] sm:$0xff]  ;;  %v71_v22 = vld [vmem:[%s10941_s0 + $0xf8] sm:$0xff]  ;;  %v7084_v11 = vmov 0   ;;  %s11010_s23 = smov 28   ;;  %s11006_s24 = smov 50  }
   0x8   :  { %147 = vmatprep.subr.mxu0 %v83_v13  ;;  %224 = vmatprep.subr.mxu1 %v85_v14  ;;  %v69_v21 = vld [vmem:[%s10941_s0 + $0xe8] sm:$0xff]  ;;  %v68_v23 = vld [vmem:[%s10941_s0 + $0xe0] sm:$0xff]  ;;  %v70_v24 = vld [vmem:[%s10941_s0 + $0xf0] sm:$0xff]  ;;  %s10964_s25 = smov 78   ;;  %s11004_s26 = smov 51   ;;  %vm2589_vm9 = vcmask 203776  }
   0x9   :  { %148 = vmatpush1.msra.mxu0 %v82_v15  ;;  %225 = vmatpush1.msra.mxu1 %v84_v16  ;;  %v62_v25 = vld [vmem:[%s10941_s0 + $0xb0] sm:$0xff]  ;;  %v64_v26 = vld [vmem:[%s10941_s0 + $0xc0] sm:$0xff]  ;;  %v61_v27 = vld [vmem:[%s10941_s0 + $0xa8] sm:$0xff]  ;;  %s7106_s27 = smov 52   ;;  %vm10997_vm10 = vcmask 433152   ;;  %vm2496_vm11 = vcmask 211968  }
   0xa   :  { %149 = vmatprep.subr.mxu0 %v76_v17  ;;  %226 = vmatprep.subr.mxu1 %v78_v18  ;;  %v63_v28 = vld [vmem:[%s10941_s0 + $0xb8] sm:$0xff]  ;;  %v57_v30 = vld [vmem:[%s10941_s0 + $0x88] sm:$0xff]  ;;  %v54_v31 = vld [vmem:[%s10941_s0 + $0x70] sm:$0xff]  ;;  %vm10995_vm12 = vcmask 605184   ;;  %vm2403_vm13 = vcmask 220160   ;;  %vm10996_vm14 = vcmask 613376  }
   0xb   :  { %150 = vmatpush1.msra.mxu0 %v75_v19  ;;  %227 = vmatpush1.msra.mxu1 %v77_v20  ;;  %v55_v29 = vld [vmem:[%s10941_s0 + $0x78] sm:$0xff]  ;;  %v56_v32 = vld [vmem:[%s10941_s0 + $0x80] sm:$0xff]  ;;  %v50_v34 = vld [vmem:[%s10941_s0 + $0x50] sm:$0xff]  ;;  %vm11020_vm15 = vcmask 228352  }
   0xc   :  { %151 = vmatprep.subr.mxu0 %v69_v21  ;;  %228 = vmatprep.subr.mxu1 %v71_v22  ;;  %v48_v33 = vld [vmem:[%s10941_s0 + $0x40] sm:$0xff]  ;;  %v47_v35 = vld [vmem:[%s10941_s0 + $0x38] sm:$0xff]  ;;  %v49_v36 = vld [vmem:[%s10941_s0 + $0x48] sm:$0xff] }
   0xd   :  { %152 = vmatpush1.msra.mxu0 %v68_v23  ;;  %229 = vmatpush1.msra.mxu1 %v70_v24  ;;  %v41_v37 = vld [vmem:[%s10941_s0 + $0x8] sm:$0xff]  ;;  %v43_v38 = vld [vmem:[%s10941_s0 + $0x18] sm:$0xff]  ;;  %v40_v39 = vld [vmem:[%s10941_s0] sm:$0xff] }
   0xe   :  { %153 = vmatprep.subr.mxu0 %v62_v25  ;;  %230 = vmatprep.subr.mxu1 %v64_v26  ;;  %v42_v40 = vld [vmem:[%s10941_s0 + $0x10] sm:$0xff]  ;;  %v7315_v41 = vld [vmem:[%s10942_s1] sm:$0xff]  ;;  %v109_v43 = vld [vmem:[%s10941_s0 + $0x228] sm:$0xff] }
   0xf   :  { %154 = vmatpush1.msra.mxu0 %v61_v27  ;;  %231 = vmatpush1.msra.mxu1 %v63_v28  ;;  %v108_v42 = vld [vmem:[%s10941_s0 + $0x220] sm:$0xff]  ;;  %v107_v44 = vld [vmem:[%s10941_s0 + $0x218] sm:$0xff]  ;;  %v101_v45 = vld [vmem:[%s10941_s0 + $0x1e8] sm:$0xff] }
  0x10   :  { %155 = vmatprep.subr.mxu0 %v55_v29  ;;  %232 = vmatprep.subr.mxu1 %v57_v30  ;;  %v102_v46 = vld [vmem:[%s10941_s0 + $0x1f0] sm:$0xff]  ;;  %v100_v47 = vld [vmem:[%s10941_s0 + $0x1e0] sm:$0xff]  ;;  %v7342_v48 = vld [vmem:[%s10942_s1 + $0x8] sm:$0xff]  ;;  %s11008_s1 = smov 49  }
  0x11   :  { %156 = vmatpush1.msra.mxu0 %v54_v31  ;;  %233 = vmatpush1.msra.mxu1 %v56_v32  ;;  %v94_v49 = vld [vmem:[%s10941_s0 + $0x1b0] sm:$0xff]  ;;  %v95_v50 = vld [vmem:[%s10941_s0 + $0x1b8] sm:$0xff]  ;;  %v93_v51 = vld [vmem:[%s10941_s0 + $0x1a8] sm:$0xff] }
  0x12   :  { %157 = vmatprep.subr.mxu0 %v48_v33  ;;  %234 = vmatprep.subr.mxu1 %v50_v34  ;;  %v87_v52 = vld [vmem:[%s10941_s0 + $0x178] sm:$0xff]  ;;  %v88_v53 = vld [vmem:[%s10941_s0 + $0x180] sm:$0xff]  ;;  %v86_v54 = vld [vmem:[%s10941_s0 + $0x170] sm:$0xff] }
  0x13   :  { %158 = vmatpush1.msra.mxu0 %v47_v35  ;;  %235 = vmatpush1.msra.mxu1 %v49_v36  ;;  %v80_v55 = vld [vmem:[%s10941_s0 + $0x140] sm:$0xff]  ;;  %v81_v56 = vld [vmem:[%s10941_s0 + $0x148] sm:$0xff]  ;;  %v79_v57 = vld [vmem:[%s10941_s0 + $0x138] sm:$0xff] }
  0x14   :  { %159 = vmatprep.subr.mxu0 %v41_v37  ;;  %236 = vmatprep.subr.mxu1 %v43_v38  ;;  %v73_v58 = vld [vmem:[%s10941_s0 + $0x108] sm:$0xff]  ;;  %v74_v59 = vld [vmem:[%s10941_s0 + $0x110] sm:$0xff]  ;;  %v72_v60 = vld [vmem:[%s10941_s0 + $0x100] sm:$0xff] }
  0x15   :  { %160 = vmatpush1.msra.mxu0 %v40_v39  ;;  %237 = vmatpush1.msra.mxu1 %v42_v40  ;;  %v66_v61 = vld [vmem:[%s10941_s0 + $0xd0] sm:$0xff]  ;;  %v67_v62 = vld [vmem:[%s10941_s0 + $0xd8] sm:$0xff]  ;;  %v65_v63 = vld [vmem:[%s10941_s0 + $0xc8] sm:$0xff] }
  0x16   :  { %6581 = vmatmul.mubr.msk.f32.vlgmr.msra.gmra.mxu0 %vm10994_vm0, %v7315_v41  ;;  %6583 = vmatmul.mubr.msk.f32.vlgmr.msra.gmra.mxu1 %vm10994_vm0, %v7315_v41  ;;  %v59_v0 = vld [vmem:[%s10941_s0 + $0x98] sm:$0xff]  ;;  %v60_v1 = vld [vmem:[%s10941_s0 + $0xa0] sm:$0xff]  ;;  %v58_v2 = vld [vmem:[%s10941_s0 + $0x90] sm:$0xff] }
  0x17   :  { %295 = vmatprep.subr.mxu0 %v108_v42  ;;  %6855 = vmatprep.subr.mxu1 %v109_v43  ;;  %v52_v4 = vld [vmem:[%s10941_s0 + $0x60] sm:$0xff]  ;;  %v53_v5 = vld [vmem:[%s10941_s0 + $0x68] sm:$0xff]  ;;  %v51_v6 = vld [vmem:[%s10941_s0 + $0x58] sm:$0xff] }
  0x18   :  { %296 = vmatpush1.msra.mxu0 %v107_v44  ;;  %6856 = vmatpush3.msra.mxu1 %v109_v43  ;;  %v45_v7 = vld [vmem:[%s10941_s0 + $0x28] sm:$0xff]  ;;  %v46_v8 = vld [vmem:[%s10941_s0 + $0x30] sm:$0xff]  ;;  %v44_v9 = vld [vmem:[%s10941_s0 + $0x20] sm:$0xff]  ;;  %s10974_s0 = smov 99  }
  0x19   :  { %297 = vmatprep.subr.mxu0 %v101_v45  ;;  %6857 = vmatprep.subr.mxu1 %v102_v46  ;;  %v111_v10 = vld [vmem:[%s10943_s2 + $0x8] sm:$0xff]  ;;  %v110_v12 = vld [vmem:[%s10943_s2] sm:$0xff]  ;;  %s7086_s2 = smov 102  }
  0x1a   :  { %199 = vmatprep.mubr.f32.mxu0 %v7083_v3  ;;  %276 = vmatprep.mubr.f32.mxu1 %v7083_v3 }
  0x1b   :  { %298 = vmatpush1.msra.mxu0 %v100_v47  ;;  %6858 = vmatpush3.msra.mxu1 %v102_v46 }
  0x1c   :  { %6582 = vmatmul.mubr.msk.f32.gmra.mxu0 %vm10994_vm0, %v7342_v48  ;;  %6584 = vmatmul.mubr.msk.f32.gmra.mxu1 %vm10994_vm0, %v7342_v48 }
  0x1d   :  { %299 = vmatprep.subr.mxu0 %v94_v49  ;;  %6859 = vmatprep.subr.mxu1 %v95_v50 }
  0x1e   :  { %300 = vmatpush1.msra.mxu0 %v93_v51  ;;  %6860 = vmatpush3.msra.mxu1 %v95_v50 }
  0x1f   :  { %301 = vmatprep.subr.mxu0 %v87_v52  ;;  %6861 = vmatprep.subr.mxu1 %v88_v53 }
  0x20   :  { %302 = vmatpush1.msra.mxu0 %v86_v54  ;;  %6862 = vmatpush3.msra.mxu1 %v88_v53 }
  0x21   :  { %303 = vmatprep.subr.mxu0 %v80_v55  ;;  %6863 = vmatprep.subr.mxu1 %v81_v56 }
  0x22   :  { %304 = vmatpush1.msra.mxu0 %v79_v57  ;;  %6864 = vmatpush3.msra.mxu1 %v81_v56 }
  0x23   :  { %305 = vmatprep.subr.mxu0 %v73_v58  ;;  %6865 = vmatprep.subr.mxu1 %v74_v59 }
  0x24   :  { %306 = vmatpush1.msra.mxu0 %v72_v60  ;;  %6866 = vmatpush3.msra.mxu1 %v74_v59 }
  0x25   :  { %307 = vmatprep.subr.mxu0 %v66_v61  ;;  %6867 = vmatprep.subr.mxu1 %v67_v62 }
  0x26   :  { %308 = vmatpush1.msra.mxu0 %v65_v63  ;;  %6868 = vmatpush3.msra.mxu1 %v67_v62 }
  0x27   :  { %309 = vmatprep.subr.mxu0 %v59_v0  ;;  %6869 = vmatprep.subr.mxu1 %v60_v1 }
  0x28   :  { %310 = vmatpush1.msra.mxu0 %v58_v2  ;;  %6870 = vmatpush3.msra.mxu1 %v60_v1 }
  0x29   :  { %311 = vmatprep.subr.mxu0 %v52_v4  ;;  %6871 = vmatprep.subr.mxu1 %v53_v5 }
  0x2a   :  { %312 = vmatpush1.msra.mxu0 %v51_v6  ;;  %6872 = vmatpush3.msra.mxu1 %v53_v5 }
  0x2b   :  { %313 = vmatprep.subr.mxu0 %v45_v7  ;;  %6873 = vmatprep.subr.mxu1 %v46_v8 }
  0x2c   :  { %314 = vmatpush1.msra.mxu0 %v44_v9  ;;  %347 = vmatprep.mubr.f32.mxu0 %v7083_v3 }
  0x2d   :  { %6874 = vmatpush3.msra.mxu1 %v46_v8  ;;  %6875 = vmatprep.mubr.msk.f32.mxu1 %vm10994_vm0, %v7315_v41 }
  0x2e   :  { %6585 = vmatmul.mubr.msk.f32.vlgmr.msra.gmra.mxu0 %vm10994_vm0, %v7315_v41  ;;  %6876 = vmatmul.mubr.msk.f32.vlgmr.msra.gmra.mxu1 %vm10994_vm0, %v7342_v48 }
  0x2f   :  { %353 = vmatprep.mubr.f32.mxu0 %v7083_v3  ;;  %7065 = vset.pattern.permute.xlu0 %v7084_v11 }
  0x30   :  { %119 = vperm.xlu0 %7065, %v111_v10   ;;  %7066 = vset.pattern.permute.xlu1 %v7084_v11 }
  0x32   :  { %6586 = vmatmul.mubr.msk.f32.gmra.mxu0 %vm10994_vm0, %v7342_v48  ;;  %vm10998_vm0 = vcmask 621568  }
  0x34   :  { %114 = vperm.xlu0 %7065, %v110_v12  }
  0xab   :  { %v7438_v13 = vpop.permute.xlu0 %119 }
  0xac   :  { %11024 = vst [vmem:[#allocation6_spill] sm:$0xff] %v7438_v13 }
  0xaf   :  { %v7440_v14 = vpop.permute.xlu0 %114 }
  0xb0   :  { %11025 = vst [vmem:[#allocation7_spill] sm:$0xff] %v7440_v14 }
  0xd6   :  { %v195_v15 = vpop.f32.mrf.mxu0  ;;  %v272_v16 = vpop.f32.mrf.mxu1 }
  0xd7   :  { %v196_v3 = vadd.f32 %v195_v15, %v7440_v14  ;;  %v273_v17 = vadd.f32 %v272_v16, %v7440_v14 }
  0xd8   :  { %v197_v20 = vpop.f32.mrf.mxu0  ;;  %v7566_v26 = vpop.f32.mrf.mxu1 }
  0xd9   :  { %v7444_v18 = vmax.f32 %v196_v3, 0.0  ;;  %v7446_v19 = vmax.f32 %v273_v17, 0.0  ;;  %v198_v21 = vadd.f32 %v197_v20, %v7440_v14 }
  0xdb   :  { %11026 = vst [vmem:[#allocation8_spill] sm:$0xff] %v7446_v19  ;;  %1077 = vrot.lane.b32.xlu0 %v7446_v19, %s7085_s28  ;;  %1073 = vrot.lane.b32.xlu1 %v7444_v18, %s7085_s28  ;;  %v7497_v22 = vmax.f32 %v198_v21, 0.0 }
  0xdc   :  { %v201_v23 = vpop.f32.mrf.mxu0  ;;  %v278_v29 = vpop.f32.mrf.mxu1 }
  0xdd   :  { %v202_v24 = vadd.f32 %v201_v23, %v7438_v13  ;;  %v279_v30 = vadd.f32 %v278_v29, %v7438_v13 }
  0xde   :  { %v203_v60 = vpop.f32.mrf.mxu0 }
  0xdf   :  { %984 = vrot.lane.b32.xlu0 %v7446_v19, %s7086_s2  ;;  %980 = vrot.lane.b32.xlu1 %v7444_v18, %s7086_s2  ;;  %v7548_v25 = vmax.f32 %v202_v24, 0.0  ;;  %v7589_v33 = vmax.f32 %v279_v30, 0.0  ;;  %v204_v61 = vadd.f32 %v203_v60, %v7438_v13 }
  0xe1   :  { %11028 = vst [vmem:[#allocation10_spill] sm:$0xff] %v7589_v33  ;;  %v7704_v0 = vmax.f32 %v204_v61, 0.0 }
  0xe3   :  { %891 = vrot.lane.b32.xlu0 %v7446_v19, %s11022_s29  ;;  %887 = vrot.lane.b32.xlu1 %v7444_v18, %s11022_s29 }
  0xe7   :  { %798 = vrot.lane.b32.xlu0 %v7446_v19, %s7088_s30  ;;  %794 = vrot.lane.b32.xlu1 %v7444_v18, %s7088_s30 }
  0xeb   :  { %705 = vrot.lane.b32.xlu0 %v7446_v19, %s7089_s12  ;;  %701 = vrot.lane.b32.xlu1 %v7444_v18, %s7089_s12 }
  0xef   :  { %612 = vrot.lane.b32.xlu0 %v7446_v19, %s7090_s13  ;;  %608 = vrot.lane.b32.xlu1 %v7444_v18, %s7090_s13 }
  0xf3   :  { %519 = vrot.lane.b32.xlu0 %v7446_v19, %s7091_s14  ;;  %515 = vrot.lane.b32.xlu1 %v7444_v18, %s7091_s14 }
  0xf7   :  { %2565 = vrot.lane.b32.xlu0 %v7446_v19, %s7092_s15  ;;  %1817 = vrot.lane.b32.xlu1 %v7444_v18, %s7093_s16 }
  0xfb   :  { %2561 = vrot.lane.b32.xlu0 %v7444_v18, %s7092_s15  ;;  %1724 = vrot.lane.b32.xlu1 %v7444_v18, %s7094_s17 }
  0xff   :  { %1821 = vrot.lane.b32.xlu0 %v7446_v19, %s7093_s16  ;;  %1631 = vrot.lane.b32.xlu1 %v7444_v18, %s7095_s18 }
 0x103   :  { %2472 = vrot.lane.b32.xlu0 %v7446_v19, %s7096_s19  ;;  %1538 = vrot.lane.b32.xlu1 %v7444_v18, %s10979_s20 }
 0x107   :  { %2468 = vrot.lane.b32.xlu0 %v7444_v18, %s7096_s19  ;;  %1445 = vrot.lane.b32.xlu1 %v7444_v18, %s10977_s21 }
 0x10b   :  { %1728 = vrot.lane.b32.xlu0 %v7446_v19, %s7094_s17  ;;  %1075 = vrot.lane.b32.xlu1 %v7497_v22, %s7085_s28 }
 0x10f   :  { %2379 = vrot.lane.b32.xlu0 %v7446_v19, %s7099_s22  ;;  %982 = vrot.lane.b32.xlu1 %v7497_v22, %s7086_s2 }
 0x113   :  { %2375 = vrot.lane.b32.xlu0 %v7444_v18, %s7099_s22  ;;  %889 = vrot.lane.b32.xlu1 %v7497_v22, %s11022_s29 }
 0x117   :  { %1635 = vrot.lane.b32.xlu0 %v7446_v19, %s7095_s18  ;;  %796 = vrot.lane.b32.xlu1 %v7497_v22, %s7088_s30 }
 0x11b   :  { %2286 = vrot.lane.b32.xlu0 %v7446_v19, %s11010_s23  ;;  %703 = vrot.lane.b32.xlu1 %v7497_v22, %s7089_s12 }
 0x11f   :  { %2282 = vrot.lane.b32.xlu0 %v7444_v18, %s11010_s23  ;;  %610 = vrot.lane.b32.xlu1 %v7497_v22, %s7090_s13 }
 0x123   :  { %1542 = vrot.lane.b32.xlu0 %v7446_v19, %s10979_s20  ;;  %517 = vrot.lane.b32.xlu1 %v7497_v22, %s7091_s14 }
 0x127   :  { %2193 = vrot.lane.b32.xlu0 %v7446_v19, %s11008_s1  ;;  %2563 = vrot.lane.b32.xlu1 %v7497_v22, %s7092_s15 }
 0x12b   :  { %2189 = vrot.lane.b32.xlu0 %v7444_v18, %s11008_s1  ;;  %1819 = vrot.lane.b32.xlu1 %v7497_v22, %s7093_s16 }
 0x12f   :  { %1449 = vrot.lane.b32.xlu0 %v7446_v19, %s10977_s21  ;;  %2470 = vrot.lane.b32.xlu1 %v7497_v22, %s7096_s19 }
 0x133   :  { %2100 = vrot.lane.b32.xlu0 %v7446_v19, %s11006_s24  ;;  %1726 = vrot.lane.b32.xlu1 %v7497_v22, %s7094_s17 }
 0x137   :  { %2096 = vrot.lane.b32.xlu0 %v7444_v18, %s11006_s24  ;;  %2377 = vrot.lane.b32.xlu1 %v7497_v22, %s7099_s22 }
 0x13b   :  { %1087 = vrot.lane.b32.xlu0 %v7548_v25, %s7085_s28  ;;  %1633 = vrot.lane.b32.xlu1 %v7497_v22, %s7095_s18 }
 0x13f   :  { %994 = vrot.lane.b32.xlu0 %v7548_v25, %s7086_s2  ;;  %2284 = vrot.lane.b32.xlu1 %v7497_v22, %s11010_s23 }
 0x143   :  { %901 = vrot.lane.b32.xlu0 %v7548_v25, %s11022_s29  ;;  %1540 = vrot.lane.b32.xlu1 %v7497_v22, %s10979_s20 }
 0x147   :  { %808 = vrot.lane.b32.xlu0 %v7548_v25, %s7088_s30  ;;  %2191 = vrot.lane.b32.xlu1 %v7497_v22, %s11008_s1 }
 0x14b   :  { %715 = vrot.lane.b32.xlu0 %v7548_v25, %s7089_s12  ;;  %1447 = vrot.lane.b32.xlu1 %v7497_v22, %s10977_s21 }
 0x14d   :  { %v7572_v27 = vpop.permute.xlu0 %1077  ;;  %v7574_v28 = vpop.permute.xlu1 %1073 }
 0x14e   :  { %11027 = vst [vmem:[#allocation9_spill] sm:$0xff] %v7572_v27 }
 0x14f   :  { %622 = vrot.lane.b32.xlu0 %v7548_v25, %s7090_s13  ;;  %2098 = vrot.lane.b32.xlu1 %v7497_v22, %s11006_s24 }
 0x151   :  { %v7581_v31 = vpop.permute.xlu0 %984  ;;  %v7583_v32 = vpop.permute.xlu1 %980 }
 0x153   :  { %529 = vrot.lane.b32.xlu0 %v7548_v25, %s7091_s14  ;;  %1354 = vrot.lane.b32.xlu1 %v7497_v22, %s10964_s25 }
 0x155   :  { %v7591_v34 = vpop.permute.xlu0 %891  ;;  %v7593_v35 = vpop.permute.xlu1 %887 }
 0x157   :  { %2575 = vrot.lane.b32.xlu0 %v7548_v25, %s7092_s15  ;;  %1091 = vrot.lane.b32.xlu1 %v7589_v33, %s7085_s28 }
 0x159   :  { %v7599_v36 = vpop.permute.xlu0 %798  ;;  %v7601_v37 = vpop.permute.xlu1 %794 }
 0x15b   :  { %1835 = vrot.lane.b32.xlu0 %v7589_v33, %s7093_s16  ;;  %998 = vrot.lane.b32.xlu1 %v7589_v33, %s7086_s2 }
 0x15d   :  { %v7607_v38 = vpop.permute.xlu0 %705  ;;  %v7609_v39 = vpop.permute.xlu1 %701 }
 0x15f   :  { %2486 = vrot.lane.b32.xlu0 %v7589_v33, %s7096_s19  ;;  %905 = vrot.lane.b32.xlu1 %v7589_v33, %s11022_s29 }
 0x161   :  { %v7615_v40 = vpop.permute.xlu0 %612  ;;  %v7617_v41 = vpop.permute.xlu1 %608 }
 0x163   :  { %2482 = vrot.lane.b32.xlu0 %v7548_v25, %s7096_s19  ;;  %812 = vrot.lane.b32.xlu1 %v7589_v33, %s7088_s30 }
 0x165   :  { %v7623_v42 = vpop.permute.xlu0 %519  ;;  %v7625_v43 = vpop.permute.xlu1 %515 }
 0x167   :  { %1742 = vrot.lane.b32.xlu0 %v7589_v33, %s7094_s17  ;;  %719 = vrot.lane.b32.xlu1 %v7589_v33, %s7089_s12 }
 0x169   :  { %v7631_v44 = vpop.permute.xlu0 %2565  ;;  %v7633_v45 = vpop.permute.xlu1 %1817 }
 0x16a   :  { %11029 = vst [vmem:[#allocation11_spill] sm:$0xff] %v7633_v45  ;;  %v280_v45 = vpop.f32.mrf.mxu1 }
 0x16b   :  { %2393 = vrot.lane.b32.xlu0 %v7589_v33, %s7099_s22  ;;  %626 = vrot.lane.b32.xlu1 %v7589_v33, %s7090_s13 }
 0x16d   :  { %v7639_v46 = vpop.permute.xlu0 %2561  ;;  %v7641_v47 = vpop.permute.xlu1 %1724 }
 0x16e   :  { %11030 = vst [vmem:[#allocation12_spill] sm:$0xff] %v7641_v47 }
 0x16f   :  { %2389 = vrot.lane.b32.xlu0 %v7548_v25, %s7099_s22  ;;  %533 = vrot.lane.b32.xlu1 %v7589_v33, %s7091_s14 }
 0x171   :  { %v7647_v48 = vpop.permute.xlu0 %1821  ;;  %v7649_v49 = vpop.permute.xlu1 %1631 }
 0x172   :  { %11031 = vst [vmem:[#allocation13_spill] sm:$0xff] %v7649_v49 }
 0x173   :  { %1649 = vrot.lane.b32.xlu0 %v7589_v33, %s7095_s18  ;;  %2579 = vrot.lane.b32.xlu1 %v7589_v33, %s7092_s15 }
 0x175   :  { %v7655_v50 = vpop.permute.xlu0 %2472  ;;  %v7657_v51 = vpop.permute.xlu1 %1538 }
 0x176   :  { %11032 = vst [vmem:[#allocation14_spill] sm:$0xff] %v7655_v50  ;;  %11033 = vst [vmem:[#allocation15_spill] sm:$0xff] %v7657_v51 }
 0x177   :  { %2300 = vrot.lane.b32.xlu0 %v7589_v33, %s11010_s23  ;;  %1831 = vrot.lane.b32.xlu1 %v7548_v25, %s7093_s16 }
 0x179   :  { %v7663_v52 = vpop.permute.xlu0 %2468  ;;  %v7665_v53 = vpop.permute.xlu1 %1445 }
 0x17a   :  { %11034 = vst [vmem:[#allocation16_spill] sm:$0xff] %v7663_v52  ;;  %11035 = vst [vmem:[#allocation17_spill] sm:$0xff] %v7665_v53 }
 0x17b   :  { %2296 = vrot.lane.b32.xlu0 %v7548_v25, %s11010_s23  ;;  %1738 = vrot.lane.b32.xlu1 %v7548_v25, %s7094_s17 }
 0x17d   :  { %v7671_v54 = vpop.permute.xlu0 %1728  ;;  %v7673_v55 = vpop.permute.xlu1 %1075 }
 0x17e   :  { %11036 = vst [vmem:[#allocation18_spill] sm:$0xff] %v7671_v54 }
 0x17f   :  { %1556 = vrot.lane.b32.xlu0 %v7589_v33, %s10979_s20  ;;  %1645 = vrot.lane.b32.xlu1 %v7548_v25, %s7095_s18 }
 0x181   :  { %v7679_v56 = vpop.permute.xlu0 %2379  ;;  %v7681_v57 = vpop.permute.xlu1 %982 }
 0x182   :  { %11037 = vst [vmem:[#allocation19_spill] sm:$0xff] %v7679_v56 }
 0x183   :  { %2207 = vrot.lane.b32.xlu0 %v7589_v33, %s11008_s1  ;;  %1552 = vrot.lane.b32.xlu1 %v7548_v25, %s10979_s20 }
 0x185   :  { %v7687_v58 = vpop.permute.xlu0 %2375  ;;  %v7689_v59 = vpop.permute.xlu1 %889 }
 0x186   :  { %11038 = vst [vmem:[#allocation20_spill] sm:$0xff] %v7687_v58 }
 0x187   :  { %2203 = vrot.lane.b32.xlu0 %v7548_v25, %s11008_s1  ;;  %1459 = vrot.lane.b32.xlu1 %v7548_v25, %s10977_s21 }
 0x189   :  { %v7696_v62 = vpop.permute.xlu0 %1635  ;;  %v7698_v63 = vpop.permute.xlu1 %796 }
 0x18a   :  { %11039 = vst [vmem:[#allocation21_spill] sm:$0xff] %v7696_v62 }
 0x18b   :  { %1463 = vrot.lane.b32.xlu0 %v7589_v33, %s10977_s21  ;;  %1366 = vrot.lane.b32.xlu1 %v7548_v25, %s10964_s25 }
 0x18d   :  { %v7706_v1 = vpop.permute.xlu0 %2286  ;;  %v7708_v2 = vpop.permute.xlu1 %703 }
 0x18e   :  { %11040 = vst [vmem:[#allocation22_spill] sm:$0xff] %v7706_v1 }
 0x18f   :  { %2114 = vrot.lane.b32.xlu0 %v7589_v33, %s11006_s24  ;;  %1089 = vrot.lane.b32.xlu1 %v7704_v0, %s7085_s28 }
 0x191   :  { %v7714_v4 = vpop.permute.xlu0 %2282  ;;  %v7716_v5 = vpop.permute.xlu1 %610 }
 0x192   :  { %11041 = vst [vmem:[#allocation23_spill] sm:$0xff] %v7714_v4 }
 0x193   :  { %2110 = vrot.lane.b32.xlu0 %v7548_v25, %s11006_s24  ;;  %1833 = vrot.lane.b32.xlu1 %v7704_v0, %s7093_s16 }
 0x195   :  { %v7722_v6 = vpop.permute.xlu0 %1542  ;;  %v7724_v7 = vpop.permute.xlu1 %517 }
 0x196   :  { %11042 = vst [vmem:[#allocation24_spill] sm:$0xff] %v7722_v6 }
 0x197   :  { %1370 = vrot.lane.b32.xlu0 %v7589_v33, %s10964_s25  ;;  %2484 = vrot.lane.b32.xlu1 %v7704_v0, %s7096_s19 }
 0x199   :  { %v7730_v8 = vpop.permute.xlu0 %2193  ;;  %v7732_v9 = vpop.permute.xlu1 %2563 }
 0x19a   :  { %11043 = vst [vmem:[#allocation25_spill] sm:$0xff] %v7730_v8 }
 0x19b   :  { %996 = vrot.lane.b32.xlu0 %v7704_v0, %s7086_s2  ;;  %1740 = vrot.lane.b32.xlu1 %v7704_v0, %s7094_s17 }
 0x19d   :  { %v7738_v10 = vpop.permute.xlu0 %2189  ;;  %v7740_v11 = vpop.permute.xlu1 %1819 }
 0x19e   :  { %11044 = vst [vmem:[#allocation26_spill] sm:$0xff] %v7738_v10  ;;  %11045 = vst [vmem:[#allocation27_spill] sm:$0xff] %v7740_v11 }
 0x19f   :  { %903 = vrot.lane.b32.xlu0 %v7704_v0, %s11022_s29  ;;  %2391 = vrot.lane.b32.xlu1 %v7704_v0, %s7099_s22 }
 0x1a1   :  { %v7746_v12 = vpop.permute.xlu0 %1449  ;;  %v7748_v15 = vpop.permute.xlu1 %2470 }
 0x1a2   :  { %11046 = vst [vmem:[#allocation28_spill] sm:$0xff] %v7746_v12  ;;  %11047 = vst [vmem:[#allocation29_spill] sm:$0xff] %v7748_v15 }
 0x1a3   :  { %810 = vrot.lane.b32.xlu0 %v7704_v0, %s7088_s30  ;;  %1647 = vrot.lane.b32.xlu1 %v7704_v0, %s7095_s18 }
 0x1a5   :  { %v7754_v16 = vpop.permute.xlu0 %2100  ;;  %v7756_v3 = vpop.permute.xlu1 %1726 }
 0x1a6   :  { %11048 = vst [vmem:[#allocation30_spill] sm:$0xff] %v7754_v16  ;;  %11049 = vst [vmem:[#allocation31_spill] sm:$0xff] %v7756_v3 }
 0x1a7   :  { %717 = vrot.lane.b32.xlu0 %v7704_v0, %s7089_s12  ;;  %2298 = vrot.lane.b32.xlu1 %v7704_v0, %s11010_s23 }
 0x1a9   :  { %v7762_v17 = vpop.permute.xlu0 %2096  ;;  %v7764_v20 = vpop.permute.xlu1 %2377 }
 0x1aa   :  { %11050 = vst [vmem:[#allocation32_spill] sm:$0xff] %v7762_v17  ;;  %11051 = vst [vmem:[#allocation33_spill] sm:$0xff] %v7764_v20  ;;  %v349_v20 = vpop.f32.mrf.mxu0 }
 0x1ab   :  { %624 = vrot.lane.b32.xlu0 %v7704_v0, %s7090_s13  ;;  %1554 = vrot.lane.b32.xlu1 %v7704_v0, %s10979_s20  ;;  %s11127_s20 = smov 77  }
 0x1ac   :  { %v7886_v54 = vpop.f32.mrf.mxu0 }
 0x1ad   :  { %v7770_v21 = vpop.permute.xlu0 %1087  ;;  %v7772_v23 = vpop.permute.xlu1 %1633  ;;  %11064 = vst [vmem:[#allocation46_spill] sm:$0xff] %v7886_v54 }
 0x1ae   :  { %11052 = vst [vmem:[#allocation34_spill] sm:$0xff] %v7772_v23 }
 0x1af   :  { %531 = vrot.lane.b32.xlu0 %v7704_v0, %s7091_s14  ;;  %2205 = vrot.lane.b32.xlu1 %v7704_v0, %s11008_s1 }
 0x1b1   :  { %v7778_v24 = vpop.permute.xlu0 %994  ;;  %v7780_v29 = vpop.permute.xlu1 %2284 }
 0x1b2   :  { %11053 = vst [vmem:[#allocation35_spill] sm:$0xff] %v7780_v29 }
 0x1b3   :  { %2577 = vrot.lane.b32.xlu0 %v7704_v0, %s7092_s15  ;;  %1461 = vrot.lane.b32.xlu1 %v7704_v0, %s10977_s21  ;;  %s11130_s21 = smov 78  }
 0x1b5   :  { %v7786_v30 = vpop.permute.xlu0 %901  ;;  %v7788_v60 = vpop.permute.xlu1 %1540 }
 0x1b6   :  { %11054 = vst [vmem:[#allocation36_spill] sm:$0xff] %v7788_v60 }
 0x1b7   :  { %1356 = vrot.lane.b32.xlu0 %v7446_v19, %s10964_s25  ;;  %2112 = vrot.lane.b32.xlu1 %v7704_v0, %s11006_s24 }
 0x1b9   :  { %v7794_v61 = vpop.permute.xlu0 %808  ;;  %v7796_v17 = vpop.permute.xlu1 %2191 }
 0x1ba   :  { %11055 = vst [vmem:[#allocation37_spill] sm:$0xff] %v7796_v17 }
 0x1bb   :  { %2021 = vrot.lane.b32.xlu0 %v7589_v33, %s11004_s26  ;;  %1368 = vrot.lane.b32.xlu1 %v7704_v0, %s10964_s25 }
 0x1bd   :  { %v7802_v53 = vpop.permute.xlu0 %715  ;;  %v7804_v16 = vpop.permute.xlu1 %1447 }
 0x1be   :  { %11056 = vst [vmem:[#allocation38_spill] sm:$0xff] %v7804_v16 }
 0x1bf   :  { %2017 = vrot.lane.b32.xlu0 %v7548_v25, %s11004_s26  ;;  %2019 = vrot.lane.b32.xlu1 %v7704_v0, %s11004_s26 }
 0x1c1   :  { %v7810_v12 = vpop.permute.xlu0 %622  ;;  %v7812_v10 = vpop.permute.xlu1 %2098 }
 0x1c2   :  { %11057 = vst [vmem:[#allocation39_spill] sm:$0xff] %v7812_v10 }
 0x1c3   :  { %1277 = vrot.lane.b32.xlu0 %v7589_v33, %s10974_s0  ;;  %1352 = vrot.lane.b32.xlu1 %v7444_v18, %s10964_s25  ;;  %s7107_s25 = smov 100  }
 0x1c5   :  { %v7818_v51 = vpop.permute.xlu0 %529  ;;  %v7820_v16 = vpop.permute.xlu1 %1354 }
 0x1c6   :  { %11058 = vst [vmem:[#allocation40_spill] sm:$0xff] %v7820_v16 }
 0x1c7   :  { %2007 = vrot.lane.b32.xlu0 %v7446_v19, %s11004_s26  ;;  %1275 = vrot.lane.b32.xlu1 %v7704_v0, %s10974_s0 }
 0x1c9   :  { %v7826_v17 = vpop.permute.xlu0 %2575  ;;  %v7828_v10 = vpop.permute.xlu1 %1091 }
 0x1ca   :  { %11059 = vst [vmem:[#allocation41_spill] sm:$0xff] %v7828_v10 }
 0x1cb   :  { %2003 = vrot.lane.b32.xlu0 %v7444_v18, %s11004_s26  ;;  %2005 = vrot.lane.b32.xlu1 %v7497_v22, %s11004_s26 }
 0x1cd   :  { %v7834_v8 = vpop.permute.xlu0 %1835  ;;  %v7836_v60 = vpop.permute.xlu1 %998 }
 0x1cf   :  { %1263 = vrot.lane.b32.xlu0 %v7446_v19, %s10974_s0  ;;  %1273 = vrot.lane.b32.xlu1 %v7548_v25, %s10974_s0 }
 0x1d1   :  { %v7842_v16 = vpop.permute.xlu0 %2486  ;;  %v7844_v6 = vpop.permute.xlu1 %905 }
 0x1d3   :  { %1928 = vrot.lane.b32.xlu0 %v7589_v33, %s7106_s27  ;;  %1261 = vrot.lane.b32.xlu1 %v7497_v22, %s10974_s0 }
 0x1d5   :  { %v7850_v4 = vpop.permute.xlu0 %2482  ;;  %v7852_v49 = vpop.permute.xlu1 %812 }
 0x1d7   :  { %1924 = vrot.lane.b32.xlu0 %v7548_v25, %s7106_s27  ;;  %1926 = vrot.lane.b32.xlu1 %v7704_v0, %s7106_s27 }
 0x1d9   :  { %v7858_v29 = vpop.permute.xlu0 %1742  ;;  %v7860_v1 = vpop.permute.xlu1 %719 }
 0x1da   :  { %11060 = vst [vmem:[#allocation42_spill] sm:$0xff] %v7858_v29  ;;  %v355_v29 = vpop.f32.mrf.mxu0 }
 0x1db   :  { %1184 = vrot.lane.b32.xlu0 %v7589_v33, %s7107_s25  ;;  %1259 = vrot.lane.b32.xlu1 %v7444_v18, %s10974_s0  ;;  %s7108_s0 = smov 24   ;;  %v356_v54 = vadd.f32 %v355_v29, %v7438_v13 }
 0x1dd   :  { %v7866_v23 = vpop.permute.xlu0 %2393  ;;  %v7868_v62 = vpop.permute.xlu1 %626  ;;  %v7913_v15 = vmax.f32 %v356_v54, 0.0 }
 0x1de   :  { %11061 = vst [vmem:[#allocation43_spill] sm:$0xff] %v7866_v23 }
 0x1df   :  { %1914 = vrot.lane.b32.xlu0 %v7446_v19, %s7106_s27  ;;  %1182 = vrot.lane.b32.xlu1 %v7704_v0, %s7107_s25 }
 0x1e1   :  { %v7874_v58 = vpop.permute.xlu0 %2389  ;;  %v7876_v47 = vpop.permute.xlu1 %533 }
 0x1e2   :  { %11062 = vst [vmem:[#allocation44_spill] sm:$0xff] %v7874_v58 }
 0x1e3   :  { %1910 = vrot.lane.b32.xlu0 %v7444_v18, %s7106_s27  ;;  %1912 = vrot.lane.b32.xlu1 %v7497_v22, %s7106_s27 }
 0x1e5   :  { %v7882_v56 = vpop.permute.xlu0 %1649  ;;  %v7884_v3 = vpop.permute.xlu1 %2579 }
 0x1e6   :  { %11063 = vst [vmem:[#allocation45_spill] sm:$0xff] %v7882_v56 }
 0x1e7   :  { %1170 = vrot.lane.b32.xlu0 %v7446_v19, %s7107_s25  ;;  %1180 = vrot.lane.b32.xlu1 %v7548_v25, %s7107_s25 }
 0x1e9   :  { %v7892_v58 = vpop.permute.xlu0 %2300  ;;  %v7894_v23 = vpop.permute.xlu1 %1831 }
 0x1ea   :  { %11065 = vst [vmem:[#allocation47_spill] sm:$0xff] %v7892_v58  ;;  %v281_v58 = vadd.f32 %v280_v45, %v7438_v13 }
 0x1eb   :  { %2672 = vrot.lane.b32.xlu0 %v7589_v33, %s7108_s0  ;;  %1168 = vrot.lane.b32.xlu1 %v7497_v22, %s7107_s25  ;;  %v2720_v33 = vld [vmem:[%s10944_s3 + $0x8] sm:$0xff] }
 0x1ec   :  { %3136 = vmatprep.mubr.f32.mxu0 %v2720_v33  ;;  %v275_v33 = vadd.f32 %v7566_v26, %v7440_v14 }
 0x1ed   :  { %v7901_v56 = vpop.permute.xlu0 %2296  ;;  %v7903_v52 = vpop.permute.xlu1 %1738 }
 0x1ee   :  { %11066 = vst [vmem:[#allocation48_spill] sm:$0xff] %v7901_v56  ;;  %11067 = vst [vmem:[#allocation49_spill] sm:$0xff] %v7903_v52  ;;  %v7923_v52 = vmax.f32 %v281_v58, 0.0  ;;  %v7942_v58 = vld [vmem:[%s10944_s3 + $0x18] sm:$0xff]  ;;  %v7950_v26 = vmax.f32 %v275_v33, 0.0 }
 0x1ef   :  { %2668 = vrot.lane.b32.xlu0 %v7548_v25, %s7108_s0  ;;  %2670 = vrot.lane.b32.xlu1 %v7704_v0, %s7108_s0  ;;  %11071 = vst [vmem:[#allocation53_spill] sm:$0xff] %v7942_v58 }
 0x1f0   :  { %6589 = vmatprep.mubr.msk.f32.mxu1 %vm3059_vm1, %v7942_v58 }
 0x1f1   :  { %v7915_v29 = vpop.permute.xlu0 %1556  ;;  %v7917_v56 = vpop.permute.xlu1 %1645 }
 0x1f3   :  { %2583 = vrot.lane.b32.xlu0 %v7913_v15, %s7092_s15  ;;  %1166 = vrot.lane.b32.xlu1 %v7444_v18, %s7107_s25 }
 0x1f5   :  { %v7925_v50 = vpop.permute.xlu0 %2207  ;;  %v7927_v11 = vpop.permute.xlu1 %1552 }
 0x1f6   :  { %11068 = vst [vmem:[#allocation50_spill] sm:$0xff] %v7927_v11  ;;  %v350_v11 = vadd.f32 %v349_v20, %v7440_v14  ;;  %v1103_v20 = vsel %vm1101_vm2, %v7673_v55, %v7572_v27 }
 0x1f7   :  { %2658 = vrot.lane.b32.xlu0 %v7446_v19, %s7108_s0  ;;  %2581 = vrot.lane.b32.xlu1 %v7923_v52, %s7092_s15 }
 0x1f9   :  { %v7935_v45 = vpop.permute.xlu0 %2203  ;;  %v7937_v54 = vpop.permute.xlu1 %1459 }
 0x1fa   :  { %11069 = vst [vmem:[#allocation51_spill] sm:$0xff] %v7935_v45  ;;  %11070 = vst [vmem:[#allocation52_spill] sm:$0xff] %v7937_v54 }
 0x1fb   :  { %1093 = vrot.lane.b32.xlu0 %v7923_v52, %s7085_s28  ;;  %2656 = vrot.lane.b32.xlu1 %v7497_v22, %s7108_s0 }
 0x1fd   :  { %v7952_v19 = vpop.permute.xlu0 %1463  ;;  %v7954_v13 = vpop.permute.xlu1 %1366 }
 0x1fe   :  { %11072 = vst [vmem:[#allocation54_spill] sm:$0xff] %v7954_v13 }
 0x1ff   :  { %2567 = vrot.lane.b32.xlu0 %v7950_v26, %s7092_s15  ;;  %2654 = vrot.lane.b32.xlu1 %v7444_v18, %s7108_s0 }
 0x201   :  { %v7960_v54 = vpop.permute.xlu0 %2114  ;;  %v1090_v45 = vpop.permute.xlu1 %1089 }
 0x202   :  { %v1109_v33 = vsel %vm1101_vm2, %v1090_v45, %v7828_v10  ;;  %v1108_v58 = vsel %vm1101_vm2, %v7770_v21, %v1090_v45  ;;  %v7978_v10 = vmax.f32 %v350_v11, 0.0  ;;  %v1102_v21 = vsel %vm1101_vm2, %v7574_v28, %v7673_v55 }
 0x203   :  { %1079 = vrot.lane.b32.xlu0 %v7950_v26, %s7085_s28  ;;  %1095 = vrot.lane.b32.xlu1 %v7913_v15, %s7085_s28 }
 0x204   :  { %3072 = vmatprep.subr.mxu0 %v1109_v33 }
 0x205   :  { %3073 = vmatpush1.msra.mxu0 %v1108_v58  ;;  %v7971_v13 = vpop.permute.xlu0 %2110  ;;  %v7976_v14 = vpop.permute.xlu1 %1833 }
 0x206   :  { %3074 = vmatprep.subr.mxu0 %v1103_v20  ;;  %v1010_v20 = vsel %vm1008_vm3, %v7681_v57, %v7581_v31 }
 0x207   :  { %3075 = vmatpush1.msra.mxu0 %v1102_v21  ;;  %2488 = vrot.lane.b32.xlu0 %v7923_v52, %s7096_s19 }
 0x208   :  { %2569 = vrot.lane.b32.xlu1 %v7978_v10, %s7092_s15 }
 0x209   :  { %v7987_v45 = vpop.permute.xlu0 %1370  ;;  %v7989_v58 = vpop.permute.xlu1 %2484 }
 0x20b   :  { %1000 = vrot.lane.b32.xlu0 %v7923_v52, %s7086_s2 }
 0x20c   :  { %1081 = vrot.lane.b32.xlu1 %v7978_v10, %s7085_s28 }
 0x20d   :  { %v997_v11 = vpop.permute.xlu0 %996  ;;  %v7995_v33 = vpop.permute.xlu1 %1740 }
 0x20e   :  { %v1016_v28 = vsel %vm1008_vm3, %v997_v11, %v7836_v60  ;;  %v1015_v55 = vsel %vm1008_vm3, %v7778_v24, %v997_v11  ;;  %v1009_v24 = vsel %vm1008_vm3, %v7583_v32, %v7681_v57  ;;  %v917_v32 = vsel %vm915_vm4, %v7689_v59, %v7591_v34 }
 0x20f   :  { %2474 = vrot.lane.b32.xlu0 %v7950_v26, %s7096_s19  ;;  %3076 = vmatprep.subr.mxu0 %v1016_v28 }
 0x210   :  { %2490 = vrot.lane.b32.xlu1 %v7913_v15, %s7096_s19  ;;  %3077 = vmatpush1.msra.mxu0 %v1015_v55 }
 0x211   :  { %v904_v21 = vpop.permute.xlu0 %903  ;;  %3078 = vmatprep.subr.mxu0 %v1010_v20  ;;  %v8008_v27 = vpop.permute.xlu1 %2391 }
 0x212   :  { %3079 = vmatpush1.msra.mxu0 %v1009_v24  ;;  %v923_v11 = vsel %vm915_vm4, %v904_v21, %v7844_v6  ;;  %v922_v28 = vsel %vm915_vm4, %v7786_v30, %v904_v21  ;;  %v916_v30 = vsel %vm915_vm4, %v7593_v35, %v7689_v59  ;;  %v824_v35 = vsel %vm822_vm5, %v7698_v63, %v7599_v36 }
 0x213   :  { %986 = vrot.lane.b32.xlu0 %v7950_v26, %s7086_s2  ;;  %3080 = vmatprep.subr.mxu0 %v923_v11 }
 0x214   :  { %1002 = vrot.lane.b32.xlu1 %v7913_v15, %s7086_s2  ;;  %3081 = vmatpush1.msra.mxu0 %v922_v28 }
 0x215   :  { %v811_v57 = vpop.permute.xlu0 %810  ;;  %3082 = vmatprep.subr.mxu0 %v917_v32  ;;  %v8024_v55 = vpop.permute.xlu1 %1647 }
 0x216   :  { %3083 = vmatpush1.msra.mxu0 %v916_v30  ;;  %v830_v20 = vsel %vm822_vm5, %v811_v57, %v7852_v49  ;;  %v829_v21 = vsel %vm822_vm5, %v7794_v61, %v811_v57  ;;  %v823_v61 = vsel %vm822_vm5, %v7601_v37, %v7698_v63  ;;  %v731_v37 = vsel %vm729_vm6, %v7708_v2, %v7607_v38 }
 0x217   :  { %2395 = vrot.lane.b32.xlu0 %v7923_v52, %s7099_s22  ;;  %3084 = vmatprep.subr.mxu0 %v830_v20 }
 0x218   :  { %2476 = vrot.lane.b32.xlu1 %v7978_v10, %s7096_s19  ;;  %3085 = vmatpush1.msra.mxu0 %v829_v21 }
 0x219   :  { %v718_v59 = vpop.permute.xlu0 %717  ;;  %3086 = vmatprep.subr.mxu0 %v824_v35  ;;  %v8040_v24 = vpop.permute.xlu1 %2298 }
 0x21a   :  { %3087 = vmatpush1.msra.mxu0 %v823_v61  ;;  %v737_v11 = vsel %vm729_vm6, %v718_v59, %v7860_v1  ;;  %v736_v28 = vsel %vm729_vm6, %v7802_v53, %v718_v59  ;;  %v730_v53 = vsel %vm729_vm6, %v7609_v39, %v7708_v2  ;;  %v638_v39 = vsel %vm11001_vm7, %v7716_v5, %v7615_v40 }
 0x21b   :  { %907 = vrot.lane.b32.xlu0 %v7923_v52, %s11022_s29  ;;  %3088 = vmatprep.subr.mxu0 %v737_v11 }
 0x21c   :  { %988 = vrot.lane.b32.xlu1 %v7978_v10, %s7086_s2  ;;  %3089 = vmatpush1.msra.mxu0 %v736_v28 }
 0x21d   :  { %v625_v63 = vpop.permute.xlu0 %624  ;;  %3090 = vmatprep.subr.mxu0 %v731_v37  ;;  %v8056_v32 = vpop.permute.xlu1 %1554  ;;  %v11073_v37 = vld [vmem:[#allocation27_spill] sm:$0xff] }
 0x21e   :  { %3091 = vmatpush1.msra.mxu0 %v730_v53  ;;  %v644_v57 = vsel %vm11001_vm7, %v625_v63, %v7868_v62  ;;  %v643_v30 = vsel %vm11001_vm7, %v7810_v12, %v625_v63  ;;  %v637_v12 = vsel %vm11001_vm7, %v7617_v41, %v7716_v5  ;;  %v545_v41 = vsel %vm10999_vm8, %v7724_v7, %v7623_v42  ;;  %v11074_v53 = vld [vmem:[#allocation14_spill] sm:$0xff] }
 0x21f   :  { %2381 = vrot.lane.b32.xlu0 %v7950_v26, %s7099_s22  ;;  %3092 = vmatprep.subr.mxu0 %v644_v57  ;;  %v1847_v63 = vsel %vm10997_vm10, %v11073_v37, %v7647_v48  ;;  %v11075_v57 = vld [vmem:[#allocation29_spill] sm:$0xff]  ;;  %vm1938_vm7 = vcmask 424960  }
 0x220   :  { %2397 = vrot.lane.b32.xlu1 %v7913_v15, %s7099_s22  ;;  %3093 = vmatpush1.msra.mxu0 %v643_v30  ;;  %v2498_v30 = vsel %vm2496_vm11, %v11075_v57, %v11074_v53 }
 0x221   :  { %v532_v2 = vpop.permute.xlu0 %531  ;;  %3094 = vmatprep.subr.mxu0 %v638_v39  ;;  %v8072_v20 = vpop.permute.xlu1 %2205  ;;  %v11078_v39 = vld [vmem:[#allocation42_spill] sm:$0xff] }
 0x222   :  { %3095 = vmatpush1.msra.mxu0 %v637_v12  ;;  %v551_v21 = vsel %vm10999_vm8, %v532_v2, %v7876_v47  ;;  %v550_v35 = vsel %vm10999_vm8, %v7818_v51, %v532_v2  ;;  %v544_v51 = vsel %vm10999_vm8, %v7625_v43, %v7724_v7  ;;  %v2591_v7 = vsel %vm2589_vm9, %v7732_v9, %v7631_v44  ;;  %v11079_v12 = vld [vmem:[#allocation43_spill] sm:$0xff] }
 0x223   :  { %893 = vrot.lane.b32.xlu0 %v7950_v26, %s11022_s29  ;;  %3096 = vmatprep.subr.mxu0 %v551_v21  ;;  %v1760_v2 = vsel %vm10995_vm12, %v7995_v33, %v11078_v39  ;;  %v2411_v21 = vsel %vm2403_vm13, %v8008_v27, %v11079_v12  ;;  %vm11002_vm8 = vcmask 637952  }
 0x224   :  { %909 = vrot.lane.b32.xlu1 %v7913_v15, %s11022_s29  ;;  %3097 = vmatpush1.msra.mxu0 %v550_v35 }
 0x225   :  { %v2578_v5 = vpop.permute.xlu0 %2577  ;;  %3098 = vmatprep.subr.mxu0 %v545_v41  ;;  %v8088_v59 = vpop.permute.xlu1 %1461 }
 0x226   :  { %3099 = vmatpush1.msra.mxu0 %v544_v51  ;;  %v2597_v61 = vsel %vm2589_vm9, %v2578_v5, %v7884_v3  ;;  %v2596_v11 = vsel %vm2589_vm9, %v7826_v17, %v2578_v5  ;;  %v11080_v5 = vld [vmem:[#allocation49_spill] sm:$0xff] }
 0x227   :  { %2302 = vrot.lane.b32.xlu0 %v7923_v52, %s11010_s23  ;;  %3100 = vmatprep.subr.mxu0 %v7704_v0  ;;  %v2590_v0 = vsel %vm2589_vm9, %v7639_v46, %v7732_v9  ;;  %v2503_v46 = vsel %vm2496_vm11, %v7850_v4, %v7989_v58  ;;  %v1759_v51 = vsel %vm10995_vm12, %v11080_v5, %v7995_v33 }
 0x228   :  { %2383 = vrot.lane.b32.xlu1 %v7978_v10, %s7099_s22  ;;  %3161 = vmatprep.subr.mxu1 %v2597_v61  ;;  %v11081_v61 = vld [vmem:[#allocation44_spill] sm:$0xff] }
 0x229   :  { %3101 = vmatpush1.msra.mxu0 %v7548_v25  ;;  %3162 = vmatpush1.msra.mxu1 %v2596_v11  ;;  %v8103_v43 = vpop.permute.xlu0 %1356  ;;  %v8108_v28 = vpop.permute.xlu1 %2112  ;;  %v2504_v25 = vsel %vm2496_vm11, %v7989_v58, %v7842_v16  ;;  %v2410_v11 = vsel %vm2403_vm13, %v11081_v61, %v8008_v27  ;;  %v11092_v61 = vld [vmem:[#allocation34_spill] sm:$0xff] }
 0x22a   :  { %3102 = vmatprep.subr.mxu0 %v7497_v22  ;;  %3163 = vmatprep.subr.mxu1 %v2591_v7  ;;  %v1853_v22 = vsel %vm10997_vm10, %v7976_v14, %v7834_v8  ;;  %v11082_v7 = vld [vmem:[#allocation18_spill] sm:$0xff] }
 0x22b   :  { %3103 = vmatpush1.msra.mxu0 %v7444_v18  ;;  %3164 = vmatpush1.msra.mxu1 %v2590_v0  ;;  %v1852_v18 = vsel %vm10997_vm10, %v7894_v23, %v7976_v14  ;;  %v11076_v14 = vld [vmem:[#allocation11_spill] sm:$0xff]  ;;  %v11077_v23 = vld [vmem:[#allocation16_spill] sm:$0xff] }
 0x22c   :  { %814 = vrot.lane.b32.xlu0 %v7923_v52, %s7088_s30  ;;  %895 = vrot.lane.b32.xlu1 %v7978_v10, %s11022_s29  ;;  %v1846_v4 = vsel %vm10997_vm10, %v11076_v14, %v11073_v37  ;;  %v2497_v58 = vsel %vm2496_vm11, %v11077_v23, %v11075_v57  ;;  %v11083_v0 = vld [vmem:[#allocation31_spill] sm:$0xff]  ;;  %v11086_v37 = vld [vmem:[#allocation12_spill] sm:$0xff]  ;;  %v11088_v14 = vld [vmem:[#allocation45_spill] sm:$0xff]  ;;  %vm2124_vm10 = vcmask 408576  }
 0x22d   :  { %3104 = vmatprep.subr.mxu0 %v1853_v22  ;;  %3165 = vmatprep.subr.mxu1 %v2504_v25  ;;  %v8131_v9 = vpop.permute.xlu0 %2021  ;;  %v8133_v17 = vpop.permute.xlu1 %1368  ;;  %v1754_v22 = vsel %vm10995_vm12, %v11083_v0, %v11082_v7  ;;  %v11084_v25 = vld [vmem:[#allocation19_spill] sm:$0xff]  ;;  %v1753_v33 = vsel %vm10995_vm12, %v11086_v37, %v11083_v0  ;;  %v11093_v0 = vld [vmem:[#allocation22_spill] sm:$0xff]  ;;  %vm11019_vm12 = vcmask 400384  }
 0x22e   :  { %3105 = vmatpush2.msra.mxu0 %v1852_v18  ;;  %3166 = vmatpush1.msra.mxu1 %v2503_v46  ;;  %v11085_v18 = vld [vmem:[#allocation33_spill] sm:$0xff]  ;;  %v11089_v23 = vld [vmem:[#allocation47_spill] sm:$0xff] }
 0x22f   :  { %3106 = vmatprep.subr.mxu0 %v1847_v63  ;;  %3167 = vmatprep.subr.mxu1 %v2498_v30  ;;  %v2405_v46 = vsel %vm2403_vm13, %v11085_v18, %v11084_v25  ;;  %v11087_v63 = vld [vmem:[#allocation20_spill] sm:$0xff] }
 0x230   :  { %3107 = vmatpush2.msra.mxu0 %v1846_v4  ;;  %3168 = vmatpush1.msra.mxu1 %v2497_v58  ;;  %v2404_v27 = vsel %vm2403_vm13, %v11087_v63, %v11085_v18  ;;  %v1667_v4 = vsel %vm10996_vm14, %v8024_v55, %v11088_v14  ;;  %v2318_v58 = vsel %vm11020_vm15, %v8040_v24, %v11089_v23 }
 0x231   :  { %2288 = vrot.lane.b32.xlu0 %v7950_v26, %s11010_s23  ;;  %2304 = vrot.lane.b32.xlu1 %v7913_v15, %s11010_s23  ;;  %v8157_v35 = vpop.permute.xlu0 %2017  ;;  %v8159_v41 = vpop.permute.xlu1 %2019  ;;  %v1574_v63 = vsel %vm10998_vm0, %v8056_v32, %v7915_v29 }
 0x232   :  { %3108 = vmatprep.subr.mxu0 %v1760_v2  ;;  %3169 = vmatprep.subr.mxu1 %v2411_v21  ;;  %v1666_v2 = vsel %vm10996_vm14, %v7917_v56, %v8024_v55  ;;  %v11090_v21 = vld [vmem:[#allocation48_spill] sm:$0xff]  ;;  %v11096_v55 = vld [vmem:[#allocation23_spill] sm:$0xff] }
 0x233   :  { %3109 = vmatpush2.msra.mxu0 %v1759_v51  ;;  %3170 = vmatpush1.msra.mxu1 %v2410_v11  ;;  %v2317_v5 = vsel %vm11020_vm15, %v11090_v21, %v8040_v24  ;;  %v11091_v51 = vld [vmem:[#allocation21_spill] sm:$0xff] }
 0x234   :  { %3110 = vmatprep.subr.mxu0 %v1754_v22  ;;  %3171 = vmatprep.subr.mxu1 %v2405_v46  ;;  %v1661_v11 = vsel %vm10996_vm14, %v11092_v61, %v11091_v51  ;;  %v11094_v22 = vld [vmem:[#allocation35_spill] sm:$0xff]  ;;  %v11095_v46 = vld [vmem:[#allocation13_spill] sm:$0xff] }
 0x235   :  { %3111 = vmatpush2.msra.mxu0 %v1753_v33  ;;  %3172 = vmatpush1.msra.mxu1 %v2404_v27  ;;  %v8179_v57 = vpop.permute.xlu0 %1277  ;;  %v8181_v30 = vpop.permute.xlu1 %1352  ;;  %v2312_v18 = vsel %vm11020_vm15, %v11094_v22, %v11093_v0  ;;  %v1660_v56 = vsel %vm10996_vm14, %v11095_v46, %v11092_v61  ;;  %v2311_v24 = vsel %vm11020_vm15, %v11096_v55, %v11094_v22  ;;  %v11100_v61 = vld [vmem:[#allocation36_spill] sm:$0xff]  ;;  %v11101_v22 = vld [vmem:[#allocation25_spill] sm:$0xff]  ;;  %vm11000_vm14 = vcmask 629760  }
 0x236   :  { %800 = vrot.lane.b32.xlu0 %v7950_v26, %s7088_s30  ;;  %816 = vrot.lane.b32.xlu1 %v7913_v15, %s7088_s30  ;;  %v2225_v27 = vsel %vm11019_vm12, %v8072_v20, %v7925_v50 }
 0x237   :  { %3112 = vmatprep.subr.mxu0 %v1667_v4  ;;  %3173 = vmatprep.subr.mxu1 %v2318_v58  ;;  %v11097_v4 = vld [vmem:[#allocation50_spill] sm:$0xff] }
 0x238   :  { %3113 = vmatpush2.msra.mxu0 %v1666_v2  ;;  %3174 = vmatpush1.msra.mxu1 %v2317_v5  ;;  %v1573_v58 = vsel %vm10998_vm0, %v11097_v4, %v8056_v32  ;;  %v11098_v2 = vld [vmem:[#allocation51_spill] sm:$0xff]  ;;  %v11099_v5 = vld [vmem:[#allocation24_spill] sm:$0xff]  ;;  %v2132_v4 = vsel %vm2124_vm10, %v8108_v28, %v7960_v54 }
 0x239   :  { %3114 = vmatprep.subr.mxu0 %v1661_v11  ;;  %3175 = vmatprep.subr.mxu1 %v2312_v18  ;;  %v8211_v37 = vpop.permute.xlu0 %2007  ;;  %v8213_v33 = vpop.permute.xlu1 %1275  ;;  %v2224_v21 = vsel %vm11019_vm12, %v11098_v2, %v8072_v20  ;;  %v1568_v11 = vsel %vm10998_vm0, %v11100_v61, %v11099_v5  ;;  %v11102_v18 = vld [vmem:[#allocation37_spill] sm:$0xff]  ;;  %v11103_v32 = vld [vmem:[#allocation15_spill] sm:$0xff]  ;;  %v11104_v20 = vld [vmem:[#allocation26_spill] sm:$0xff] }
 0x23a   :  { %3115 = vmatpush2.msra.mxu0 %v1660_v56  ;;  %3176 = vmatpush1.msra.mxu1 %v2311_v24  ;;  %v2219_v46 = vsel %vm11019_vm12, %v11102_v18, %v11101_v22  ;;  %v1567_v24 = vsel %vm10998_vm0, %v11103_v32, %v11100_v61  ;;  %vm2031_vm0 = vcmask 416768  }
 0x23b   :  { %2209 = vrot.lane.b32.xlu0 %v7923_v52, %s11008_s1  ;;  %2290 = vrot.lane.b32.xlu1 %v7978_v10, %s11010_s23 }
 0x23c   :  { %3116 = vmatprep.subr.mxu0 %v1574_v63  ;;  %3177 = vmatprep.subr.mxu1 %v2225_v27  ;;  %v2218_v63 = vsel %vm11019_vm12, %v11104_v20, %v11102_v18  ;;  %v1481_v27 = vsel %vm11000_vm14, %v8088_v59, %v7952_v19  ;;  %v11106_v18 = vld [vmem:[#allocation28_spill] sm:$0xff]  ;;  %v11109_v20 = vld [vmem:[#allocation39_spill] sm:$0xff] }
 0x23d   :  { %3117 = vmatpush2.msra.mxu0 %v1573_v58  ;;  %3178 = vmatpush1.msra.mxu1 %v2224_v21  ;;  %v2004_v56 = vpop.permute.xlu0 %2003  ;;  %v2006_v55 = vpop.permute.xlu1 %2005  ;;  %v11105_v58 = vld [vmem:[#allocation52_spill] sm:$0xff]  ;;  %v2131_v21 = vsel %vm2124_vm10, %v7971_v13, %v8108_v28 }
 0x23e   :  { %3118 = vmatprep.subr.mxu0 %v1568_v11  ;;  %3179 = vmatprep.subr.mxu1 %v2219_v46  ;;  %v1480_v2 = vsel %vm11000_vm14, %v11105_v58, %v8088_v59  ;;  %v11107_v46 = vld [vmem:[#allocation38_spill] sm:$0xff]  ;;  %v11110_v59 = vld [vmem:[#allocation17_spill] sm:$0xff]  ;;  %v11111_v28 = vld [vmem:[#allocation32_spill] sm:$0xff]  ;;  %v2039_v58 = vsel %vm2031_vm0, %v8159_v41, %v8131_v9 }
 0x23f   :  { %3119 = vmatpush2.msra.mxu0 %v1567_v24  ;;  %3180 = vmatpush1.msra.mxu1 %v2218_v63  ;;  %v1475_v32 = vsel %vm11000_vm14, %v11107_v46, %v11106_v18  ;;  %v11108_v24 = vld [vmem:[#allocation30_spill] sm:$0xff]  ;;  %v1474_v13 = vsel %vm11000_vm14, %v11110_v59, %v11107_v46  ;;  %vm11003_vm14 = vcmask 809984  }
 0x240   :  { %721 = vrot.lane.b32.xlu0 %v7923_v52, %s7089_s12  ;;  %802 = vrot.lane.b32.xlu1 %v7978_v10, %s7088_s30  ;;  %v2126_v63 = vsel %vm2124_vm10, %v11109_v20, %v11108_v24  ;;  %v11112_v46 = vld [vmem:[#allocation54_spill] sm:$0xff] }
 0x241   :  { %3120 = vmatprep.subr.mxu0 %v1481_v27  ;;  %3181 = vmatprep.subr.mxu1 %v2132_v4  ;;  %v8259_v61 = vpop.permute.xlu0 %1263  ;;  %v1274_v11 = vpop.permute.xlu1 %1273  ;;  %v2125_v27 = vsel %vm2124_vm10, %v11111_v28, %v11109_v20  ;;  %v1388_v4 = vsel %vm11002_vm8, %v8133_v17, %v7987_v45  ;;  %v2038_v20 = vsel %vm2031_vm0, %v8157_v35, %v8159_v41 }
 0x242   :  { %3121 = vmatpush2.msra.mxu0 %v1480_v2  ;;  %3182 = vmatpush1.msra.mxu1 %v2131_v21  ;;  %v1294_v35 = vsel %vm11003_vm14, %v1274_v11, %v8213_v33  ;;  %v1295_v41 = vsel %vm11003_vm14, %v8213_v33, %v8179_v57 }
 0x243   :  { %3122 = vmatprep.subr.mxu0 %v1475_v32  ;;  %3183 = vmatprep.subr.mxu1 %v2126_v63  ;;  %v1387_v32 = vsel %vm11002_vm8, %v11112_v46, %v8133_v17  ;;  %v11113_v63 = vld [vmem:[#allocation40_spill] sm:$0xff]  ;;  %v2032_v17 = vsel %vm2031_vm0, %v2004_v56, %v2006_v55 }
 0x244   :  { %3123 = vmatpush2.msra.mxu0 %v1474_v13  ;;  %3184 = vmatpush1.msra.mxu1 %v2125_v27  ;;  %v1382_v59 = vsel %vm11002_vm8, %v11113_v63, %v8103_v43  ;;  %v2033_v13 = vsel %vm2031_vm0, %v2006_v55, %v8211_v37  ;;  %v1381_v28 = vsel %vm11002_vm8, %v8181_v30, %v11113_v63  ;;  %vm1194_vm8 = vcmask 818176  }
 0x245   :  { %2195 = vrot.lane.b32.xlu0 %v7950_v26, %s11008_s1  ;;  %2211 = vrot.lane.b32.xlu1 %v7913_v15, %s11008_s1  ;;  %v8283_v2 = vpop.permute.xlu0 %1928  ;;  %v1262_v21 = vpop.permute.xlu1 %1261 }
 0x246   :  { %3124 = vmatprep.subr.mxu0 %v1388_v4  ;;  %3185 = vmatprep.subr.mxu1 %v2039_v58  ;;  %v1289_v30 = vsel %vm11003_vm14, %v1262_v21, %v8259_v61 }
 0x247   :  { %3125 = vmatpush2.msra.mxu0 %v1387_v32  ;;  %3186 = vmatpush1.msra.mxu1 %v2038_v20 }
 0x248   :  { %3126 = vmatprep.subr.mxu0 %v1382_v59  ;;  %3187 = vmatprep.subr.mxu1 %v2033_v13 }
 0x249   :  { %3127 = vmatpush2.msra.mxu0 %v1381_v28  ;;  %3188 = vmatpush1.msra.mxu1 %v2032_v17  ;;  %v1925_v27 = vpop.permute.xlu0 %1924  ;;  %v1927_v4 = vpop.permute.xlu1 %1926 }
 0x24a   :  { %707 = vrot.lane.b32.xlu0 %v7950_v26, %s7089_s12  ;;  %723 = vrot.lane.b32.xlu1 %v7913_v15, %s7089_s12  ;;  %v1946_v56 = vsel %vm1938_vm7, %v1927_v4, %v8283_v2  ;;  %v1945_v55 = vsel %vm1938_vm7, %v1925_v27, %v1927_v4 }
 0x24b   :  { %3128 = vmatprep.subr.mxu0 %v1295_v41  ;;  %3189 = vmatprep.subr.mxu1 %v1946_v56 }
 0x24c   :  { %3129 = vmatpush2.msra.mxu0 %v1294_v35  ;;  %3190 = vmatpush1.msra.mxu1 %v1945_v55 }
 0x24d   :  { %3130 = vmatprep.subr.mxu0 %v1289_v30  ;;  %v8314_v33 = vpop.permute.xlu0 %1184  ;;  %v1260_v11 = vpop.permute.xlu1 %1259 }
 0x24e   :  { %11114 = vst [vmem:[#allocation27_spill] sm:$0xff] %v8314_v33  ;;  %2116 = vrot.lane.b32.xlu0 %v7923_v52, %s11006_s24  ;;  %2197 = vrot.lane.b32.xlu1 %v7978_v10, %s11008_s1  ;;  %v1288_v58 = vsel %vm11003_vm14, %v1260_v11, %v1262_v21  ;;  %vm2682_vm14 = vcmask 195584  }
 0x24f   :  { %3131 = vmatpush2.msra.mxu0 %v1288_v58 }
 0x251   :  { %v8321_v46 = vpop.permute.xlu0 %1914  ;;  %v1183_v32 = vpop.permute.xlu1 %1182 }
 0x252   :  { %628 = vrot.lane.b32.xlu0 %v7923_v52, %s7090_s13  ;;  %709 = vrot.lane.b32.xlu1 %v7978_v10, %s7089_s12  ;;  %v1202_v20 = vsel %vm1194_vm8, %v1183_v32, %v8314_v33 }
 0x253   :  { %3132 = vmatprep.subr.mxu0 %v1202_v20  ;;  %v2719_v20 = vld [vmem:[%s10944_s3] sm:$0xff] }
 0x255   :  { %v1911_v63 = vpop.permute.xlu0 %1910  ;;  %v1913_v59 = vpop.permute.xlu1 %1912 }
 0x256   :  { %2102 = vrot.lane.b32.xlu0 %v7950_v26, %s11006_s24  ;;  %2118 = vrot.lane.b32.xlu1 %v7913_v15, %s11006_s24  ;;  %v1940_v21 = vsel %vm1938_vm7, %v1913_v59, %v8321_v46  ;;  %v1939_v13 = vsel %vm1938_vm7, %v1911_v63, %v1913_v59 }
 0x257   :  { %3191 = vmatprep.subr.mxu1 %v1940_v21 }
 0x258   :  { %3192 = vmatpush1.msra.mxu1 %v1939_v13 }
 0x259   :  { %v8336_v28 = vpop.permute.xlu0 %1170  ;;  %v1181_v17 = vpop.permute.xlu1 %1180 }
 0x25a   :  { %11115 = vst [vmem:[#allocation14_spill] sm:$0xff] %v8336_v28  ;;  %614 = vrot.lane.b32.xlu0 %v7950_v26, %s7090_s13  ;;  %630 = vrot.lane.b32.xlu1 %v7913_v15, %s7090_s13  ;;  %v1201_v35 = vsel %vm1194_vm8, %v1181_v17, %v1183_v32 }
 0x25b   :  { %3133 = vmatpush2.msra.mxu0 %v1201_v35 }
 0x25d   :  { %v8343_v41 = vpop.permute.xlu0 %2672  ;;  %v1169_v27 = vpop.permute.xlu1 %1168 }
 0x25e   :  { %2023 = vrot.lane.b32.xlu0 %v7923_v52, %s11004_s26  ;;  %2104 = vrot.lane.b32.xlu1 %v7978_v10, %s11006_s24  ;;  %v1196_v4 = vsel %vm1194_vm8, %v1169_v27, %v8336_v28  ;;  %v11123_v28 = vld [vmem:[#allocation46_spill] sm:$0xff]  ;;  %s11134_s24 = smov 99  }
 0x25f   :  { %3134 = vmatprep.subr.mxu0 %v1196_v4 }
 0x261   :  { %v2669_v30 = vpop.permute.xlu0 %2668  ;;  %v2671_v56 = vpop.permute.xlu1 %2670 }
 0x262   :  { %535 = vrot.lane.b32.xlu0 %v7923_v52, %s7091_s14  ;;  %616 = vrot.lane.b32.xlu1 %v7978_v10, %s7090_s13  ;;  %v2690_v55 = vsel %vm2682_vm14, %v2671_v56, %v8343_v41  ;;  %v2689_v11 = vsel %vm2682_vm14, %v2669_v30, %v2671_v56 }
 0x263   :  { %3221 = vmatprep.subr.mxu1 %v2690_v55 }
 0x264   :  { %3222 = vmatpush2.msra.mxu1 %v2689_v11  ;;  %v2724_v11 = vld [vmem:[%s10944_s3 + $0x28] sm:$0xff] }
 0x265   :  { %v8358_v58 = vpop.permute.xlu0 %2583  ;;  %v1167_v32 = vpop.permute.xlu1 %1166 }
 0x266   :  { %11116 = vst [vmem:[#allocation29_spill] sm:$0xff] %v8358_v58  ;;  %2009 = vrot.lane.b32.xlu0 %v7950_v26, %s11004_s26  ;;  %2025 = vrot.lane.b32.xlu1 %v7913_v15, %s11004_s26  ;;  %v1195_v63 = vsel %vm1194_vm8, %v1167_v32, %v1169_v27  ;;  %v2723_v32 = vld [vmem:[%s10944_s3 + $0x20] sm:$0xff] }
 0x267   :  { %3135 = vmatpush2.msra.mxu0 %v1195_v63 }
 0x268   :  { %3137 = vmatmul.mubr.f32.vlgmr.msra.gmra.mxu0 %v2719_v20 }
 0x269   :  { %v8368_v59 = vpop.permute.xlu0 %2658  ;;  %v2582_v21 = vpop.permute.xlu1 %2581  ;;  %3142 = vmatprep.mubr.f32.mxu0 %v2724_v11 }
 0x26a   :  { %521 = vrot.lane.b32.xlu0 %v7950_v26, %s7091_s14  ;;  %537 = vrot.lane.b32.xlu1 %v7913_v15, %s7091_s14  ;;  %v2599_v13 = vsel %vm2589_vm9, %v2582_v21, %v8358_v58  ;;  %v2598_v17 = vsel %vm2589_vm9, %v7884_v3, %v2582_v21  ;;  %v8387_v3 = vld [vmem:[%s10944_s3 + $0x10] sm:$0xff]  ;;  %v11120_v58 = vld [vmem:[#allocation53_spill] sm:$0xff] }
 0x26b   :  { %3339 = vmatprep.subr.mxu0 %v2599_v13  ;;  %v2728_v13 = vld [vmem:[%s10944_s3 + $0x48] sm:$0xff] }
 0x26c   :  { %3340 = vmatpush1.msra.mxu0 %v2598_v17  ;;  %v11117_v17 = vld [vmem:[#allocation41_spill] sm:$0xff] }
 0x26d   :  { %v1094_v35 = vpop.permute.xlu0 %1093  ;;  %v2657_v27 = vpop.permute.xlu1 %2656  ;;  %3143 = vmatmul.mubr.f32.gmra.mxu0 %v2723_v32 }
 0x26e   :  { %1930 = vrot.lane.b32.xlu0 %v7923_v52, %s7106_s27  ;;  %2011 = vrot.lane.b32.xlu1 %v7978_v10, %s11004_s26  ;;  %v2684_v4 = vsel %vm2682_vm14, %v2657_v27, %v8368_v59  ;;  %s7110_s26 = smov 116  }
 0x26f   :  { %3223 = vmatprep.subr.mxu1 %v2684_v4  ;;  %3148 = vmatprep.mubr.f32.mxu0 %v2728_v13  ;;  %v2727_v4 = vld [vmem:[%s10944_s3 + $0x40] sm:$0xff] }
 0x270   :  { %v11119_v13 = vld [vmem:[#allocation6_spill] sm:$0xff] }
 0x271   :  { %v2568_v30 = vpop.permute.xlu0 %2567  ;;  %v2655_v56 = vpop.permute.xlu1 %2654  ;;  %3149 = vmatmul.mubr.f32.gmra.mxu0 %v2727_v4 }
 0x272   :  { %1916 = vrot.lane.b32.xlu0 %v7950_v26, %s7106_s27  ;;  %523 = vrot.lane.b32.xlu1 %v7978_v10, %s7091_s14  ;;  %v2683_v55 = vsel %vm2682_vm14, %v2655_v56, %v2657_v27  ;;  %v1110_v27 = vsel %vm1101_vm2, %v11117_v17, %v1094_v35  ;;  %v357_v56 = vpop.f32.mrf.mxu0 }
 0x273   :  { %3224 = vmatpush2.msra.mxu1 %v2683_v55  ;;  %v358_v17 = vadd.f32 %v357_v56, %v11119_v13 }
 0x274   :  { %3226 = vmatmul.mubr.f32.vlgmr.msra.gmra.mxu1 %v8387_v3 }
 0x275   :  { %v1080_v20 = vpop.permute.xlu0 %1079  ;;  %v8401_v63 = vpop.permute.xlu1 %1095 }
 0x276   :  { %2674 = vrot.lane.b32.xlu0 %v7923_v52, %s7108_s0  ;;  %1932 = vrot.lane.b32.xlu1 %v7913_v15, %s7106_s27  ;;  %v1111_v21 = vsel %vm1101_vm2, %v1094_v35, %v8401_v63  ;;  %v2732_v35 = vld [vmem:[%s10944_s3 + $0x68] sm:$0xff] }
 0x277   :  { %3250 = vmatprep.subr.mxu1 %v1111_v21  ;;  %3154 = vmatprep.mubr.f32.mxu0 %v2732_v35  ;;  %v2731_v21 = vld [vmem:[%s10944_s3 + $0x60] sm:$0xff] }
 0x278   :  { %3251 = vmatpush1.msra.mxu1 %v1110_v27  ;;  %v2592_v27 = vsel %vm2589_vm9, %v7631_v44, %v2568_v30  ;;  %3155 = vmatmul.mubr.f32.gmra.mxu0 %v2731_v21  ;;  %v11121_v44 = vld [vmem:[#allocation9_spill] sm:$0xff]  ;;  %v6877_v21 = vpop.f32.mrf.mxu1 }
 0x279   :  { %v2489_v55 = vpop.permute.xlu0 %2488  ;;  %6593 = vmatprep.mubr.msk.f32.mxu0 %vm3059_vm1, %v11120_v58 }
 0x27a   :  { %1837 = vrot.lane.b32.xlu0 %v7923_v52, %s7093_s16  ;;  %1918 = vrot.lane.b32.xlu1 %v7978_v10, %s7106_s27  ;;  %v8421_v11 = vpop.permute.xlu1 %2569 }
 0x27b   :  { %11118 = vst [vmem:[#allocation11_spill] sm:$0xff] %v8421_v11  ;;  %v2593_v32 = vsel %vm2589_vm9, %v2568_v30, %v8421_v11  ;;  %v1104_v30 = vsel %vm1101_vm2, %v11121_v44, %v1080_v20 }
 0x27c   :  { %3341 = vmatprep.subr.mxu0 %v2593_v32  ;;  %v8444_v32 = vmax.f32 %v358_v17, 0.0  ;;  %v432_v17 = vadd.f32 %v6877_v21, %v11119_v13 }
 0x27d   :  { %3342 = vmatpush1.msra.mxu0 %v2592_v27  ;;  %v1001_v4 = vpop.permute.xlu0 %1000 }
 0x27e   :  { %2660 = vrot.lane.b32.xlu0 %v7950_v26, %s7108_s0  ;;  %2676 = vrot.lane.b32.xlu1 %v7913_v15, %s7108_s0  ;;  %v8440_v35 = vpop.permute.xlu1 %1081  ;;  %v8469_v21 = vmax.f32 %v432_v17, 0.0 }
 0x27f   :  { %v1105_v56 = vsel %vm1101_vm2, %v1080_v20, %v8440_v35  ;;  %v2505_v20 = vsel %vm2496_vm11, %v7842_v16, %v2489_v55  ;;  %v1017_v16 = vsel %vm1008_vm3, %v7836_v60, %v1001_v4 }
 0x280   :  { %3252 = vmatprep.subr.mxu1 %v1105_v56  ;;  %v11122_v56 = vld [vmem:[#allocation7_spill] sm:$0xff] }
 0x281   :  { %3253 = vmatpush1.msra.mxu1 %v1104_v30  ;;  %v2475_v58 = vpop.permute.xlu0 %2474  ;;  %v352_v33 = vadd.f32 %v11123_v28, %v11122_v56 }
 0x282   :  { %1097 = vrot.lane.b32.xlu0 %v8444_v32, %s7085_s28  ;;  %1839 = vrot.lane.b32.xlu1 %v7913_v15, %s7093_s16  ;;  %v8452_v27 = vpop.permute.xlu1 %2490  ;;  %v2499_v60 = vsel %vm2496_vm11, %v11074_v53, %v2475_v58 }
 0x283   :  { %v2506_v11 = vsel %vm2496_vm11, %v2489_v55, %v8452_v27  ;;  %v8471_v28 = vmax.f32 %v352_v33, 0.0  ;;  %v426_v55 = vpop.f32.mrf.mxu1 }
 0x284   :  { %3343 = vmatprep.subr.mxu0 %v2506_v11  ;;  %v427_v33 = vadd.f32 %v426_v55, %v11122_v56 }
 0x285   :  { %3344 = vmatpush1.msra.mxu0 %v2505_v20  ;;  %v987_v44 = vpop.permute.xlu0 %986 }
 0x286   :  { %1823 = vrot.lane.b32.xlu0 %v7950_v26, %s7093_s16  ;;  %2662 = vrot.lane.b32.xlu1 %v7978_v10, %s7108_s0  ;;  %v8465_v30 = vpop.permute.xlu1 %1002  ;;  %v1011_v56 = vsel %vm1008_vm3, %v7581_v31, %v987_v44 }
 0x287   :  { %v1018_v13 = vsel %vm1008_vm3, %v1001_v4, %v8465_v30 }
 0x288   :  { %3254 = vmatprep.subr.mxu1 %v1018_v13 }
 0x289   :  { %3255 = vmatpush1.msra.mxu1 %v1017_v16  ;;  %v2396_v11 = vpop.permute.xlu0 %2395 }
 0x28a   :  { %1083 = vrot.lane.b32.xlu0 %v8471_v28, %s7085_s28  ;;  %1099 = vrot.lane.b32.xlu1 %v8469_v21, %s7085_s28  ;;  %v8479_v20 = vpop.permute.xlu1 %2476 }
 0x28b   :  { %11124 = vst [vmem:[#allocation16_spill] sm:$0xff] %v8479_v20  ;;  %v2500_v17 = vsel %vm2496_vm11, %v2475_v58, %v8479_v20  ;;  %v8494_v20 = vmax.f32 %v427_v33, 0.0 }
 0x28c   :  { %3345 = vmatprep.subr.mxu0 %v2500_v17  ;;  %v2412_v17 = vsel %vm2403_vm13, %v11079_v12, %v2396_v11 }
 0x28d   :  { %3346 = vmatpush1.msra.mxu0 %v2499_v60  ;;  %v908_v4 = vpop.permute.xlu0 %907 }
 0x28e   :  { %1744 = vrot.lane.b32.xlu0 %v7923_v52, %s7094_s17  ;;  %1825 = vrot.lane.b32.xlu1 %v7978_v10, %s7093_s16  ;;  %v8490_v13 = vpop.permute.xlu1 %988  ;;  %v924_v60 = vsel %vm915_vm4, %v7844_v6, %v908_v4 }
 0x28f   :  { %v1012_v16 = vsel %vm1008_vm3, %v987_v44, %v8490_v13 }
 0x290   :  { %3256 = vmatprep.subr.mxu1 %v1012_v16 }
 0x291   :  { %3257 = vmatpush1.msra.mxu1 %v1011_v56  ;;  %v2382_v53 = vpop.permute.xlu0 %2381 }
 0x292   :  { %1004 = vrot.lane.b32.xlu0 %v8444_v32, %s7086_s2  ;;  %1085 = vrot.lane.b32.xlu1 %v8494_v20, %s7085_s28  ;;  %v8502_v58 = vpop.permute.xlu1 %2397  ;;  %v2406_v56 = vsel %vm2403_vm13, %v11084_v25, %v2382_v53  ;;  %s11125_s28 = smov 76  }
 0x293   :  { %v2413_v55 = vsel %vm2403_vm13, %v2396_v11, %v8502_v58 }
 0x294   :  { %3347 = vmatprep.subr.mxu0 %v2413_v55 }
 0x295   :  { %3348 = vmatpush1.msra.mxu0 %v2412_v17  ;;  %v894_v33 = vpop.permute.xlu0 %893 }
 0x296   :  { %1730 = vrot.lane.b32.xlu0 %v7950_v26, %s7094_s17  ;;  %1746 = vrot.lane.b32.xlu1 %v7913_v15, %s7094_s17  ;;  %v8512_v31 = vpop.permute.xlu1 %909  ;;  %v918_v17 = vsel %vm915_vm4, %v7591_v34, %v894_v33 }
 0x297   :  { %v925_v44 = vsel %vm915_vm4, %v908_v4, %v8512_v31 }
 0x298   :  { %3258 = vmatprep.subr.mxu1 %v925_v44 }
 0x299   :  { %3259 = vmatpush1.msra.mxu1 %v924_v60  ;;  %v2303_v16 = vpop.permute.xlu0 %2302 }
 0x29a   :  { %990 = vrot.lane.b32.xlu0 %v8471_v28, %s7086_s2  ;;  %1006 = vrot.lane.b32.xlu1 %v8469_v21, %s7086_s2  ;;  %v8522_v12 = vpop.permute.xlu1 %2383  ;;  %v2319_v34 = vsel %vm11020_vm15, %v11089_v23, %v2303_v16 }
 0x29b   :  { %v2407_v11 = vsel %vm2403_vm13, %v2382_v53, %v8522_v12 }
 0x29c   :  { %3349 = vmatprep.subr.mxu0 %v2407_v11 }
 0x29d   :  { %3350 = vmatpush1.msra.mxu0 %v2406_v56 }
 0x29e   :  { %1651 = vrot.lane.b32.xlu0 %v7923_v52, %s7095_s18  ;;  %1732 = vrot.lane.b32.xlu1 %v7978_v10, %s7094_s17  ;;  %v815_v6 = vpop.permute.xlu0 %814  ;;  %v8532_v4 = vpop.permute.xlu1 %895 }
 0x29f   :  { %v919_v55 = vsel %vm915_vm4, %v894_v33, %v8532_v4  ;;  %v831_v56 = vsel %vm822_vm5, %v7852_v49, %v815_v6 }
 0x2a0   :  { %3260 = vmatprep.subr.mxu1 %v919_v55 }
 0x2a1   :  { %3261 = vmatpush1.msra.mxu1 %v918_v17 }
 0x2a2   :  { %911 = vrot.lane.b32.xlu0 %v8444_v32, %s11022_s29  ;;  %992 = vrot.lane.b32.xlu1 %v8494_v20, %s7086_s2 }
 0x2a3   :  { %v2289_v25 = vpop.permute.xlu0 %2288  ;;  %v8542_v53 = vpop.permute.xlu1 %2304 }
 0x2a4   :  { %v2320_v44 = vsel %vm11020_vm15, %v2303_v16, %v8542_v53  ;;  %v2313_v17 = vsel %vm11020_vm15, %v11093_v0, %v2289_v25 }
 0x2a5   :  { %3351 = vmatprep.subr.mxu0 %v2320_v44 }
 0x2a6   :  { %1637 = vrot.lane.b32.xlu0 %v7950_v26, %s7095_s18  ;;  %1653 = vrot.lane.b32.xlu1 %v7913_v15, %s7095_s18 }
 0x2a7   :  { %3352 = vmatpush1.msra.mxu0 %v2319_v34 }
 0x2a8   :  { %v801_v33 = vpop.permute.xlu0 %800  ;;  %v8552_v60 = vpop.permute.xlu1 %816 }
 0x2a9   :  { %v832_v11 = vsel %vm822_vm5, %v815_v6, %v8552_v60  ;;  %v825_v34 = vsel %vm822_vm5, %v7599_v36, %v801_v33  ;;  %v8598_v36 = vld [vmem:[%s10944_s3 + $0x30] sm:$0xff] }
 0x2aa   :  { %897 = vrot.lane.b32.xlu0 %v8471_v28, %s11022_s29  ;;  %913 = vrot.lane.b32.xlu1 %v8469_v21, %s11022_s29 }
 0x2ab   :  { %3262 = vmatprep.subr.mxu1 %v832_v11 }
 0x2ac   :  { %3263 = vmatpush1.msra.mxu1 %v831_v56  ;;  %v8593_v56 = vld [vmem:[%s10944_s3 + $0x38] sm:$0xff] }
 0x2ad   :  { %v2210_v55 = vpop.permute.xlu0 %2209  ;;  %v8562_v23 = vpop.permute.xlu1 %2290  ;;  %6590 = vmatprep.mubr.msk.f32.mxu1 %vm3059_vm1, %v8593_v56 }
 0x2ae   :  { %1558 = vrot.lane.b32.xlu0 %v7923_v52, %s11125_s28  ;;  %1639 = vrot.lane.b32.xlu1 %v7978_v10, %s7095_s18  ;;  %v2314_v16 = vsel %vm11020_vm15, %v2289_v25, %v8562_v23 }
 0x2af   :  { %3353 = vmatprep.subr.mxu0 %v2314_v16  ;;  %3232 = vmatmul.mubr.f32.gmra.mxu1 %v8598_v36 }
 0x2b0   :  { %3354 = vmatpush1.msra.mxu0 %v2313_v17 }
 0x2b2   :  { %818 = vrot.lane.b32.xlu0 %v8444_v32, %s7088_s30  ;;  %899 = vrot.lane.b32.xlu1 %v8494_v20, %s11022_s29  ;;  %v722_v49 = vpop.permute.xlu0 %721  ;;  %v8576_v6 = vpop.permute.xlu1 %802 }
 0x2b3   :  { %v826_v44 = vsel %vm822_vm5, %v801_v33, %v8576_v6  ;;  %v2226_v33 = vsel %vm11019_vm12, %v7925_v50, %v2210_v55  ;;  %v738_v50 = vsel %vm729_vm6, %v7860_v1, %v722_v49 }
 0x2b4   :  { %3264 = vmatprep.subr.mxu1 %v826_v44  ;;  %v8614_v44 = vld [vmem:[%s10944_s3 + $0x58] sm:$0xff] }
 0x2b5   :  { %3265 = vmatpush1.msra.mxu1 %v825_v34  ;;  %v8619_v34 = vld [vmem:[%s10944_s3 + $0x50] sm:$0xff]  ;;  %6591 = vmatprep.mubr.msk.f32.mxu1 %vm3059_vm1, %v8614_v44 }
 0x2b6   :  { %1544 = vrot.lane.b32.xlu0 %v7950_v26, %s11125_s28  ;;  %1560 = vrot.lane.b32.xlu1 %v7913_v15, %s11125_s28 }
 0x2b7   :  { %v2196_v0 = vpop.permute.xlu0 %2195  ;;  %v8586_v25 = vpop.permute.xlu1 %2211  ;;  %3238 = vmatmul.mubr.f32.gmra.mxu1 %v8619_v34 }
 0x2b8   :  { %11126 = vst [vmem:[#allocation42_spill] sm:$0xff] %v8586_v25  ;;  %v2227_v11 = vsel %vm11019_vm12, %v2210_v55, %v8586_v25 }
 0x2b9   :  { %3355 = vmatprep.subr.mxu0 %v2227_v11 }
 0x2ba   :  { %804 = vrot.lane.b32.xlu0 %v8471_v28, %s7088_s30  ;;  %820 = vrot.lane.b32.xlu1 %v8469_v21, %s7088_s30 }
 0x2bb   :  { %3356 = vmatpush1.msra.mxu0 %v2226_v33 }
 0x2bc   :  { %v708_v16 = vpop.permute.xlu0 %707  ;;  %v8609_v17 = vpop.permute.xlu1 %723 }
 0x2bd   :  { %v739_v11 = vsel %vm729_vm6, %v722_v49, %v8609_v17 }
 0x2be   :  { %1465 = vrot.lane.b32.xlu0 %v7923_v52, %s11127_s20  ;;  %1546 = vrot.lane.b32.xlu1 %v7978_v10, %s11125_s28 }
 0x2bf   :  { %3266 = vmatprep.subr.mxu1 %v739_v11  ;;  %v2220_v11 = vsel %vm11019_vm12, %v11101_v22, %v2196_v0 }
 0x2c0   :  { %3267 = vmatpush1.msra.mxu1 %v738_v50  ;;  %v2117_v55 = vpop.permute.xlu0 %2116  ;;  %v8632_v33 = vpop.permute.xlu1 %2197 }
 0x2c1   :  { %11128 = vst [vmem:[#allocation43_spill] sm:$0xff] %v8632_v33  ;;  %v2221_v25 = vsel %vm11019_vm12, %v2196_v0, %v8632_v33  ;;  %vm11129_vm12 = vcmask 1031168  }
 0x2c2   :  { %725 = vrot.lane.b32.xlu0 %v8444_v32, %s7089_s12  ;;  %806 = vrot.lane.b32.xlu1 %v8494_v20, %s7088_s30  ;;  %vm11131_vm15 = vmmov %vm11129_vm12 }
 0x2c3   :  { %3357 = vmatprep.subr.mxu0 %v2221_v25  ;;  %v732_v25 = vsel %vm729_vm6, %v7607_v38, %v708_v16 }
 0x2c4   :  { %3358 = vmatpush1.msra.mxu0 %v2220_v11  ;;  %v629_v1 = vpop.permute.xlu0 %628  ;;  %v8642_v49 = vpop.permute.xlu1 %709  ;;  %v2133_v11 = vsel %vm2124_vm10, %v7960_v54, %v2117_v55 }
 0x2c5   :  { %v733_v50 = vsel %vm729_vm6, %v708_v16, %v8642_v49 }
 0x2c6   :  { %1451 = vrot.lane.b32.xlu0 %v7950_v26, %s11127_s20  ;;  %1467 = vrot.lane.b32.xlu1 %v7913_v15, %s11127_s20 }
 0x2c7   :  { %3268 = vmatprep.subr.mxu1 %v733_v50 }
 0x2c8   :  { %3269 = vmatpush1.msra.mxu1 %v732_v25  ;;  %v2103_v33 = vpop.permute.xlu0 %2102  ;;  %v8652_v22 = vpop.permute.xlu1 %2118  ;;  %v645_v25 = vsel %vm11131_vm15, %v7868_v62, %v629_v1  ;;  %vm11132_vm15 = vmmov %vm11129_vm12 }
 0x2c9   :  { %v2134_v0 = vsel %vm2124_vm10, %v2117_v55, %v8652_v22 }
 0x2ca   :  { %711 = vrot.lane.b32.xlu0 %v8471_v28, %s7089_s12  ;;  %727 = vrot.lane.b32.xlu1 %v8469_v21, %s7089_s12 }
 0x2cb   :  { %3359 = vmatprep.subr.mxu0 %v2134_v0 }
 0x2cc   :  { %3360 = vmatpush1.msra.mxu0 %v2133_v11  ;;  %v615_v50 = vpop.permute.xlu0 %614  ;;  %v8662_v38 = vpop.permute.xlu1 %630  ;;  %v2127_v11 = vsel %vm2124_vm10, %v11108_v24, %v2103_v33 }
 0x2cd   :  { %v646_v16 = vsel %vm11129_vm12, %v629_v1, %v8662_v38 }
 0x2ce   :  { %1372 = vrot.lane.b32.xlu0 %v7923_v52, %s11130_s21  ;;  %1453 = vrot.lane.b32.xlu1 %v7978_v10, %s11127_s20 }
 0x2cf   :  { %3270 = vmatprep.subr.mxu1 %v646_v16 }
 0x2d0   :  { %3271 = vmatpush1.msra.mxu1 %v645_v25  ;;  %v2024_v0 = vpop.permute.xlu0 %2023  ;;  %v8672_v54 = vpop.permute.xlu1 %2104  ;;  %v639_v25 = vsel %vm11132_vm15, %v7615_v40, %v615_v50 }
 0x2d1   :  { %v2128_v55 = vsel %vm2124_vm10, %v2103_v33, %v8672_v54 }
 0x2d2   :  { %632 = vrot.lane.b32.xlu0 %v8444_v32, %s7090_s13  ;;  %713 = vrot.lane.b32.xlu1 %v8494_v20, %s7089_s12 }
 0x2d3   :  { %3361 = vmatprep.subr.mxu0 %v2128_v55 }
 0x2d4   :  { %3362 = vmatpush1.msra.mxu0 %v2127_v11  ;;  %v536_v16 = vpop.permute.xlu0 %535  ;;  %v8682_v62 = vpop.permute.xlu1 %616  ;;  %v2040_v11 = vsel %vm2031_vm0, %v8131_v9, %v2024_v0 }
 0x2d5   :  { %v640_v1 = vsel %vm11129_vm12, %v615_v50, %v8682_v62  ;;  %vm11133_vm12 = vcmask 1039360  }
 0x2d6   :  { %1358 = vrot.lane.b32.xlu0 %v7950_v26, %s11130_s21  ;;  %1374 = vrot.lane.b32.xlu1 %v7913_v15, %s11130_s21  ;;  %vm11135_vm15 = vmmov %vm11133_vm12 }
 0x2d7   :  { %3272 = vmatprep.subr.mxu1 %v640_v1 }
 0x2d8   :  { %3273 = vmatpush1.msra.mxu1 %v639_v25  ;;  %v2010_v55 = vpop.permute.xlu0 %2009  ;;  %v8692_v24 = vpop.permute.xlu1 %2025  ;;  %v552_v25 = vsel %vm11135_vm15, %v7876_v47, %v536_v16  ;;  %vm11136_vm15 = vmmov %vm11133_vm12 }
 0x2d9   :  { %v2041_v33 = vsel %vm2031_vm0, %v2024_v0, %v8692_v24 }
 0x2da   :  { %618 = vrot.lane.b32.xlu0 %v8471_v28, %s7090_s13  ;;  %634 = vrot.lane.b32.xlu1 %v8469_v21, %s7090_s13 }
 0x2db   :  { %3363 = vmatprep.subr.mxu0 %v2041_v33 }
 0x2dc   :  { %3364 = vmatpush1.msra.mxu0 %v2040_v11  ;;  %v522_v1 = vpop.permute.xlu0 %521  ;;  %v8702_v40 = vpop.permute.xlu1 %537  ;;  %v2034_v11 = vsel %vm2031_vm0, %v8211_v37, %v2010_v55 }
 0x2dd   :  { %v553_v50 = vsel %vm11133_vm12, %v536_v16, %v8702_v40 }
 0x2de   :  { %1279 = vrot.lane.b32.xlu0 %v7923_v52, %s11134_s24  ;;  %1360 = vrot.lane.b32.xlu1 %v7978_v10, %s11130_s21 }
 0x2df   :  { %3274 = vmatprep.subr.mxu1 %v553_v50 }
 0x2e0   :  { %3275 = vmatpush1.msra.mxu1 %v552_v25  ;;  %v1931_v33 = vpop.permute.xlu0 %1930  ;;  %v8712_v9 = vpop.permute.xlu1 %2011  ;;  %v546_v25 = vsel %vm11136_vm15, %v7623_v42, %v522_v1  ;;  %v11139_v42 = vld [vmem:[#allocation8_spill] sm:$0xff] }
 0x2e1   :  { %v2035_v0 = vsel %vm2031_vm0, %v2010_v55, %v8712_v9 }
 0x2e2   :  { %539 = vrot.lane.b32.xlu0 %v8444_v32, %s7091_s14  ;;  %620 = vrot.lane.b32.xlu1 %v8494_v20, %s7090_s13 }
 0x2e3   :  { %3365 = vmatprep.subr.mxu0 %v2035_v0 }
 0x2e4   :  { %3366 = vmatpush1.msra.mxu0 %v2034_v11  ;;  %v1917_v50 = vpop.permute.xlu0 %1916  ;;  %v8722_v47 = vpop.permute.xlu1 %523  ;;  %v11138_v11 = vld [vmem:[#allocation10_spill] sm:$0xff] }
 0x2e5   :  { %v547_v16 = vsel %vm11133_vm12, %v522_v1, %v8722_v47  ;;  %v1947_v1 = vsel %vm1938_vm7, %v8283_v2, %v1931_v33  ;;  %v1941_v2 = vsel %vm1938_vm7, %v8321_v46, %v1917_v50  ;;  %vm11140_vm12 = vcmask 433152  }
 0x2e6   :  { %1265 = vrot.lane.b32.xlu0 %v7950_v26, %s11134_s24  ;;  %1281 = vrot.lane.b32.xlu1 %v7913_v15, %s11134_s24  ;;  %vm11141_vm15 = vmmov %vm11140_vm12 }
 0x2e7   :  { %3276 = vmatprep.subr.mxu1 %v547_v16 }
 0x2e8   :  { %3277 = vmatpush1.msra.mxu1 %v546_v25  ;;  %v2675_v0 = vpop.permute.xlu0 %2674  ;;  %v8732_v37 = vpop.permute.xlu1 %1932 }
 0x2e9   :  { %11137 = vst [vmem:[#allocation49_spill] sm:$0xff] %v8732_v37  ;;  %3278 = vmatprep.subr.mxu1 %v7923_v52  ;;  %v1948_v55 = vsel %vm1938_vm7, %v1931_v33, %v8732_v37  ;;  %v2691_v46 = vsel %vm2682_vm14, %v8343_v41, %v2675_v0 }
 0x2ea   :  { %3279 = vmatpush1.msra.mxu1 %v11138_v11  ;;  %525 = vrot.lane.b32.xlu0 %v8471_v28, %s7091_s14  ;;  %v2734_v11 = vld [vmem:[%s10944_s3 + $0x78] sm:$0xff] }
 0x2eb   :  { %541 = vrot.lane.b32.xlu1 %v8469_v21, %s7091_s14  ;;  %3280 = vmatprep.subr.mxu1 %v7950_v26 }
 0x2ec   :  { %3367 = vmatprep.subr.mxu0 %v1948_v55  ;;  %3281 = vmatpush1.msra.mxu1 %v11139_v42  ;;  %v1838_v16 = vpop.permute.xlu0 %1837  ;;  %v8746_v25 = vpop.permute.xlu1 %1918  ;;  %v8757_v55 = vld [vmem:[%s10944_s3 + $0x70] sm:$0xff] }
 0x2ed   :  { %3368 = vmatpush1.msra.mxu0 %v1947_v1  ;;  %v1942_v37 = vsel %vm1938_vm7, %v1917_v50, %v8746_v25  ;;  %6592 = vmatprep.mubr.msk.f32.mxu1 %vm3059_vm1, %v2734_v11 }
 0x2ee   :  { %1186 = vrot.lane.b32.xlu0 %v7923_v52, %s7107_s25  ;;  %3369 = vmatprep.subr.mxu0 %v1942_v37  ;;  %v7067_v52 = vld [vmem:[%s10944_s3 + $0x8] sm:$0xff] }
 0x2ef   :  { %1267 = vrot.lane.b32.xlu1 %v7978_v10, %s11134_s24  ;;  %3370 = vmatpush1.msra.mxu0 %v1941_v2 }
 0x2f0   :  { %v2661_v33 = vpop.permute.xlu0 %2660  ;;  %v8765_v42 = vpop.permute.xlu1 %2676  ;;  %3244 = vmatmul.mubr.f32.gmra.mxu1 %v8757_v55 }
 0x2f1   :  { %v2692_v1 = vsel %vm2682_vm14, %v2675_v0, %v8765_v42  ;;  %3314 = vmatprep.mubr.f32.mxu1 %v7067_v52 }
 0x2f2   :  { %1172 = vrot.lane.b32.xlu0 %v7950_v26, %s7107_s25  ;;  %3399 = vmatprep.subr.mxu0 %v2692_v1  ;;  %v1854_v26 = vsel %vm11141_vm15, %v7834_v8, %v1838_v16  ;;  %vm11142_vm15 = vmmov %vm11140_vm12 }
 0x2f3   :  { %527 = vrot.lane.b32.xlu1 %v8494_v20, %s7091_s14  ;;  %3400 = vmatpush2.msra.mxu0 %v2691_v46  ;;  %v2685_v46 = vsel %vm2682_vm14, %v8368_v59, %v2661_v33 }
 0x2f4   :  { %v1098_v50 = vpop.permute.xlu0 %1097  ;;  %v8779_v37 = vpop.permute.xlu1 %1839 }
 0x2f5   :  { %v1855_v2 = vsel %vm11140_vm12, %v1838_v16, %v8779_v37  ;;  %v1112_v59 = vsel %vm1101_vm2, %v8401_v63, %v1098_v50 }
 0x2f6   :  { %2585 = vrot.lane.b32.xlu0 %v8444_v32, %s7092_s15  ;;  %3282 = vmatprep.subr.mxu1 %v1855_v2 }
 0x2f7   :  { %1188 = vrot.lane.b32.xlu1 %v7913_v15, %s7107_s25  ;;  %3283 = vmatpush2.msra.mxu1 %v1854_v26 }
 0x2f8   :  { %v1824_v41 = vpop.permute.xlu0 %1823  ;;  %v8789_v0 = vpop.permute.xlu1 %2662 }
 0x2f9   :  { %v2686_v1 = vsel %vm2682_vm14, %v2661_v33, %v8789_v0  ;;  %v1848_v63 = vsel %vm11142_vm15, %v7647_v48, %v1824_v41 }
 0x2fa   :  { %1841 = vrot.lane.b32.xlu0 %v8444_v32, %s7093_s16  ;;  %3401 = vmatprep.subr.mxu0 %v2686_v1 }
 0x2fb   :  { %1174 = vrot.lane.b32.xlu1 %v7978_v10, %s7107_s25  ;;  %3402 = vmatpush2.msra.mxu0 %v2685_v46 }
 0x2fc   :  { %v1084_v8 = vpop.permute.xlu0 %1083  ;;  %v1100_v16 = vpop.permute.xlu1 %1099  ;;  %3404 = vmatmul.mubr.f32.vlgmr.msra.gmra.mxu0 %v8387_v3 }
 0x2fd   :  { %v1113_v2 = vsel %vm1101_vm2, %v1098_v50, %v1100_v16  ;;  %6594 = vmatprep.mubr.msk.f32.mxu0 %vm3059_vm1, %v8593_v56 }
 0x2fe   :  { %2571 = vrot.lane.b32.xlu0 %v8471_v28, %s7092_s15  ;;  %3428 = vmatprep.subr.mxu0 %v1113_v2 }
 0x2ff   :  { %2587 = vrot.lane.b32.xlu1 %v8469_v21, %s7092_s15  ;;  %3429 = vmatpush1.msra.mxu0 %v1112_v59 }
 0x300   :  { %v1745_v33 = vpop.permute.xlu0 %1744  ;;  %v8809_v26 = vpop.permute.xlu1 %1825  ;;  %3410 = vmatmul.mubr.f32.gmra.mxu0 %v8598_v36 }
 0x301   :  { %v1849_v3 = vsel %vm11140_vm12, %v1824_v41, %v8809_v26  ;;  %6595 = vmatprep.mubr.msk.f32.mxu0 %vm3059_vm1, %v8614_v44  ;;  %v1106_v44 = vsel %vm1101_vm2, %v8440_v35, %v1084_v8  ;;  %vm11143_vm12 = vcmask 605184  }
 0x302   :  { %1827 = vrot.lane.b32.xlu0 %v8471_v28, %s7093_s16  ;;  %3284 = vmatprep.subr.mxu1 %v1849_v3  ;;  %vm11144_vm15 = vmmov %vm11143_vm12 }
 0x303   :  { %1843 = vrot.lane.b32.xlu1 %v8469_v21, %s7093_s16  ;;  %3285 = vmatpush2.msra.mxu1 %v1848_v63  ;;  %v1761_v35 = vsel %vm11144_vm15, %v11078_v39, %v1745_v33  ;;  %vm11147_vm15 = vcmask 613376  }
 0x304   :  { %v1005_v56 = vpop.permute.xlu0 %1004  ;;  %v1086_v50 = vpop.permute.xlu1 %1085  ;;  %3416 = vmatmul.mubr.f32.gmra.mxu0 %v8619_v34 }
 0x305   :  { %v1107_v36 = vsel %vm1101_vm2, %v1084_v8, %v1086_v50  ;;  %6596 = vmatprep.mubr.msk.f32.mxu0 %vm3059_vm1, %v2734_v11  ;;  %vm11145_vm2 = vmmov %vm11143_vm12 }
 0x306   :  { %2492 = vrot.lane.b32.xlu0 %v8444_v32, %s7096_s19  ;;  %3430 = vmatprep.subr.mxu0 %v1107_v36 }
 0x307   :  { %2573 = vrot.lane.b32.xlu1 %v8494_v20, %s7092_s15  ;;  %3431 = vmatpush1.msra.mxu0 %v1106_v44  ;;  %s11151_s15 = smov 28  }
 0x308   :  { %v1731_v48 = vpop.permute.xlu0 %1730  ;;  %v8831_v41 = vpop.permute.xlu1 %1746  ;;  %3422 = vmatmul.mubr.f32.gmra.mxu0 %v8757_v55  ;;  %v1019_v55 = vsel %vm1008_vm3, %v8465_v30, %v1005_v56 }
 0x309   :  { %v1762_v34 = vsel %vm11143_vm12, %v1745_v33, %v8831_v41  ;;  %3492 = vmatprep.mubr.f32.mxu0 %v7067_v52  ;;  %vm11146_vm12 = vmmov %vm11145_vm2 }
 0x30a   :  { %1748 = vrot.lane.b32.xlu0 %v8444_v32, %s7094_s17  ;;  %3286 = vmatprep.subr.mxu1 %v1762_v34  ;;  %v1755_v16 = vsel %vm11146_vm12, %v11082_v7, %v1731_v48 }
 0x30b   :  { %1829 = vrot.lane.b32.xlu1 %v8494_v20, %s7093_s16  ;;  %3287 = vmatpush2.msra.mxu1 %v1761_v35  ;;  %s11155_s16 = smov 49  }
 0x30c   :  { %v991_v11 = vpop.permute.xlu0 %990  ;;  %v1007_v1 = vpop.permute.xlu1 %1006 }
 0x30d   :  { %v1020_v46 = vsel %vm1008_vm3, %v1005_v56, %v1007_v1  ;;  %v1013_v33 = vsel %vm1008_vm3, %v8490_v13, %v991_v11 }
 0x30e   :  { %2478 = vrot.lane.b32.xlu0 %v8471_v28, %s7096_s19  ;;  %3432 = vmatprep.subr.mxu0 %v1020_v46 }
 0x30f   :  { %2494 = vrot.lane.b32.xlu1 %v8469_v21, %s7096_s19  ;;  %3433 = vmatpush1.msra.mxu0 %v1019_v55 }
 0x310   :  { %v1652_v39 = vpop.permute.xlu0 %1651  ;;  %v8849_v52 = vpop.permute.xlu1 %1732 }
 0x311   :  { %v1756_v8 = vsel %vm11145_vm2, %v1731_v48, %v8849_v52  ;;  %vm11148_vm2 = vmmov %vm11147_vm15 }
 0x312   :  { %1734 = vrot.lane.b32.xlu0 %v8471_v28, %s7094_s17  ;;  %3288 = vmatprep.subr.mxu1 %v1756_v8  ;;  %v1668_v56 = vsel %vm11148_vm2, %v11088_v14, %v1652_v39  ;;  %vm11149_vm12 = vmmov %vm11148_vm2 }
 0x313   :  { %1750 = vrot.lane.b32.xlu1 %v8469_v21, %s7094_s17  ;;  %3289 = vmatpush2.msra.mxu1 %v1755_v16 }
 0x314   :  { %v912_v30 = vpop.permute.xlu0 %911  ;;  %v993_v2 = vpop.permute.xlu1 %992 }
 0x315   :  { %v1014_v59 = vsel %vm1008_vm3, %v991_v11, %v993_v2  ;;  %v926_v44 = vsel %vm915_vm4, %v8512_v31, %v912_v30 }
 0x316   :  { %2399 = vrot.lane.b32.xlu0 %v8444_v32, %s7099_s22  ;;  %3434 = vmatprep.subr.mxu0 %v1014_v59 }
 0x317   :  { %2480 = vrot.lane.b32.xlu1 %v8494_v20, %s7096_s19  ;;  %3435 = vmatpush1.msra.mxu0 %v1013_v33  ;;  %s7117_s19 = smov 82  }
 0x318   :  { %v1638_v7 = vpop.permute.xlu0 %1637  ;;  %v8866_v3 = vpop.permute.xlu1 %1653 }
 0x319   :  { %v1669_v63 = vsel %vm11147_vm15, %v1652_v39, %v8866_v3  ;;  %vm11150_vm15 = vmmov %vm11148_vm2  ;;  %vm11152_vm2 = vcmask 621568  }
 0x31a   :  { %1655 = vrot.lane.b32.xlu0 %v8444_v32, %s7095_s18  ;;  %3290 = vmatprep.subr.mxu1 %v1669_v63  ;;  %v1662_v35 = vsel %vm11150_vm15, %v11091_v51, %v1638_v7  ;;  %vm11154_vm15 = vmmov %vm11152_vm2 }
 0x31b   :  { %1736 = vrot.lane.b32.xlu1 %v8494_v20, %s7094_s17  ;;  %3291 = vmatpush2.msra.mxu1 %v1668_v56  ;;  %s11160_s17 = smov 50  }
 0x31c   :  { %v898_v13 = vpop.permute.xlu0 %897  ;;  %v914_v50 = vpop.permute.xlu1 %913 }
 0x31d   :  { %v927_v36 = vsel %vm915_vm4, %v912_v30, %v914_v50  ;;  %v920_v46 = vsel %vm915_vm4, %v8532_v4, %v898_v13 }
 0x31e   :  { %2385 = vrot.lane.b32.xlu0 %v8471_v28, %s7099_s22  ;;  %3436 = vmatprep.subr.mxu0 %v927_v36 }
 0x31f   :  { %2401 = vrot.lane.b32.xlu1 %v8469_v21, %s7099_s22  ;;  %3437 = vmatpush1.msra.mxu0 %v926_v44 }
 0x320   :  { %v1559_v14 = vpop.permute.xlu0 %1558  ;;  %v8883_v48 = vpop.permute.xlu1 %1639 }
 0x321   :  { %v1663_v34 = vsel %vm11149_vm12, %v1638_v7, %v8883_v48  ;;  %vm11153_vm12 = vmmov %vm11152_vm2 }
 0x322   :  { %1641 = vrot.lane.b32.xlu0 %v8471_v28, %s7095_s18  ;;  %3292 = vmatprep.subr.mxu1 %v1663_v34  ;;  %v1575_v8 = vsel %vm11153_vm12, %v7915_v29, %v1559_v14  ;;  %vm11156_vm12 = vcmask 629760  }
 0x323   :  { %1657 = vrot.lane.b32.xlu1 %v8469_v21, %s7095_s18  ;;  %3293 = vmatpush2.msra.mxu1 %v1662_v35 }
 0x324   :  { %v819_v31 = vpop.permute.xlu0 %818  ;;  %v900_v11 = vpop.permute.xlu1 %899 }
 0x325   :  { %v921_v1 = vsel %vm915_vm4, %v898_v13, %v900_v11  ;;  %v833_v2 = vsel %vm822_vm5, %v8552_v60, %v819_v31 }
 0x326   :  { %2306 = vrot.lane.b32.xlu0 %v8444_v32, %s11151_s15  ;;  %3438 = vmatprep.subr.mxu0 %v921_v1 }
 0x327   :  { %2387 = vrot.lane.b32.xlu1 %v8494_v20, %s7099_s22  ;;  %3439 = vmatpush1.msra.mxu0 %v920_v46 }
 0x328   :  { %v1545_v51 = vpop.permute.xlu0 %1544  ;;  %v8900_v55 = vpop.permute.xlu1 %1560 }
 0x329   :  { %v1576_v39 = vsel %vm11152_vm2, %v1559_v14, %v8900_v55  ;;  %v1569_v7 = vsel %vm11152_vm2, %v11099_v5, %v1545_v51  ;;  %vm11158_vm2 = vmmov %vm11156_vm12 }
 0x32a   :  { %1562 = vrot.lane.b32.xlu0 %v8444_v32, %s11125_s28  ;;  %3294 = vmatprep.subr.mxu1 %v1576_v39 }
 0x32b   :  { %1643 = vrot.lane.b32.xlu1 %v8494_v20, %s7095_s18  ;;  %3295 = vmatpush2.msra.mxu1 %v1575_v8  ;;  %s11166_s18 = smov 51  }
 0x32c   :  { %v805_v4 = vpop.permute.xlu0 %804  ;;  %v821_v16 = vpop.permute.xlu1 %820 }
 0x32d   :  { %v834_v30 = vsel %vm822_vm5, %v819_v31, %v821_v16  ;;  %v827_v13 = vsel %vm822_vm5, %v8576_v6, %v805_v4 }
 0x32e   :  { %2292 = vrot.lane.b32.xlu0 %v8471_v28, %s11151_s15  ;;  %3440 = vmatprep.subr.mxu0 %v834_v30 }
 0x32f   :  { %2308 = vrot.lane.b32.xlu1 %v8469_v21, %s11151_s15  ;;  %3441 = vmatpush1.msra.mxu0 %v833_v2 }
 0x330   :  { %v1466_v29 = vpop.permute.xlu0 %1465  ;;  %v8917_v59 = vpop.permute.xlu1 %1546 }
 0x331   :  { %v1570_v33 = vsel %vm11154_vm15, %v1545_v51, %v8917_v59  ;;  %vm11157_vm15 = vmmov %vm11156_vm12 }
 0x332   :  { %1548 = vrot.lane.b32.xlu0 %v8471_v28, %s11125_s28  ;;  %3296 = vmatprep.subr.mxu1 %v1570_v33  ;;  %v1482_v44 = vsel %vm11157_vm15, %v7952_v19, %v1466_v29  ;;  %vm11161_vm15 = vcmask 637952  }
 0x333   :  { %1564 = vrot.lane.b32.xlu1 %v8469_v21, %s11125_s28  ;;  %3297 = vmatpush2.msra.mxu1 %v1569_v7 }
 0x334   :  { %v726_v60 = vpop.permute.xlu0 %725  ;;  %v807_v63 = vpop.permute.xlu1 %806 }
 0x335   :  { %v828_v56 = vsel %vm822_vm5, %v805_v4, %v807_v63  ;;  %v740_v35 = vsel %vm729_vm6, %v8609_v17, %v726_v60 }
 0x336   :  { %2213 = vrot.lane.b32.xlu0 %v8444_v32, %s11155_s16  ;;  %3442 = vmatprep.subr.mxu0 %v828_v56 }
 0x337   :  { %2294 = vrot.lane.b32.xlu1 %v8494_v20, %s11151_s15  ;;  %3443 = vmatpush1.msra.mxu0 %v827_v13  ;;  %s7112_s15 = smov 95  }
 0x338   :  { %v1452_v5 = vpop.permute.xlu0 %1451  ;;  %v8934_v50 = vpop.permute.xlu1 %1467 }
 0x339   :  { %v1483_v36 = vsel %vm11156_vm12, %v1466_v29, %v8934_v50  ;;  %vm11159_vm12 = vmmov %vm11158_vm2 }
 0x33a   :  { %1469 = vrot.lane.b32.xlu0 %v8444_v32, %s11127_s20  ;;  %3298 = vmatprep.subr.mxu1 %v1483_v36  ;;  %v1476_v1 = vsel %vm11159_vm12, %v11106_v18, %v1452_v5  ;;  %vm11163_vm12 = vcmask 1031168  }
 0x33b   :  { %1550 = vrot.lane.b32.xlu1 %v8494_v20, %s11125_s28  ;;  %3299 = vmatpush2.msra.mxu1 %v1482_v44  ;;  %s7120_s28 = smov 83  }
 0x33c   :  { %v712_v6 = vpop.permute.xlu0 %711  ;;  %v728_v14 = vpop.permute.xlu1 %727 }
 0x33d   :  { %v741_v34 = vsel %vm729_vm6, %v726_v60, %v728_v14  ;;  %v734_v39 = vsel %vm729_vm6, %v8642_v49, %v712_v6 }
 0x33e   :  { %2199 = vrot.lane.b32.xlu0 %v8471_v28, %s11155_s16  ;;  %3444 = vmatprep.subr.mxu0 %v741_v34 }
 0x33f   :  { %2215 = vrot.lane.b32.xlu1 %v8469_v21, %s11155_s16  ;;  %3445 = vmatpush1.msra.mxu0 %v740_v35 }
 0x340   :  { %v1373_v19 = vpop.permute.xlu0 %1372  ;;  %v8951_v31 = vpop.permute.xlu1 %1453 }
 0x341   :  { %v1477_v11 = vsel %vm11158_vm2, %v1452_v5, %v8951_v31  ;;  %vm11162_vm2 = vmmov %vm11161_vm15 }
 0x342   :  { %1455 = vrot.lane.b32.xlu0 %v8471_v28, %s11127_s20  ;;  %3300 = vmatprep.subr.mxu1 %v1477_v11  ;;  %v1389_v16 = vsel %vm11162_vm2, %v7987_v45, %v1373_v19 }
 0x343   :  { %1471 = vrot.lane.b32.xlu1 %v8469_v21, %s11127_s20  ;;  %3301 = vmatpush2.msra.mxu1 %v1476_v1 }
 0x344   :  { %v633_v17 = vpop.permute.xlu0 %632  ;;  %v714_v46 = vpop.permute.xlu1 %713 }
 0x345   :  { %v735_v51 = vsel %vm729_vm6, %v712_v6, %v714_v46 }
 0x346   :  { %2120 = vrot.lane.b32.xlu0 %v8444_v32, %s11160_s17  ;;  %3446 = vmatprep.subr.mxu0 %v735_v51 }
 0x347   :  { %2201 = vrot.lane.b32.xlu1 %v8494_v20, %s11155_s16  ;;  %3447 = vmatpush1.msra.mxu0 %v734_v39  ;;  %s7113_s16 = smov 105  }
 0x348   :  { %v1359_v18 = vpop.permute.xlu0 %1358  ;;  %v8968_v8 = vpop.permute.xlu1 %1374 }
 0x349   :  { %v1390_v4 = vsel %vm11161_vm15, %v1373_v19, %v8968_v8  ;;  %vm11164_vm15 = vmmov %vm11163_vm12 }
 0x34a   :  { %1376 = vrot.lane.b32.xlu0 %v8444_v32, %s11130_s21  ;;  %3302 = vmatprep.subr.mxu1 %v1390_v4  ;;  %v647_v29 = vsel %vm11164_vm15, %v8662_v38, %v633_v17 }
 0x34b   :  { %1457 = vrot.lane.b32.xlu1 %v8494_v20, %s11127_s20  ;;  %3303 = vmatpush2.msra.mxu1 %v1389_v16  ;;  %s7121_s20 = smov 93  }
 0x34c   :  { %v619_v49 = vpop.permute.xlu0 %618  ;;  %v635_v30 = vpop.permute.xlu1 %634 }
 0x34d   :  { %v648_v2 = vsel %vm11163_vm12, %v633_v17, %v635_v30  ;;  %vm11165_vm12 = vmmov %vm11162_vm2 }
 0x34e   :  { %2106 = vrot.lane.b32.xlu0 %v8471_v28, %s11160_s17  ;;  %3448 = vmatprep.subr.mxu0 %v648_v2  ;;  %v1383_v60 = vsel %vm11165_vm12, %v8103_v43, %v1359_v18  ;;  %vm11168_vm12 = vcmask 809984  }
 0x34f   :  { %2122 = vrot.lane.b32.xlu1 %v8469_v21, %s11160_s17  ;;  %3449 = vmatpush1.msra.mxu0 %v647_v29 }
 0x350   :  { %v1280_v45 = vpop.permute.xlu0 %1279  ;;  %v8985_v33 = vpop.permute.xlu1 %1360 }
 0x351   :  { %v1384_v7 = vsel %vm11162_vm2, %v1359_v18, %v8985_v33  ;;  %vm11167_vm2 = vmmov %vm11164_vm15  ;;  %v11174_v18 = vld [vmem:[#allocation27_spill] sm:$0xff] }
 0x352   :  { %1362 = vrot.lane.b32.xlu0 %v8471_v28, %s11130_s21  ;;  %3304 = vmatprep.subr.mxu1 %v1384_v7  ;;  %v641_v13 = vsel %vm11167_vm2, %v8682_v62, %v619_v49  ;;  %vm11170_vm2 = vcmask 1039360   ;;  %v9072_v7 = vld [vmem:[%s10944_s3 + $0x28] sm:$0xff] }
 0x353   :  { %1378 = vrot.lane.b32.xlu1 %v8469_v21, %s11130_s21  ;;  %3305 = vmatpush2.msra.mxu1 %v1383_v60  ;;  %v11176_v60 = vld [vmem:[#allocation29_spill] sm:$0xff] }
 0x354   :  { %v540_v38 = vpop.permute.xlu0 %539  ;;  %v621_v63 = vpop.permute.xlu1 %620 }
 0x355   :  { %v642_v56 = vsel %vm11164_vm15, %v619_v49, %v621_v63  ;;  %vm11169_vm15 = vmmov %vm11168_vm12  ;;  %v11175_v49 = vld [vmem:[#allocation14_spill] sm:$0xff] }
 0x356   :  { %2027 = vrot.lane.b32.xlu0 %v8444_v32, %s11166_s18  ;;  %3450 = vmatprep.subr.mxu0 %v642_v56  ;;  %v1296_v44 = vsel %vm11169_vm15, %v8179_v57, %v1280_v45  ;;  %v9082_v56 = vld [vmem:[%s10944_s3 + $0x20] sm:$0xff] }
 0x357   :  { %2108 = vrot.lane.b32.xlu1 %v8494_v20, %s11160_s17  ;;  %3451 = vmatpush1.msra.mxu0 %v641_v13  ;;  %s7114_s17 = smov 81  }
 0x358   :  { %v1266_v43 = vpop.permute.xlu0 %1265  ;;  %v9002_v5 = vpop.permute.xlu1 %1281 }
 0x359   :  { %v1297_v36 = vsel %vm11168_vm12, %v1280_v45, %v9002_v5  ;;  %vm11171_vm12 = vmmov %vm11170_vm2 }
 0x35a   :  { %1283 = vrot.lane.b32.xlu0 %v8444_v32, %s11134_s24  ;;  %3306 = vmatprep.subr.mxu1 %v1297_v36  ;;  %v554_v34 = vsel %vm11171_vm12, %v8702_v40, %v540_v38  ;;  %v9091_v36 = vld [vmem:[%s10944_s3 + $0x48] sm:$0xff] }
 0x35b   :  { %1364 = vrot.lane.b32.xlu1 %v8494_v20, %s11130_s21  ;;  %3307 = vmatpush2.msra.mxu1 %v1296_v44  ;;  %s7122_s21 = smov 104  }
 0x35c   :  { %v526_v62 = vpop.permute.xlu0 %525 }
 0x35d   :  { %v542_v6 = vpop.permute.xlu1 %541 }
 0x35e   :  { %2013 = vrot.lane.b32.xlu0 %v8471_v28, %s11166_s18  ;;  %v555_v14 = vsel %vm11170_vm2, %v540_v38, %v542_v6  ;;  %vm11172_vm2 = vmmov %vm11169_vm15 }
 0x35f   :  { %2029 = vrot.lane.b32.xlu1 %v8469_v21, %s11166_s18  ;;  %3452 = vmatprep.subr.mxu0 %v555_v14  ;;  %v1290_v11 = vsel %vm11172_vm2, %v8259_v61, %v1266_v43  ;;  %vm11177_vm2 = vcmask 433152  }
 0x360   :  { %3453 = vmatpush1.msra.mxu0 %v554_v34  ;;  %v1187_v57 = vpop.permute.xlu0 %1186  ;;  %v9110_v34 = vld [vmem:[%s10944_s3 + $0x68] sm:$0xff] }
 0x361   :  { %v9019_v35 = vpop.permute.xlu1 %1267 }
 0x362   :  { %1269 = vrot.lane.b32.xlu0 %v8471_v28, %s11134_s24  ;;  %v1291_v19 = vsel %vm11169_vm15, %v1266_v43, %v9019_v35  ;;  %vm11173_vm15 = vmmov %vm11171_vm12 }
 0x363   :  { %1285 = vrot.lane.b32.xlu1 %v8469_v21, %s11134_s24  ;;  %3308 = vmatprep.subr.mxu1 %v1291_v19  ;;  %v548_v46 = vsel %vm11173_vm15, %v8722_v47, %v526_v62  ;;  %v1203_v47 = vsel %vm1194_vm8, %v11174_v18, %v1187_v57  ;;  %vm11180_vm15 = vmmov %vm11177_vm2 }
 0x364   :  { %3309 = vmatpush2.msra.mxu1 %v1290_v11  ;;  %v1173_v1 = vpop.permute.xlu0 %1172 }
 0x365   :  { %v528_v40 = vpop.permute.xlu1 %527  ;;  %v1197_v30 = vsel %vm1194_vm8, %v11175_v49, %v1173_v1 }
 0x366   :  { %1934 = vrot.lane.b32.xlu0 %v8444_v32, %s7106_s27  ;;  %v549_v17 = vsel %vm11171_vm12, %v526_v62, %v528_v40  ;;  %vm11178_vm12 = vmmov %vm11177_vm2 }
 0x367   :  { %2015 = vrot.lane.b32.xlu1 %v8494_v20, %s11166_s18  ;;  %3454 = vmatprep.subr.mxu0 %v549_v17  ;;  %v7075_v17 = vld [vmem:[%s10944_s3 + $0x18] sm:$0xff]  ;;  %s7116_s18 = smov 106  }
 0x368   :  { %3455 = vmatpush1.msra.mxu0 %v548_v46  ;;  %v2586_v51 = vpop.permute.xlu0 %2585 }
 0x369   :  { %3456 = vmatprep.subr.mxu0 %v8444_v32  ;;  %v9037_v61 = vpop.permute.xlu1 %1188  ;;  %v2600_v38 = vsel %vm2589_vm9, %v11176_v60, %v2586_v51 }
 0x36a   :  { %3457 = vmatpush1.msra.mxu0 %v7913_v15  ;;  %1190 = vrot.lane.b32.xlu0 %v8444_v32, %s7107_s25  ;;  %v1204_v39 = vsel %vm1194_vm8, %v1187_v57, %v9037_v61 }
 0x36b   :  { %1271 = vrot.lane.b32.xlu1 %v8494_v20, %s11134_s24  ;;  %3310 = vmatprep.subr.mxu1 %v1204_v39  ;;  %s7123_s24 = smov 114  }
 0x36c   :  { %3458 = vmatprep.subr.mxu0 %v8471_v28  ;;  %3311 = vmatpush2.msra.mxu1 %v1203_v47  ;;  %v1842_v4 = vpop.permute.xlu0 %1841 }
 0x36d   :  { %3459 = vmatpush1.msra.mxu0 %v7978_v10  ;;  %v9050_v15 = vpop.permute.xlu1 %1174  ;;  %v9063_v10 = vld [vmem:[%s10944_s3] sm:$0xff]  ;;  %v1856_v44 = vsel %vm11178_vm12, %v8779_v37, %v1842_v4  ;;  %v11179_v37 = vld [vmem:[#allocation11_spill] sm:$0xff] }
 0x36e   :  { %1920 = vrot.lane.b32.xlu0 %v8471_v28, %s7106_s27  ;;  %v1198_v16 = vsel %vm1194_vm8, %v1173_v1, %v9050_v15  ;;  %v9123_v1 = vld [vmem:[%s10944_s3 + $0x60] sm:$0xff] }
 0x36f   :  { %1936 = vrot.lane.b32.xlu1 %v8469_v21, %s7106_s27  ;;  %3312 = vmatprep.subr.mxu1 %v1198_v16 }
 0x370   :  { %3313 = vmatpush2.msra.mxu1 %v1197_v30  ;;  %v2572_v2 = vpop.permute.xlu0 %2571 }
 0x371   :  { %3315 = vmatmul.mubr.f32.vlgmr.msra.gmra.mxu1 %v9063_v10  ;;  %v2588_v29 = vpop.permute.xlu1 %2587  ;;  %v2594_v57 = vsel %vm2589_vm9, %v11179_v37, %v2572_v2 }
 0x372   :  { %1176 = vrot.lane.b32.xlu0 %v8471_v28, %s7107_s25  ;;  %v2601_v45 = vsel %vm2589_vm9, %v2586_v51, %v2588_v29  ;;  %3320 = vmatprep.mubr.f32.mxu1 %v9072_v7  ;;  %v3037_v51 = vld [vmem:[%s10945_s4 + $0x10] sm:$0xff] }
 0x373   :  { %1192 = vrot.lane.b32.xlu1 %v8469_v21, %s7107_s25  ;;  %3517 = vmatprep.subr.mxu1 %v2601_v45  ;;  %v11184_v45 = vld [vmem:[#allocation16_spill] sm:$0xff] }
 0x374   :  { %3518 = vmatpush1.msra.mxu1 %v2600_v38  ;;  %v1828_v63 = vpop.permute.xlu0 %1827 }
 0x375   :  { %3321 = vmatmul.mubr.f32.gmra.mxu1 %v9082_v56  ;;  %v1844_v13 = vpop.permute.xlu1 %1843 }
 0x376   :  { %2678 = vrot.lane.b32.xlu0 %v8444_v32, %s7108_s0  ;;  %v1857_v43 = vsel %vm11177_vm2, %v1842_v4, %v1844_v13  ;;  %3326 = vmatprep.mubr.f32.mxu1 %v9091_v36  ;;  %v9101_v32 = vld [vmem:[%s10944_s3 + $0x40] sm:$0xff] }
 0x377   :  { %1922 = vrot.lane.b32.xlu1 %v8494_v20, %s7106_s27  ;;  %3460 = vmatprep.subr.mxu0 %v1857_v43  ;;  %s7111_s27 = smov 117  }
 0x378   :  { %3461 = vmatpush2.msra.mxu0 %v1856_v44  ;;  %v2493_v62 = vpop.permute.xlu0 %2492 }
 0x379   :  { %3327 = vmatmul.mubr.f32.gmra.mxu1 %v9101_v32  ;;  %v2574_v6 = vpop.permute.xlu1 %2573 }
 0x37a   :  { %2664 = vrot.lane.b32.xlu0 %v8471_v28, %s7108_s0  ;;  %v2595_v14 = vsel %vm2589_vm9, %v2572_v2, %v2574_v6  ;;  %3332 = vmatprep.mubr.f32.mxu1 %v9110_v34  ;;  %v3035_v28 = vld [vmem:[%s10945_s4] sm:$0xff]  ;;  %vm11181_vm9 = vmmov %vm11177_vm2  ;;  %vm11182_vm2 = vcmask 605184  }
 0x37b   :  { %1178 = vrot.lane.b32.xlu1 %v8494_v20, %s7107_s25  ;;  %3519 = vmatprep.subr.mxu1 %v2595_v14  ;;  %v1850_v46 = vsel %vm11181_vm9, %v8809_v26, %v1828_v63  ;;  %v3036_v26 = vld [vmem:[%s10945_s4 + $0x8] sm:$0xff]  ;;  %vm11183_vm12 = vmmov %vm11182_vm2  ;;  %s7118_s25 = smov 92  }
 0x37c   :  { %3520 = vmatpush1.msra.mxu1 %v2594_v57  ;;  %v1749_v19 = vpop.permute.xlu0 %1748  ;;  %vm11186_vm9 = vmmov %vm11182_vm2 }
 0x37d   :  { %v1830_v11 = vpop.permute.xlu1 %1829  ;;  %3333 = vmatmul.mubr.f32.gmra.mxu1 %v9123_v1  ;;  %v1763_v30 = vsel %vm11183_vm12, %v8831_v41, %v1749_v19 }
 0x37e   :  { %3041 = vperm.xlu0 %7065, %v3035_v28   ;;  %v1851_v40 = vsel %vm11180_vm15, %v1828_v63, %v1830_v11  ;;  %6597 = vmatprep.mubr.msk.f32.mxu1 %vm3059_vm1, %v7075_v17  ;;  %vm11185_vm15 = vmmov %vm11182_vm2 }
 0x37f   :  { %2680 = vrot.lane.b32.xlu1 %v8469_v21, %s7108_s0  ;;  %3462 = vmatprep.subr.mxu0 %v1851_v40  ;;  %v2507_v21 = vsel %vm2496_vm11, %v8452_v27, %v2493_v62  ;;  %v3038_v27 = vld [vmem:[%s10945_s4 + $0x18] sm:$0xff] }
 0x380   :  { %3463 = vmatpush2.msra.mxu0 %v1850_v46  ;;  %v2479_v39 = vpop.permute.xlu0 %2478 }
 0x381   :  { %v2495_v18 = vpop.permute.xlu1 %2494  ;;  %v2501_v60 = vsel %vm2496_vm11, %v11184_v45, %v2479_v39 }
 0x382   :  { %3051 = vperm.xlu0 %7065, %v3037_v51   ;;  %v2508_v47 = vsel %vm2496_vm11, %v2493_v62, %v2495_v18 }
 0x383   :  { %2666 = vrot.lane.b32.xlu1 %v8494_v20, %s7108_s0  ;;  %3521 = vmatprep.subr.mxu1 %v2508_v47 }
 0x384   :  { %3522 = vmatpush1.msra.mxu1 %v2507_v21  ;;  %v1735_v4 = vpop.permute.xlu0 %1734 }
 0x385   :  { %v1751_v16 = vpop.permute.xlu1 %1750  ;;  %v1757_v13 = vsel %vm11186_vm9, %v8849_v52, %v1735_v4  ;;  %vm11191_vm9 = vcmask 228352  }
 0x386   :  { %v1764_v49 = vsel %vm11182_vm2, %v1749_v19, %v1751_v16 }
 0x387   :  { %3464 = vmatprep.subr.mxu0 %v1764_v49  ;;  %3046 = vperm.xlu1 %7066, %v3036_v26  }
 0x388   :  { %3465 = vmatpush2.msra.mxu0 %v1763_v30  ;;  %v2400_v20 = vpop.permute.xlu0 %2399 }
 0x389   :  { %v2481_v2 = vpop.permute.xlu1 %2480  ;;  %v2414_v6 = vsel %vm2403_vm13, %v8502_v58, %v2400_v20 }
 0x38a   :  { %v2502_v29 = vsel %vm2496_vm11, %v2479_v39, %v2481_v2  ;;  %vm11187_vm11 = vcmask 613376  }
 0x38b   :  { %3523 = vmatprep.subr.mxu1 %v2502_v29  ;;  %3056 = vperm.xlu1 %7066, %v3038_v27   ;;  %vm11188_vm2 = vmmov %vm11187_vm11 }
 0x38c   :  { %3524 = vmatpush1.msra.mxu1 %v2501_v60  ;;  %v1656_v38 = vpop.permute.xlu0 %1655  ;;  %vm11189_vm12 = vmmov %vm11188_vm2  ;;  %v11200_v60 = vld [vmem:[#allocation42_spill] sm:$0xff] }
 0x38d   :  { %v1737_v63 = vpop.permute.xlu1 %1736  ;;  %v1670_v28 = vsel %vm11188_vm2, %v8866_v3, %v1656_v38 }
 0x38e   :  { %v1758_v41 = vsel %vm11185_vm15, %v1735_v4, %v1737_v63  ;;  %vm11190_vm15 = vmmov %vm11188_vm2 }
 0x38f   :  { %3466 = vmatprep.subr.mxu0 %v1758_v41 }
 0x390   :  { %3467 = vmatpush2.msra.mxu0 %v1757_v13  ;;  %v2386_v43 = vpop.permute.xlu0 %2385 }
 0x391   :  { %v2402_v44 = vpop.permute.xlu1 %2401  ;;  %v2408_v40 = vsel %vm2403_vm13, %v8522_v12, %v2386_v43 }
 0x392   :  { %v2415_v62 = vsel %vm2403_vm13, %v2400_v20, %v2402_v44 }
 0x393   :  { %3525 = vmatprep.subr.mxu1 %v2415_v62  ;;  %v11205_v62 = vld [vmem:[#allocation43_spill] sm:$0xff] }
 0x394   :  { %3526 = vmatpush1.msra.mxu1 %v2414_v6  ;;  %v1642_v14 = vpop.permute.xlu0 %1641 }
 0x395   :  { %v1658_v37 = vpop.permute.xlu1 %1657  ;;  %v1664_v51 = vsel %vm11190_vm15, %v8883_v48, %v1642_v14  ;;  %vm11196_vm15 = vmmov %vm11191_vm9 }
 0x396   :  { %v1671_v57 = vsel %vm11187_vm11, %v1656_v38, %v1658_v37  ;;  %vm11192_vm11 = vmmov %vm11191_vm9 }
 0x397   :  { %3468 = vmatprep.subr.mxu0 %v1671_v57 }
 0x398   :  { %3469 = vmatpush2.msra.mxu0 %v1670_v28  ;;  %v2307_v52 = vpop.permute.xlu0 %2306 }
 0x399   :  { %v2388_v19 = vpop.permute.xlu1 %2387  ;;  %v2321_v47 = vsel %vm11192_vm11, %v8542_v53, %v2307_v52 }
 0x39a   :  { %v2409_v11 = vsel %vm2403_vm13, %v2386_v43, %v2388_v19  ;;  %vm11193_vm13 = vcmask 621568  }
 0x39b   :  { %3527 = vmatprep.subr.mxu1 %v2409_v11  ;;  %vm11194_vm2 = vmmov %vm11193_vm13 }
 0x39c   :  { %3528 = vmatpush1.msra.mxu1 %v2408_v40  ;;  %v1563_v58 = vpop.permute.xlu0 %1562  ;;  %vm11198_vm11 = vmmov %vm11194_vm2 }
 0x39d   :  { %v1644_v17 = vpop.permute.xlu1 %1643  ;;  %v1577_v26 = vsel %vm11194_vm2, %v8900_v55, %v1563_v58 }
 0x39e   :  { %v1665_v46 = vsel %vm11189_vm12, %v1642_v14, %v1644_v17  ;;  %vm11195_vm12 = vmmov %vm11191_vm9 }
 0x39f   :  { %3470 = vmatprep.subr.mxu0 %v1665_v46 }
 0x3a0   :  { %3471 = vmatpush2.msra.mxu0 %v1664_v51  ;;  %v2293_v3 = vpop.permute.xlu0 %2292 }
 0x3a1   :  { %v2309_v39 = vpop.permute.xlu1 %2308  ;;  %v2315_v30 = vsel %vm11196_vm15, %v8562_v23, %v2293_v3 }
 0x3a2   :  { %v2322_v18 = vsel %vm11191_vm9, %v2307_v52, %v2309_v39  ;;  %vm11197_vm9 = vmmov %vm11194_vm2 }
 0x3a3   :  { %3529 = vmatprep.subr.mxu1 %v2322_v18 }
 0x3a4   :  { %3530 = vmatpush1.msra.mxu1 %v2321_v47  ;;  %v1549_v12 = vpop.permute.xlu0 %1548 }
 0x3a5   :  { %v1565_v21 = vpop.permute.xlu1 %1564  ;;  %v1571_v2 = vsel %vm11198_vm11, %v8917_v59, %v1549_v12 }
 0x3a6   :  { %v1578_v4 = vsel %vm11193_vm13, %v1563_v58, %v1565_v21  ;;  %vm11199_vm13 = vcmask 400384  }
 0x3a7   :  { %3472 = vmatprep.subr.mxu0 %v1578_v4  ;;  %vm11201_vm2 = vmmov %vm11199_vm13 }
 0x3a8   :  { %3473 = vmatpush2.msra.mxu0 %v1577_v26  ;;  %v2214_v48 = vpop.permute.xlu0 %2213  ;;  %vm11206_vm11 = vmmov %vm11201_vm2 }
 0x3a9   :  { %v2295_v16 = vpop.permute.xlu1 %2294  ;;  %v2228_v38 = vsel %vm11201_vm2, %v11200_v60, %v2214_v48  ;;  %v11217_v60 = vld [vmem:[#allocation49_spill] sm:$0xff] }
 0x3aa   :  { %v2316_v49 = vsel %vm11195_vm12, %v2293_v3, %v2295_v16  ;;  %vm11202_vm12 = vcmask 629760  }
 0x3ab   :  { %3531 = vmatprep.subr.mxu1 %v2316_v49  ;;  %vm11203_vm15 = vmmov %vm11202_vm12 }
 0x3ac   :  { %3532 = vmatpush1.msra.mxu1 %v2315_v30  ;;  %v1470_v53 = vpop.permute.xlu0 %1469 }
 0x3ad   :  { %v1551_v20 = vpop.permute.xlu1 %1550  ;;  %v1484_v13 = vsel %vm11203_vm15, %v8934_v50, %v1470_v53 }
 0x3ae   :  { %v1572_v27 = vsel %vm11197_vm9, %v1549_v12, %v1551_v20  ;;  %vm11204_vm9 = vmmov %vm11201_vm2 }
 0x3af   :  { %3474 = vmatprep.subr.mxu0 %v1572_v27  ;;  %vm11208_vm2 = vmmov %vm11202_vm12 }
 0x3b0   :  { %3475 = vmatpush2.msra.mxu0 %v1571_v2  ;;  %v2200_v55 = vpop.permute.xlu0 %2199 }
 0x3b1   :  { %v2216_v29 = vpop.permute.xlu1 %2215  ;;  %v2222_v6 = vsel %vm11206_vm11, %v11205_v62, %v2200_v55 }
 0x3b2   :  { %v2229_v45 = vsel %vm11199_vm13, %v2214_v48, %v2216_v29  ;;  %vm11207_vm13 = vmmov %vm11202_vm12 }
 0x3b3   :  { %3533 = vmatprep.subr.mxu1 %v2229_v45 }
 0x3b4   :  { %3534 = vmatpush1.msra.mxu1 %v2228_v38  ;;  %v1456_v23 = vpop.permute.xlu0 %1455 }
 0x3b5   :  { %v1472_v63 = vpop.permute.xlu1 %1471  ;;  %v1478_v28 = vsel %vm11208_vm2, %v8951_v31, %v1456_v23 }
 0x3b6   :  { %v1485_v41 = vsel %vm11202_vm12, %v1470_v53, %v1472_v63  ;;  %vm11209_vm12 = vcmask 637952  }
 0x3b7   :  { %3476 = vmatprep.subr.mxu0 %v1485_v41  ;;  %vm11210_vm15 = vmmov %vm11209_vm12 }
 0x3b8   :  { %3477 = vmatpush2.msra.mxu0 %v1484_v13  ;;  %v2121_v59 = vpop.permute.xlu0 %2120 }
 0x3b9   :  { %v2202_v43 = vpop.permute.xlu1 %2201  ;;  %v2135_v11 = vsel %vm2124_vm10, %v8652_v22, %v2121_v59 }
 0x3ba   :  { %v2223_v44 = vsel %vm11204_vm9, %v2200_v55, %v2202_v43  ;;  %vm11211_vm9 = vmmov %vm11209_vm12 }
 0x3bb   :  { %3535 = vmatprep.subr.mxu1 %v2223_v44  ;;  %vm11212_vm11 = vmmov %vm11211_vm9 }
 0x3bc   :  { %3536 = vmatpush1.msra.mxu1 %v2222_v6  ;;  %v1377_v14 = vpop.permute.xlu0 %1376  ;;  %v3725_v6 = vld [vmem:[%s10946_s5 + $0x2f8] sm:$0xff] }
 0x3bd   :  { %v1458_v37 = vpop.permute.xlu1 %1457  ;;  %v1391_v46 = vsel %vm11210_vm15, %v8968_v8, %v1377_v14  ;;  %vm4313_vm15 = vcmask 957440  }
 0x3be   :  { %v1479_v57 = vsel %vm11207_vm13, %v1456_v23, %v1458_v37 }
 0x3bf   :  { %3478 = vmatprep.subr.mxu0 %v1479_v57  ;;  %v3722_v57 = vld [vmem:[%s10946_s5 + $0x2e0] sm:$0xff] }
 0x3c0   :  { %3479 = vmatpush2.msra.mxu0 %v1478_v28  ;;  %v2107_v50 = vpop.permute.xlu0 %2106 }
 0x3c1   :  { %v2123_v52 = vpop.permute.xlu1 %2122  ;;  %v2129_v39 = vsel %vm2124_vm10, %v8672_v54, %v2107_v50 }
 0x3c2   :  { %v2136_v19 = vsel %vm2124_vm10, %v2121_v59, %v2123_v52 }
 0x3c3   :  { %3537 = vmatprep.subr.mxu1 %v2136_v19 }
 0x3c4   :  { %3538 = vmatpush1.msra.mxu1 %v2135_v11  ;;  %v1363_v40 = vpop.permute.xlu0 %1362 }
 0x3c5   :  { %v1379_v58 = vpop.permute.xlu1 %1378  ;;  %v1385_v12 = vsel %vm11212_vm11, %v8985_v33, %v1363_v40 }
 0x3c6   :  { %v1392_v17 = vsel %vm11209_vm12, %v1377_v14, %v1379_v58  ;;  %v3724_v14 = vld [vmem:[%s10946_s5 + $0x2f0] sm:$0xff]  ;;  %v3661_v58 = vld [vmem:[%s10946_s5 + $0xf8] sm:$0xff] }
 0x3c7   :  { %3480 = vmatprep.subr.mxu0 %v1392_v17  ;;  %v3660_v17 = vld [vmem:[%s10946_s5 + $0xf0] sm:$0xff] }
 0x3c8   :  { %3481 = vmatpush2.msra.mxu0 %v1391_v46  ;;  %v2028_v31 = vpop.permute.xlu0 %2027  ;;  %v3717_v46 = vld [vmem:[%s10946_s5 + $0x2b8] sm:$0xff] }
 0x3c9   :  { %v2109_v51 = vpop.permute.xlu1 %2108  ;;  %v2042_v26 = vsel %vm2031_vm0, %v8692_v24, %v2028_v31 }
 0x3ca   :  { %v2130_v3 = vsel %vm2124_vm10, %v2107_v50, %v2109_v51  ;;  %vm11213_vm10 = vcmask 809984   ;;  %v7077_v51 = vld [vmem:[%s10944_s3 + $0x38] sm:$0xff] }
 0x3cb   :  { %3539 = vmatprep.subr.mxu1 %v2130_v3  ;;  %vm11214_vm13 = vmmov %vm11213_vm10  ;;  %v3657_v3 = vld [vmem:[%s10946_s5 + $0xd8] sm:$0xff] }
 0x3cc   :  { %3540 = vmatpush1.msra.mxu1 %v2129_v39  ;;  %v1284_v22 = vpop.permute.xlu0 %1283  ;;  %vm11215_vm2 = vmmov %vm11213_vm10 }
 0x3cd   :  { %v1365_v18 = vpop.permute.xlu1 %1364  ;;  %v1298_v49 = vsel %vm11214_vm13, %v9002_v5, %v1284_v22  ;;  %vm11216_vm12 = vmmov %vm11215_vm2 }
 0x3ce   :  { %v1386_v47 = vsel %vm11211_vm9, %v1363_v40, %v1365_v18  ;;  %v3655_v18 = vld [vmem:[%s10946_s5 + $0xc8] sm:$0xff]  ;;  %vm11258_vm9 = vcmask 1039360  }
 0x3cf   :  { %3482 = vmatprep.subr.mxu0 %v1386_v47  ;;  %v3716_v47 = vld [vmem:[%s10946_s5 + $0x2b0] sm:$0xff]  ;;  %vm11259_vm11 = vmmov %vm11258_vm9 }
 0x3d0   :  { %3483 = vmatpush2.msra.mxu0 %v1385_v12  ;;  %v2014_v8 = vpop.permute.xlu0 %2013  ;;  %vm11261_vm13 = vmmov %vm11258_vm9 }
 0x3d1   :  { %v2030_v21 = vpop.permute.xlu1 %2029  ;;  %v2036_v20 = vsel %vm2031_vm0, %v8712_v9, %v2014_v8 }
 0x3d2   :  { %v2043_v4 = vsel %vm2031_vm0, %v2028_v31, %v2030_v21  ;;  %v3715_v21 = vld [vmem:[%s10946_s5 + $0x2a8] sm:$0xff] }
 0x3d3   :  { %3541 = vmatprep.subr.mxu1 %v2043_v4  ;;  %v7079_v4 = vld [vmem:[%s10944_s3 + $0x58] sm:$0xff] }
 0x3d4   :  { %3542 = vmatpush1.msra.mxu1 %v2042_v26  ;;  %v1270_v54 = vpop.permute.xlu0 %1269  ;;  %v3653_v26 = vld [vmem:[%s10946_s5 + $0xb8] sm:$0xff] }
 0x3d5   :  { %v1286_v48 = vpop.permute.xlu1 %1285  ;;  %v1292_v55 = vsel %vm11216_vm12, %v9019_v35, %v1270_v54  ;;  %vm4583_vm12 = vcmask 859136  }
 0x3d6   :  { %v1299_v16 = vsel %vm11213_vm10, %v1284_v22, %v1286_v48  ;;  %v9295_v22 = vpop.f32.mrf.mxu1  ;;  %v3652_v48 = vld [vmem:[%s10946_s5 + $0xb0] sm:$0xff]  ;;  %vm11260_vm10 = vmmov %vm11258_vm9 }
 0x3d7   :  { %3484 = vmatprep.subr.mxu0 %v1299_v16  ;;  %v3651_v16 = vld [vmem:[%s10946_s5 + $0xa8] sm:$0xff] }
 0x3d8   :  { %3485 = vmatpush2.msra.mxu0 %v1298_v49  ;;  %v1935_v33 = vpop.permute.xlu0 %1934 }
 0x3d9   :  { %v2016_v30 = vpop.permute.xlu1 %2015  ;;  %v1949_v38 = vsel %vm1938_vm7, %v11217_v60, %v1935_v33  ;;  %v3646_v60 = vld [vmem:[%s10946_s5 + $0x80] sm:$0xff] }
 0x3da   :  { %v2037_v53 = vsel %vm2031_vm0, %v2014_v8, %v2016_v30  ;;  %v7078_v8 = vld [vmem:[%s10944_s3 + $0x30] sm:$0xff]  ;;  %vm4403_vm0 = vcmask 941056  }
 0x3db   :  { %3543 = vmatprep.subr.mxu1 %v2037_v53  ;;  %v7080_v30 = vld [vmem:[%s10944_s3 + $0x50] sm:$0xff]  ;;  %v3650_v53 = vld [vmem:[%s10946_s5 + $0xa0] sm:$0xff] }
 0x3dc   :  { %3544 = vmatpush1.msra.mxu1 %v2036_v20  ;;  %v1191_v24 = vpop.permute.xlu0 %1190  ;;  %v3713_v20 = vld [vmem:[%s10946_s5 + $0x298] sm:$0xff] }
 0x3dd   :  { %v1272_v27 = vpop.permute.xlu1 %1271  ;;  %v1205_v63 = vsel %vm1194_vm8, %v9037_v61, %v1191_v24 }
 0x3de   :  { %v1293_v2 = vsel %vm11215_vm2, %v1270_v54, %v1272_v27  ;;  %v3229_v54 = vpop.f32.mrf.mxu1  ;;  %v3649_v27 = vld [vmem:[%s10946_s5 + $0x98] sm:$0xff]  ;;  %vm4761_vm2 = vcmask 777216  }
 0x3df   :  { %3486 = vmatprep.subr.mxu0 %v1293_v2  ;;  %v3648_v2 = vld [vmem:[%s10946_s5 + $0x90] sm:$0xff] }
 0x3e0   :  { %3487 = vmatpush2.msra.mxu0 %v1292_v55  ;;  %v1921_v29 = vpop.permute.xlu0 %1920 }
 0x3e1   :  { %v1937_v5 = vpop.permute.xlu1 %1936  ;;  %v1943_v59 = vsel %vm1938_vm7, %v8746_v25, %v1921_v29  ;;  %v3723_v25 = vld [vmem:[%s10946_s5 + $0x2e8] sm:$0xff] }
 0x3e2   :  { %v1950_v45 = vsel %vm1938_vm7, %v1935_v33, %v1937_v5  ;;  %v3714_v33 = vld [vmem:[%s10946_s5 + $0x2a0] sm:$0xff]  ;;  %v3647_v5 = vld [vmem:[%s10946_s5 + $0x88] sm:$0xff] }
 0x3e3   :  { %3545 = vmatprep.subr.mxu1 %v1950_v45  ;;  %v7082_v45 = vld [vmem:[%s10944_s3 + $0x70] sm:$0xff] }
 0x3e4   :  { %3546 = vmatpush1.msra.mxu1 %v1949_v38  ;;  %v1177_v41 = vpop.permute.xlu0 %1176  ;;  %v3711_v38 = vld [vmem:[%s10946_s5 + $0x288] sm:$0xff] }
 0x3e5   :  { %v1193_v9 = vpop.permute.xlu1 %1192  ;;  %v1199_v61 = vsel %vm1194_vm8, %v9050_v15, %v1177_v41  ;;  %v3721_v15 = vld [vmem:[%s10946_s5 + $0x2d8] sm:$0xff] }
 0x3e6   :  { %v1206_v23 = vsel %vm1194_vm8, %v1191_v24, %v1193_v9  ;;  %v7081_v24 = vld [vmem:[%s10944_s3 + $0x78] sm:$0xff] }
 0x3e7   :  { %3488 = vmatprep.subr.mxu0 %v1206_v23  ;;  %v3645_v9 = vld [vmem:[%s10946_s5 + $0x78] sm:$0xff]  ;;  %v3710_v23 = vld [vmem:[%s10946_s5 + $0x280] sm:$0xff] }
 0x3e8   :  { %3489 = vmatpush2.msra.mxu0 %v1205_v63  ;;  %v2679_v44 = vpop.permute.xlu0 %2678  ;;  %v3644_v63 = vld [vmem:[%s10946_s5 + $0x70] sm:$0xff] }
 0x3e9   :  { %v1923_v35 = vpop.permute.xlu1 %1922  ;;  %v2693_v50 = vsel %vm2682_vm14, %v8765_v42, %v2679_v44  ;;  %v3718_v42 = vld [vmem:[%s10946_s5 + $0x2c0] sm:$0xff] }
 0x3ea   :  { %v1944_v13 = vsel %vm1938_vm7, %v1921_v29, %v1923_v35  ;;  %v3712_v29 = vld [vmem:[%s10946_s5 + $0x290] sm:$0xff]  ;;  %v3643_v35 = vld [vmem:[%s10946_s5 + $0x68] sm:$0xff]  ;;  %vm11254_vm7 = vcmask 1031168  }
 0x3eb   :  { %3547 = vmatprep.subr.mxu1 %v1944_v13  ;;  %v3708_v13 = vld [vmem:[%s10946_s5 + $0x270] sm:$0xff] }
 0x3ec   :  { %3548 = vmatpush1.msra.mxu1 %v1943_v59  ;;  %v2665_v52 = vpop.permute.xlu0 %2664  ;;  %v3642_v59 = vld [vmem:[%s10946_s5 + $0x60] sm:$0xff] }
 0x3ed   :  { %v1179_v43 = vpop.permute.xlu1 %1178  ;;  %v2687_v40 = vsel %vm2682_vm14, %v8789_v0, %v2665_v52  ;;  %v3659_v0 = vld [vmem:[%s10946_s5 + $0xe8] sm:$0xff] }
 0x3ee   :  { %v1200_v62 = vsel %vm1194_vm8, %v1177_v41, %v1179_v43  ;;  %v3709_v41 = vld [vmem:[%s10946_s5 + $0x278] sm:$0xff]  ;;  %v3707_v43 = vld [vmem:[%s10946_s5 + $0x268] sm:$0xff] }
 0x3ef   :  { %3490 = vmatprep.subr.mxu0 %v1200_v62  ;;  %v3706_v62 = vld [vmem:[%s10946_s5 + $0x260] sm:$0xff] }
 0x3f0   :  { %3491 = vmatpush2.msra.mxu0 %v1199_v61  ;;  %v3705_v61 = vld [vmem:[%s10946_s5 + $0x258] sm:$0xff] }
 0x3f1   :  { %3493 = vmatmul.mubr.f32.vlgmr.msra.gmra.mxu0 %v9063_v10  ;;  %v2681_v37 = vpop.permute.xlu1 %2680  ;;  %3911 = vmatprep.subr.mxu0 %v3725_v6  ;;  %v3720_v10 = vld [vmem:[%s10946_s5 + $0x2d0] sm:$0xff] }
 0x3f2   :  { %v2694_v28 = vsel %vm2682_vm14, %v2679_v44, %v2681_v37  ;;  %3498 = vmatprep.mubr.f32.mxu0 %v9072_v7  ;;  %3912 = vmatpush1.msra.mxu0 %v3724_v14  ;;  %v3719_v7 = vld [vmem:[%s10946_s5 + $0x2c8] sm:$0xff]  ;;  %v3641_v44 = vld [vmem:[%s10946_s5 + $0x58] sm:$0xff]  ;;  %v3640_v6 = vld [vmem:[%s10946_s5 + $0x50] sm:$0xff] }
 0x3f3   :  { %3577 = vmatprep.subr.mxu1 %v2694_v28  ;;  %3913 = vmatprep.subr.mxu0 %v3723_v25  ;;  %v3639_v14 = vld [vmem:[%s10946_s5 + $0x48] sm:$0xff]  ;;  %v3704_v25 = vld [vmem:[%s10946_s5 + $0x250] sm:$0xff]  ;;  %v3638_v37 = vld [vmem:[%s10946_s5 + $0x40] sm:$0xff] }
 0x3f4   :  { %3578 = vmatpush2.msra.mxu1 %v2693_v50  ;;  %3914 = vmatpush1.msra.mxu0 %v3722_v57  ;;  %v3703_v57 = vld [vmem:[%s10946_s5 + $0x248] sm:$0xff]  ;;  %v3702_v50 = vld [vmem:[%s10946_s5 + $0x240] sm:$0xff] }
 0x3f5   :  { %3499 = vmatmul.mubr.f32.gmra.mxu0 %v9082_v56  ;;  %v2667_v19 = vpop.permute.xlu1 %2666  ;;  %3915 = vmatprep.subr.mxu0 %v3721_v15  ;;  %v9267_v56 = vpop.f32.mrf.mxu0  ;;  %v3637_v15 = vld [vmem:[%s10946_s5 + $0x38] sm:$0xff] }
 0x3f6   :  { %v2688_v11 = vsel %vm2682_vm14, %v2665_v52, %v2667_v19  ;;  %3504 = vmatprep.mubr.f32.mxu0 %v9091_v36  ;;  %3916 = vmatpush1.msra.mxu0 %v3720_v10  ;;  %v7076_v36 = vld [vmem:[%s10944_s3 + $0x10] sm:$0xff]  ;;  %v3701_v52 = vld [vmem:[%s10946_s5 + $0x238] sm:$0xff]  ;;  %s7115_s3 = smov 91  }
 0x3f7   :  { %3579 = vmatprep.subr.mxu1 %v2688_v11  ;;  %3917 = vmatprep.subr.mxu0 %v3719_v7  ;;  %v3140_v39 = vpop.f32.mrf.mxu0  ;;  %v3636_v10 = vld [vmem:[%s10946_s5 + $0x30] sm:$0xff]  ;;  %v3635_v7 = vld [vmem:[%s10946_s5 + $0x28] sm:$0xff] }
 0x3f8   :  { %3580 = vmatpush2.msra.mxu1 %v2687_v40  ;;  %3918 = vmatpush1.msra.mxu0 %v3718_v42  ;;  %v3700_v19 = vld [vmem:[%s10946_s5 + $0x230] sm:$0xff]  ;;  %v3634_v42 = vld [vmem:[%s10946_s5 + $0x20] sm:$0xff]  ;;  %v3699_v11 = vld [vmem:[%s10946_s5 + $0x228] sm:$0xff] }
 0x3f9   :  { %3505 = vmatmul.mubr.f32.gmra.mxu0 %v9101_v32  ;;  %3582 = vmatmul.mubr.f32.vlgmr.msra.gmra.mxu1 %v7076_v36  ;;  %v9282_v31 = vpop.permute.xlu0 %3041  ;;  %v3658_v32 = vld [vmem:[%s10946_s5 + $0xe0] sm:$0xff]  ;;  %v9415_v28 = vpop.f32.mrf.mxu0  ;;  %v3632_v36 = vld [vmem:[%s10946_s5 + $0x10] sm:$0xff] }
 0x3fa   :  { %3822 = vmatprep.subr.mxu1 %v3661_v58  ;;  %3510 = vmatprep.mubr.f32.mxu0 %v9110_v34  ;;  %v3656_v34 = vld [vmem:[%s10946_s5 + $0xd0] sm:$0xff]  ;;  %v3141_v12 = vadd.f32 %v3140_v39, %v9282_v31  ;;  %v3633_v58 = vld [vmem:[%s10946_s5 + $0x18] sm:$0xff] }
 0x3fb   :  { %3823 = vmatpush1.msra.mxu1 %v3660_v17  ;;  %6598 = vmatprep.mubr.msk.f32.mxu1 %vm3059_vm1, %v7077_v51  ;;  %v9441_v40 = vpop.f32.mrf.mxu0  ;;  %v3698_v17 = vld [vmem:[%s10946_s5 + $0x220] sm:$0xff] }
 0x3fc   :  { %3824 = vmatprep.subr.mxu1 %v3659_v0  ;;  %3919 = vmatprep.subr.mxu0 %v3717_v46  ;;  %v3230_v49 = vadd.f32 %v3229_v54, %v3141_v12  ;;  %v3697_v0 = vld [vmem:[%s10946_s5 + $0x218] sm:$0xff]  ;;  %v3631_v46 = vld [vmem:[%s10946_s5 + $0x8] sm:$0xff]  ;;  %v3630_v51 = vld [vmem:[%s10946_s5] sm:$0xff] }
 0x3fd   :  { %3825 = vmatpush1.msra.mxu1 %v3658_v32  ;;  %3511 = vmatmul.mubr.f32.gmra.mxu0 %v9123_v1  ;;  %v3654_v1 = vld [vmem:[%s10946_s5 + $0xc0] sm:$0xff]  ;;  %v3696_v32 = vld [vmem:[%s10946_s5 + $0x210] sm:$0xff]  ;;  %v9467_v39 = vpop.f32.mrf.mxu0  ;;  %v3757_v12 = vld [vmem:[%s10946_s5 + $0x3f8] sm:$0xff] }
 0x3fe   :  { %3588 = vmatmul.mubr.f32.gmra.mxu1 %v7078_v8  ;;  %3826 = vmatprep.subr.mxu1 %v3657_v3  ;;  %v3607_v55 = vmax.f32 %v3230_v49, 0.0  ;;  %v3695_v3 = vld [vmem:[%s10946_s5 + $0x208] sm:$0xff]  ;;  %v3688_v49 = vld [vmem:[%s10946_s5 + $0x1d0] sm:$0xff] }
 0x3ff   :  { %3827 = vmatpush1.msra.mxu1 %v3656_v34  ;;  %6599 = vmatprep.mubr.msk.f32.mxu1 %vm3059_vm1, %v7079_v4  ;;  %v3693_v34 = vld [vmem:[%s10946_s5 + $0x1f8] sm:$0xff]  ;;  %v3691_v8 = vld [vmem:[%s10946_s5 + $0x1e8] sm:$0xff]  ;;  %v9495_v54 = vpop.f32.mrf.mxu0 }
 0x400   :  { %3828 = vmatprep.subr.mxu1 %v3655_v18  ;;  %3920 = vmatpush1.msra.mxu0 %v3716_v47  ;;  %v3694_v18 = vld [vmem:[%s10946_s5 + $0x200] sm:$0xff]  ;;  %v3692_v47 = vld [vmem:[%s10946_s5 + $0x1f0] sm:$0xff]  ;;  %v3755_v4 = vld [vmem:[%s10946_s5 + $0x3e8] sm:$0xff] }
 0x401   :  { %3829 = vmatpush1.msra.mxu1 %v3654_v1  ;;  %3921 = vmatprep.subr.mxu0 %v3715_v21  ;;  %v3756_v1 = vld [vmem:[%s10946_s5 + $0x3f0] sm:$0xff]  ;;  %v3690_v21 = vld [vmem:[%s10946_s5 + $0x1e0] sm:$0xff] }
 0x402   :  { %3594 = vmatmul.mubr.f32.gmra.mxu1 %v7080_v30  ;;  %3830 = vmatprep.subr.mxu1 %v3653_v26  ;;  %v9493_v26 = vpop.f32.mrf.mxu1  ;;  %v3687_v30 = vld [vmem:[%s10946_s5 + $0x1c8] sm:$0xff] }
 0x403   :  { %3831 = vmatpush1.msra.mxu1 %v3652_v48  ;;  %6600 = vmatprep.mubr.msk.f32.mxu1 %vm3059_vm1, %v7081_v24  ;;  %v3689_v48 = vld [vmem:[%s10946_s5 + $0x1d8] sm:$0xff]  ;;  %v3686_v24 = vld [vmem:[%s10946_s5 + $0x1c0] sm:$0xff]  ;;  %vm4358_vm1 = vcmask 949248  }
 0x404   :  { %3832 = vmatprep.subr.mxu1 %v3651_v16  ;;  %3922 = vmatpush1.msra.mxu0 %v3714_v33  ;;  %v3754_v16 = vld [vmem:[%s10946_s5 + $0x3e0] sm:$0xff]  ;;  %v3753_v33 = vld [vmem:[%s10946_s5 + $0x3d8] sm:$0xff] }
 0x405   :  { %3833 = vmatpush1.msra.mxu1 %v3650_v53  ;;  %3923 = vmatprep.subr.mxu0 %v3713_v20  ;;  %v3752_v53 = vld [vmem:[%s10946_s5 + $0x3d0] sm:$0xff]  ;;  %v9515_v20 = vpop.f32.mrf.mxu0 }
 0x406   :  { %3600 = vmatmul.mubr.f32.gmra.mxu1 %v7082_v45  ;;  %3834 = vmatprep.subr.mxu1 %v3649_v27  ;;  %v3751_v27 = vld [vmem:[%s10946_s5 + $0x3c8] sm:$0xff]  ;;  %v3749_v45 = vld [vmem:[%s10946_s5 + $0x3b8] sm:$0xff] }
 0x407   :  { %3835 = vmatpush1.msra.mxu1 %v3648_v2  ;;  %3886 = vmatprep.mubr.f32.mxu1 %v3607_v55  ;;  %v9523_v2 = vpop.f32.mrf.mxu1  ;;  %v3685_v55 = vld [vmem:[%s10946_s5 + $0x1b8] sm:$0xff] }
 0x408   :  { %3836 = vmatprep.subr.mxu1 %v3647_v5  ;;  %3924 = vmatpush1.msra.mxu0 %v3712_v29  ;;  %v3750_v5 = vld [vmem:[%s10946_s5 + $0x3c0] sm:$0xff]  ;;  %v3684_v29 = vld [vmem:[%s10946_s5 + $0x1b0] sm:$0xff] }
 0x409   :  { %3837 = vmatpush1.msra.mxu1 %v3646_v60  ;;  %3925 = vmatprep.subr.mxu0 %v3711_v38  ;;  %v3683_v60 = vld [vmem:[%s10946_s5 + $0x1a8] sm:$0xff]  ;;  %v3748_v38 = vld [vmem:[%s10946_s5 + $0x3b0] sm:$0xff] }
 0x40a   :  { %3838 = vmatprep.subr.mxu1 %v3645_v9  ;;  %3926 = vmatpush1.msra.mxu0 %v3710_v23  ;;  %v9543_v9 = vpop.f32.mrf.mxu0  ;;  %v3682_v23 = vld [vmem:[%s10946_s5 + $0x1a0] sm:$0xff] }
 0x40b   :  { %3839 = vmatpush1.msra.mxu1 %v3644_v63  ;;  %3927 = vmatprep.subr.mxu0 %v3709_v41  ;;  %v3747_v63 = vld [vmem:[%s10946_s5 + $0x3a8] sm:$0xff]  ;;  %v9551_v41 = vpop.f32.mrf.mxu1 }
 0x40c   :  { %3840 = vmatprep.subr.mxu1 %v3643_v35  ;;  %3928 = vmatpush1.msra.mxu0 %v3708_v13  ;;  %v3681_v35 = vld [vmem:[%s10946_s5 + $0x198] sm:$0xff]  ;;  %v3746_v13 = vld [vmem:[%s10946_s5 + $0x3a0] sm:$0xff] }
 0x40d   :  { %3841 = vmatpush1.msra.mxu1 %v3642_v59  ;;  %3929 = vmatprep.subr.mxu0 %v3707_v43  ;;  %v3680_v59 = vld [vmem:[%s10946_s5 + $0x190] sm:$0xff]  ;;  %v3745_v43 = vld [vmem:[%s10946_s5 + $0x398] sm:$0xff] }
 0x40e   :  { %3842 = vmatprep.subr.mxu1 %v3641_v44  ;;  %3930 = vmatpush1.msra.mxu0 %v3706_v62  ;;  %v3679_v44 = vld [vmem:[%s10946_s5 + $0x188] sm:$0xff]  ;;  %v3744_v62 = vld [vmem:[%s10946_s5 + $0x390] sm:$0xff] }
 0x40f   :  { %3843 = vmatpush1.msra.mxu1 %v3640_v6  ;;  %3931 = vmatprep.subr.mxu0 %v3705_v61  ;;  %v9571_v6 = vpop.f32.mrf.mxu0  ;;  %v3678_v61 = vld [vmem:[%s10946_s5 + $0x180] sm:$0xff] }
 0x410   :  { %3844 = vmatprep.subr.mxu1 %v3639_v14  ;;  %3932 = vmatpush1.msra.mxu0 %v3704_v25  ;;  %v3743_v14 = vld [vmem:[%s10946_s5 + $0x388] sm:$0xff]  ;;  %v9579_v25 = vpop.f32.mrf.mxu1 }
 0x411   :  { %3845 = vmatpush1.msra.mxu1 %v3638_v37  ;;  %3933 = vmatprep.subr.mxu0 %v3703_v57  ;;  %v3677_v37 = vld [vmem:[%s10946_s5 + $0x178] sm:$0xff]  ;;  %v3742_v57 = vld [vmem:[%s10946_s5 + $0x380] sm:$0xff] }
 0x412   :  { %3846 = vmatprep.subr.mxu1 %v3637_v15  ;;  %3934 = vmatpush1.msra.mxu0 %v3702_v50  ;;  %v3676_v15 = vld [vmem:[%s10946_s5 + $0x170] sm:$0xff]  ;;  %v3741_v50 = vld [vmem:[%s10946_s5 + $0x378] sm:$0xff] }
 0x413   :  { %3847 = vmatpush1.msra.mxu1 %v3636_v10  ;;  %3935 = vmatprep.subr.mxu0 %v3701_v52  ;;  %v3675_v10 = vld [vmem:[%s10946_s5 + $0x168] sm:$0xff]  ;;  %v3740_v52 = vld [vmem:[%s10946_s5 + $0x370] sm:$0xff] }
 0x414   :  { %3848 = vmatprep.subr.mxu1 %v3635_v7  ;;  %3936 = vmatpush1.msra.mxu0 %v3700_v19  ;;  %v9599_v7 = vpop.f32.mrf.mxu1  ;;  %v9601_v19 = vpop.f32.mrf.mxu0 }
 0x415   :  { %3849 = vmatpush1.msra.mxu1 %v3634_v42  ;;  %3937 = vmatprep.subr.mxu0 %v3699_v11  ;;  %v3674_v42 = vld [vmem:[%s10946_s5 + $0x160] sm:$0xff]  ;;  %v3739_v11 = vld [vmem:[%s10946_s5 + $0x368] sm:$0xff] }
 0x416   :  { %3850 = vmatprep.subr.mxu1 %v3633_v58  ;;  %3938 = vmatpush1.msra.mxu0 %v3698_v17  ;;  %v3673_v58 = vld [vmem:[%s10946_s5 + $0x158] sm:$0xff]  ;;  %v3738_v17 = vld [vmem:[%s10946_s5 + $0x360] sm:$0xff] }
 0x417   :  { %3851 = vmatpush1.msra.mxu1 %v3632_v36  ;;  %3939 = vmatprep.subr.mxu0 %v3697_v0  ;;  %v3672_v36 = vld [vmem:[%s10946_s5 + $0x150] sm:$0xff]  ;;  %v3737_v0 = vld [vmem:[%s10946_s5 + $0x358] sm:$0xff] }
 0x418   :  { %3852 = vmatprep.subr.mxu1 %v3631_v46  ;;  %3940 = vmatpush1.msra.mxu0 %v3696_v32  ;;  %v9621_v46 = vpop.permute.xlu1 %3046  ;;  %v9623_v32 = vpop.f32.mrf.mxu1 }
 0x419   :  { %3853 = vmatpush1.msra.mxu1 %v3630_v51  ;;  %3941 = vmatprep.subr.mxu0 %v3695_v3  ;;  %v3671_v51 = vld [vmem:[%s10946_s5 + $0x148] sm:$0xff]  ;;  %v3736_v3 = vld [vmem:[%s10946_s5 + $0x350] sm:$0xff] }
 0x41a   :  { %3854 = vmatprep.subr.mxu1 %v3693_v34  ;;  %3942 = vmatpush1.msra.mxu0 %v3694_v18  ;;  %v9631_v34 = vpop.f32.mrf.mxu0  ;;  %v3670_v18 = vld [vmem:[%s10946_s5 + $0x140] sm:$0xff] }
 0x41b   :  { %3855 = vmatpush2.msra.mxu1 %v3692_v47  ;;  %3943 = vmatprep.subr.mxu0 %v3757_v12  ;;  %v3735_v47 = vld [vmem:[%s10946_s5 + $0x348] sm:$0xff]  ;;  %v3669_v12 = vld [vmem:[%s10946_s5 + $0x138] sm:$0xff] }
 0x41c   :  { %3856 = vmatprep.subr.mxu1 %v3691_v8  ;;  %3944 = vmatpush2.msra.mxu0 %v3756_v1  ;;  %v3734_v8 = vld [vmem:[%s10946_s5 + $0x340] sm:$0xff]  ;;  %v3147_v1 = vadd.f32 %v9441_v40, %v9621_v46  ;;  %v3667_v40 = vld [vmem:[%s10946_s5 + $0x128] sm:$0xff] }
 0x41d   :  { %3857 = vmatpush2.msra.mxu1 %v3690_v21  ;;  %3945 = vmatprep.subr.mxu0 %v3755_v4  ;;  %v3668_v21 = vld [vmem:[%s10946_s5 + $0x130] sm:$0xff]  ;;  %v3733_v4 = vld [vmem:[%s10946_s5 + $0x338] sm:$0xff] }
 0x41e   :  { %3858 = vmatprep.subr.mxu1 %v3689_v48  ;;  %3946 = vmatpush2.msra.mxu0 %v3754_v16  ;;  %v3139_v48 = vadd.f32 %v9267_v56, %v9282_v31  ;;  %v3666_v56 = vld [vmem:[%s10946_s5 + $0x120] sm:$0xff] }
 0x41f   :  { %3859 = vmatpush2.msra.mxu1 %v3688_v49  ;;  %3947 = vmatprep.subr.mxu0 %v3753_v33  ;;  %v3732_v49 = vld [vmem:[%s10946_s5 + $0x330] sm:$0xff]  ;;  %v3413_v33 = vpop.f32.mrf.mxu0 }
 0x420   :  { %3860 = vmatprep.subr.mxu1 %v3687_v30  ;;  %3948 = vmatpush2.msra.mxu0 %v3752_v53  ;;  %v3145_v30 = vadd.f32 %v9415_v28, %v9621_v46  ;;  %v9663_v53 = vpop.permute.xlu0 %3051  ;;  %v3665_v28 = vld [vmem:[%s10946_s5 + $0x118] sm:$0xff] }
 0x421   :  { %3861 = vmatpush2.msra.mxu1 %v3686_v24  ;;  %3949 = vmatprep.subr.mxu0 %v3751_v27  ;;  %v3731_v27 = vld [vmem:[%s10946_s5 + $0x328] sm:$0xff] }
 0x422   :  { %3862 = vmatprep.subr.mxu1 %v3685_v55  ;;  %3950 = vmatpush2.msra.mxu0 %v3750_v5  ;;  %v3730_v5 = vld [vmem:[%s10946_s5 + $0x320] sm:$0xff] }
 0x423   :  { %3863 = vmatpush2.msra.mxu1 %v3684_v29  ;;  %3951 = vmatprep.subr.mxu0 %v3749_v45  ;;  %v3236_v29 = vadd.f32 %v9523_v2, %v3147_v1  ;;  %v3787_v1 = vld [vmem:[%s10946_s5 + $0x4e8] sm:$0xff] }
 0x424   :  { %3864 = vmatprep.subr.mxu1 %v3683_v60  ;;  %3952 = vmatpush2.msra.mxu0 %v3748_v38  ;;  %v3664_v60 = vld [vmem:[%s10946_s5 + $0x110] sm:$0xff]  ;;  %v3729_v38 = vld [vmem:[%s10946_s5 + $0x318] sm:$0xff] }
 0x425   :  { %3865 = vmatpush2.msra.mxu1 %v3682_v23  ;;  %3953 = vmatprep.subr.mxu0 %v3747_v63  ;;  %v3228_v23 = vadd.f32 %v9295_v22, %v3139_v48  ;;  %v9687_v63 = vpop.permute.xlu1 %3056 }
 0x426   :  { %3866 = vmatprep.subr.mxu1 %v3681_v35  ;;  %3954 = vmatpush2.msra.mxu0 %v3746_v13  ;;  %v3153_v35 = vadd.f32 %v9495_v54, %v9663_v53  ;;  %v3663_v13 = vld [vmem:[%s10946_s5 + $0x108] sm:$0xff] }
 0x427   :  { %3867 = vmatpush2.msra.mxu1 %v3680_v59  ;;  %3955 = vmatprep.subr.mxu0 %v3745_v43  ;;  %v3728_v59 = vld [vmem:[%s10946_s5 + $0x310] sm:$0xff]  ;;  %v3417_v43 = vpop.f32.mrf.mxu0 }
 0x428   :  { %3868 = vmatprep.subr.mxu1 %v3679_v44  ;;  %3956 = vmatpush2.msra.mxu0 %v3744_v62  ;;  %v3234_v44 = vadd.f32 %v9493_v26, %v3145_v30 }
 0x429   :  { %3869 = vmatpush2.msra.mxu1 %v3678_v61  ;;  %3957 = vmatprep.subr.mxu0 %v3743_v14  ;;  %v3662_v61 = vld [vmem:[%s10946_s5 + $0x100] sm:$0xff]  ;;  %v3727_v14 = vld [vmem:[%s10946_s5 + $0x308] sm:$0xff] }
 0x42a   :  { %3870 = vmatprep.subr.mxu1 %v3677_v37  ;;  %3958 = vmatpush2.msra.mxu0 %v3742_v57  ;;  %v3151_v37 = vadd.f32 %v9467_v39, %v9663_v53  ;;  %v3613_v57 = vmax.f32 %v3236_v29, 0.0  ;;  %v3242_v39 = vadd.f32 %v9579_v25, %v3153_v35  ;;  %v3788_v25 = vld [vmem:[%s10946_s5 + $0x4f0] sm:$0xff] }
 0x42b   :  { %3871 = vmatpush2.msra.mxu1 %v3676_v15  ;;  %3959 = vmatprep.subr.mxu0 %v3741_v50  ;;  %v3159_v15 = vadd.f32 %v9543_v9, %v9687_v63  ;;  %v3789_v9 = vld [vmem:[%s10946_s5 + $0x4f8] sm:$0xff] }
 0x42c   :  { %3872 = vmatprep.subr.mxu1 %v3675_v10  ;;  %3960 = vmatpush2.msra.mxu0 %v3740_v52 }
 0x42d   :  { %3873 = vmatpush2.msra.mxu1 %v3674_v42  ;;  %3961 = vmatprep.subr.mxu0 %v3739_v11  ;;  %v3419_v11 = vpop.f32.mrf.mxu0 }
 0x42e   :  { %3874 = vmatprep.subr.mxu1 %v3673_v58  ;;  %3962 = vmatpush2.msra.mxu0 %v3738_v17  ;;  %v3157_v58 = vadd.f32 %v9515_v20, %v9687_v63  ;;  %v3248_v20 = vadd.f32 %v9623_v32, %v3159_v15  ;;  %v3786_v32 = vld [vmem:[%s10946_s5 + $0x4e0] sm:$0xff]  ;;  %v3767_v15 = vld [vmem:[%s10946_s5 + $0x448] sm:$0xff] }
 0x42f   :  { %3875 = vmatpush2.msra.mxu1 %v3672_v36  ;;  %3963 = vmatprep.subr.mxu0 %v3737_v0 }
 0x430   :  { %3876 = vmatprep.subr.mxu1 %v3671_v51  ;;  %3964 = vmatpush2.msra.mxu0 %v3736_v3  ;;  %v3612_v51 = vmax.f32 %v3234_v44, 0.0  ;;  %v3246_v48 = vadd.f32 %v9599_v7, %v3157_v58  ;;  %v3777_v44 = vld [vmem:[%s10946_s5 + $0x498] sm:$0xff]  ;;  %v3759_v58 = vld [vmem:[%s10946_s5 + $0x408] sm:$0xff] }
 0x431   :  { %3877 = vmatpush2.msra.mxu1 %v3670_v18  ;;  %v3316_v16 = vpop.f32.mrf.mxu1  ;;  %3965 = vmatprep.subr.mxu0 %v3735_v47  ;;  %v3240_v18 = vadd.f32 %v9551_v41, %v3151_v37  ;;  %v3771_v37 = vld [vmem:[%s10946_s5 + $0x468] sm:$0xff] }
 0x432   :  { %v3317_v24 = vadd.f32 %v3316_v16, %v9282_v31  ;;  %3878 = vmatprep.subr.mxu1 %v3669_v12  ;;  %3966 = vmatpush2.msra.mxu0 %v3734_v8 }
 0x433   :  { %3879 = vmatpush2.msra.mxu1 %v3668_v21  ;;  %v3318_v55 = vpop.f32.mrf.mxu1  ;;  %3967 = vmatprep.subr.mxu0 %v3733_v4  ;;  %v3619_v21 = vmax.f32 %v3242_v39, 0.0  ;;  %v3618_v7 = vmax.f32 %v3240_v18, 0.0  ;;  %v3762_v39 = vld [vmem:[%s10946_s5 + $0x420] sm:$0xff]  ;;  %v3813_v18 = vld [vmem:[%s10946_s5 + $0x5b8] sm:$0xff] }
 0x434   :  { %v3319_v45 = vadd.f32 %v3318_v55, %v9282_v31  ;;  %3880 = vmatprep.subr.mxu1 %v3667_v40  ;;  %3968 = vmatpush2.msra.mxu0 %v3732_v49  ;;  %v3406_v22 = vadd.f32 %v9571_v6, %v3317_v24  ;;  %v3726_v6 = vld [vmem:[%s10946_s5 + $0x300] sm:$0xff]  ;;  %v3785_v49 = vld [vmem:[%s10946_s5 + $0x4d8] sm:$0xff]  ;;  %v3625_v24 = vmax.f32 %v3248_v20, 0.0 }
 0x435   :  { %3881 = vmatpush2.msra.mxu1 %v3666_v56  ;;  %v3322_v2 = vpop.f32.mrf.mxu1  ;;  %3969 = vmatprep.subr.mxu0 %v3731_v27  ;;  %v3814_v20 = vld [vmem:[%s10946_s5 + $0x5c0] sm:$0xff] }
 0x436   :  { %v3408_v62 = vadd.f32 %v9601_v19, %v3319_v45  ;;  %3882 = vmatprep.subr.mxu1 %v3665_v28  ;;  %3970 = vmatpush2.msra.mxu0 %v3730_v5  ;;  %v3323_v54 = vadd.f32 %v3322_v2, %v9621_v46  ;;  %v3606_v19 = vmax.f32 %v3228_v23, 0.0  ;;  %v3608_v17 = vmax.f32 %v3406_v22, 0.0  ;;  %v3784_v28 = vld [vmem:[%s10946_s5 + $0x4d0] sm:$0xff]  ;;  %v3783_v5 = vld [vmem:[%s10946_s5 + $0x4c8] sm:$0xff]  ;;  %v3781_v2 = vld [vmem:[%s10946_s5 + $0x4b8] sm:$0xff] }
 0x437   :  { %3883 = vmatpush2.msra.mxu1 %v3664_v60  ;;  %v3324_v26 = vpop.f32.mrf.mxu1  ;;  %3971 = vmatprep.subr.mxu0 %v3729_v38  ;;  %v3624_v60 = vmax.f32 %v3246_v48, 0.0  ;;  %v3782_v38 = vld [vmem:[%s10946_s5 + $0x4c0] sm:$0xff]  ;;  %v3776_v22 = vld [vmem:[%s10946_s5 + $0x490] sm:$0xff] }
 0x438   :  { %v3609_v50 = vmax.f32 %v3408_v62, 0.0  ;;  %v3325_v10 = vadd.f32 %v3324_v26, %v9621_v46  ;;  %v3412_v52 = vadd.f32 %v9631_v34, %v3323_v54  ;;  %3884 = vmatprep.subr.mxu1 %v3663_v13  ;;  %3972 = vmatpush2.msra.mxu0 %v3728_v59  ;;  %v3423_v34 = vpop.f32.mrf.mxu0  ;;  %v3780_v13 = vld [vmem:[%s10946_s5 + $0x4b0] sm:$0xff]  ;;  %v3779_v59 = vld [vmem:[%s10946_s5 + $0x4a8] sm:$0xff]  ;;  %v3774_v54 = vld [vmem:[%s10946_s5 + $0x480] sm:$0xff] }
 0x439   :  { %3885 = vmatpush2.msra.mxu1 %v3662_v61  ;;  %v3328_v42 = vpop.f32.mrf.mxu1  ;;  %3973 = vmatprep.subr.mxu0 %v3727_v14  ;;  %v3775_v62 = vld [vmem:[%s10946_s5 + $0x488] sm:$0xff]  ;;  %v3773_v61 = vld [vmem:[%s10946_s5 + $0x478] sm:$0xff]  ;;  %v3772_v14 = vld [vmem:[%s10946_s5 + $0x470] sm:$0xff] }
 0x43a   :  { %v3329_v36 = vadd.f32 %v3328_v42, %v9663_v53  ;;  %v3414_v0 = vadd.f32 %v3413_v33, %v3325_v10  ;;  %3887 = vmatmul.mubr.f32.vlgmr.msra.gmra.mxu1 %v3606_v19  ;;  %3974 = vmatpush2.msra.mxu0 %v3726_v6  ;;  %v3614_v47 = vmax.f32 %v3412_v52, 0.0  ;;  %v3425_v30 = vpop.f32.mrf.mxu0  ;;  %v3770_v26 = vld [vmem:[%s10946_s5 + $0x460] sm:$0xff]  ;;  %v3769_v6 = vld [vmem:[%s10946_s5 + $0x458] sm:$0xff]  ;;  %v3764_v52 = vld [vmem:[%s10946_s5 + $0x430] sm:$0xff] }
 0x43b   :  { %3975 = vmatprep.mubr.f32.mxu0 %v3609_v50  ;;  %v3330_v3 = vpop.f32.mrf.mxu1  ;;  %3892 = vmatprep.mubr.f32.mxu1 %v3613_v57  ;;  %v3768_v57 = vld [vmem:[%s10946_s5 + $0x450] sm:$0xff]  ;;  %v3766_v50 = vld [vmem:[%s10946_s5 + $0x440] sm:$0xff]  ;;  %v3765_v10 = vld [vmem:[%s10946_s5 + $0x438] sm:$0xff] }
 0x43c   :  { %v3615_v12 = vmax.f32 %v3414_v0, 0.0  ;;  %v3331_v8 = vadd.f32 %v3330_v3, %v9663_v53  ;;  %3976 = vmatmul.mubr.f32.vlgmr.msra.gmra.mxu0 %v3608_v17  ;;  %4000 = vmatprep.subr.mxu1 %v3789_v9  ;;  %v3418_v41 = vadd.f32 %v3417_v43, %v3329_v36  ;;  %v3778_v43 = vld [vmem:[%s10946_s5 + $0x4a0] sm:$0xff]  ;;  %v3763_v19 = vld [vmem:[%s10946_s5 + $0x428] sm:$0xff]  ;;  %v3761_v42 = vld [vmem:[%s10946_s5 + $0x418] sm:$0xff] }
 0x43d   :  { %v3334_v4 = vpop.f32.mrf.mxu1  ;;  %4001 = vmatpush1.msra.mxu1 %v3788_v25  ;;  %v3758_v9 = vld [vmem:[%s10946_s5 + $0x400] sm:$0xff]  ;;  %v3821_v17 = vld [vmem:[%s10946_s5 + $0x5f8] sm:$0xff]  ;;  %v3820_v36 = vld [vmem:[%s10946_s5 + $0x5f0] sm:$0xff] }
 0x43e   :  { %v3420_v16 = vadd.f32 %v3419_v11, %v3331_v8  ;;  %3893 = vmatmul.mubr.f32.gmra.mxu1 %v3612_v51  ;;  %3981 = vmatprep.mubr.f32.mxu0 %v3615_v12  ;;  %v3335_v40 = vadd.f32 %v3334_v4, %v9687_v63  ;;  %v3620_v29 = vmax.f32 %v3418_v41, 0.0  ;;  %v3760_v11 = vld [vmem:[%s10946_s5 + $0x410] sm:$0xff]  ;;  %v3819_v0 = vld [vmem:[%s10946_s5 + $0x5e8] sm:$0xff]  ;;  %v3818_v51 = vld [vmem:[%s10946_s5 + $0x5e0] sm:$0xff] }
 0x43f   :  { %3898 = vmatprep.mubr.f32.mxu1 %v3619_v21  ;;  %v3336_v33 = vpop.f32.mrf.mxu1  ;;  %4002 = vmatprep.subr.mxu1 %v3787_v1  ;;  %v3817_v25 = vld [vmem:[%s10946_s5 + $0x5d8] sm:$0xff]  ;;  %v3816_v3 = vld [vmem:[%s10946_s5 + $0x5d0] sm:$0xff]  ;;  %v3811_v12 = vld [vmem:[%s10946_s5 + $0x5a8] sm:$0xff] }
 0x440   :  { %v3621_v56 = vmax.f32 %v3420_v16, 0.0  ;;  %3982 = vmatmul.mubr.f32.gmra.mxu0 %v3614_v47  ;;  %v3337_v27 = vadd.f32 %v3336_v33, %v9687_v63  ;;  %v3424_v55 = vadd.f32 %v3423_v34, %v3335_v40  ;;  %4003 = vmatpush1.msra.mxu1 %v3786_v32  ;;  %v3815_v34 = vld [vmem:[%s10946_s5 + $0x5c8] sm:$0xff]  ;;  %v3812_v47 = vld [vmem:[%s10946_s5 + $0x5b0] sm:$0xff]  ;;  %v3810_v8 = vld [vmem:[%s10946_s5 + $0x5a0] sm:$0xff] }
 0x441   :  { %4004 = vmatprep.subr.mxu1 %v3785_v49  ;;  %v3809_v1 = vld [vmem:[%s10946_s5 + $0x598] sm:$0xff]  ;;  %v3808_v21 = vld [vmem:[%s10946_s5 + $0x590] sm:$0xff]  ;;  %v3807_v4 = vld [vmem:[%s10946_s5 + $0x588] sm:$0xff] }
 0x442   :  { %3899 = vmatmul.mubr.f32.gmra.mxu1 %v3618_v7  ;;  %3987 = vmatprep.mubr.f32.mxu0 %v3621_v56  ;;  %v3426_v45 = vadd.f32 %v3425_v30, %v3337_v27  ;;  %v3626_v35 = vmax.f32 %v3424_v55, 0.0  ;;  %v3806_v48 = vld [vmem:[%s10946_s5 + $0x580] sm:$0xff]  ;;  %v3805_v32 = vld [vmem:[%s10946_s5 + $0x578] sm:$0xff]  ;;  %v3804_v41 = vld [vmem:[%s10946_s5 + $0x570] sm:$0xff] }
 0x443   :  { %3904 = vmatprep.mubr.f32.mxu1 %v3625_v24  ;;  %4005 = vmatpush1.msra.mxu1 %v3784_v28  ;;  %v3803_v16 = vld [vmem:[%s10946_s5 + $0x568] sm:$0xff]  ;;  %v3802_v40 = vld [vmem:[%s10946_s5 + $0x560] sm:$0xff]  ;;  %v3801_v49 = vld [vmem:[%s10946_s5 + $0x558] sm:$0xff] }
 0x444   :  { %3988 = vmatmul.mubr.f32.gmra.mxu0 %v3620_v29  ;;  %v3627_v23 = vmax.f32 %v3426_v45, 0.0  ;;  %4006 = vmatprep.subr.mxu1 %v3783_v5  ;;  %v3800_v33 = vld [vmem:[%s10946_s5 + $0x550] sm:$0xff]  ;;  %v3799_v30 = vld [vmem:[%s10946_s5 + $0x548] sm:$0xff]  ;;  %v3798_v24 = vld [vmem:[%s10946_s5 + $0x540] sm:$0xff] }
 0x445   :  { %4007 = vmatpush1.msra.mxu1 %v3782_v38  ;;  %v3797_v7 = vld [vmem:[%s10946_s5 + $0x538] sm:$0xff]  ;;  %v3796_v56 = vld [vmem:[%s10946_s5 + $0x530] sm:$0xff]  ;;  %v3795_v27 = vld [vmem:[%s10946_s5 + $0x528] sm:$0xff] }
 0x446   :  { %3993 = vmatprep.mubr.f32.mxu0 %v3627_v23  ;;  %3905 = vmatmul.mubr.f32.gmra.mxu1 %v3624_v60  ;;  %v3794_v55 = vld [vmem:[%s10946_s5 + $0x520] sm:$0xff]  ;;  %v3793_v28 = vld [vmem:[%s10946_s5 + $0x518] sm:$0xff]  ;;  %v3792_v5 = vld [vmem:[%s10946_s5 + $0x510] sm:$0xff] }
 0x447   :  { %4008 = vmatprep.subr.mxu1 %v3781_v2  ;;  %v3791_v29 = vld [vmem:[%s10946_s5 + $0x508] sm:$0xff]  ;;  %v3790_v45 = vld [vmem:[%s10946_s5 + $0x500] sm:$0xff]  ;;  %s7109_s5 = smov 115  }
 0x448   :  { %3994 = vmatmul.mubr.f32.gmra.mxu0 %v3626_v35  ;;  %4009 = vmatpush1.msra.mxu1 %v3780_v13 }
 0x449   :  { %4010 = vmatprep.subr.mxu1 %v3779_v59 }
 0x44a   :  { %4011 = vmatpush1.msra.mxu1 %v3778_v43 }
 0x44b   :  { %4012 = vmatprep.subr.mxu1 %v3777_v44 }
 0x44c   :  { %4013 = vmatpush1.msra.mxu1 %v3776_v22 }
 0x44d   :  { %4014 = vmatprep.subr.mxu1 %v3775_v62 }
 0x44e   :  { %4015 = vmatpush1.msra.mxu1 %v3774_v54 }
 0x44f   :  { %4016 = vmatprep.subr.mxu1 %v3773_v61 }
 0x450   :  { %4017 = vmatpush1.msra.mxu1 %v3772_v14 }
 0x451   :  { %4018 = vmatprep.subr.mxu1 %v3771_v37 }
 0x452   :  { %4019 = vmatpush1.msra.mxu1 %v3770_v26 }
 0x453   :  { %4020 = vmatprep.subr.mxu1 %v3769_v6 }
 0x454   :  { %4021 = vmatpush1.msra.mxu1 %v3768_v57 }
 0x455   :  { %4022 = vmatprep.subr.mxu1 %v3767_v15 }
 0x456   :  { %4023 = vmatpush1.msra.mxu1 %v3766_v50 }
 0x457   :  { %4024 = vmatprep.subr.mxu1 %v3765_v10 }
 0x458   :  { %4025 = vmatpush1.msra.mxu1 %v3764_v52 }
 0x459   :  { %4026 = vmatprep.subr.mxu1 %v3763_v19 }
 0x45a   :  { %4027 = vmatpush1.msra.mxu1 %v3762_v39 }
 0x45b   :  { %4028 = vmatprep.subr.mxu1 %v3761_v42 }
 0x45c   :  { %4029 = vmatpush1.msra.mxu1 %v3760_v11 }
 0x45d   :  { %4030 = vmatprep.subr.mxu1 %v3759_v58 }
 0x45e   :  { %4031 = vmatpush1.msra.mxu1 %v3758_v9 }
 0x45f   :  { %4032 = vmatprep.subr.mxu1 %v3821_v17 }
 0x460   :  { %4033 = vmatpush2.msra.mxu1 %v3820_v36 }
 0x461   :  { %4034 = vmatprep.subr.mxu1 %v3819_v0 }
 0x462   :  { %4035 = vmatpush2.msra.mxu1 %v3818_v51 }
 0x463   :  { %4036 = vmatprep.subr.mxu1 %v3817_v25 }
 0x464   :  { %4037 = vmatpush2.msra.mxu1 %v3816_v3 }
 0x465   :  { %4038 = vmatprep.subr.mxu1 %v3815_v34 }
 0x466   :  { %4039 = vmatpush2.msra.mxu1 %v3814_v20 }
 0x467   :  { %4040 = vmatprep.subr.mxu1 %v3813_v18 }
 0x468   :  { %4041 = vmatpush2.msra.mxu1 %v3812_v47 }
 0x469   :  { %4042 = vmatprep.subr.mxu1 %v3811_v12 }
 0x46a   :  { %4043 = vmatpush2.msra.mxu1 %v3810_v8 }
 0x46b   :  { %4044 = vmatprep.subr.mxu1 %v3809_v1 }
 0x46c   :  { %4045 = vmatpush2.msra.mxu1 %v3808_v21 }
 0x46d   :  { %4046 = vmatprep.subr.mxu1 %v3807_v4 }
 0x46e   :  { %4047 = vmatpush2.msra.mxu1 %v3806_v48 }
 0x46f   :  { %4048 = vmatprep.subr.mxu1 %v3805_v32 }
 0x470   :  { %4049 = vmatpush2.msra.mxu1 %v3804_v41 }
 0x471   :  { %4050 = vmatprep.subr.mxu1 %v3803_v16 }
 0x472   :  { %4051 = vmatpush2.msra.mxu1 %v3802_v40 }
 0x473   :  { %4052 = vmatprep.subr.mxu1 %v3801_v49 }
 0x474   :  { %4053 = vmatpush2.msra.mxu1 %v3800_v33 }
 0x475   :  { %4054 = vmatprep.subr.mxu1 %v3799_v30 }
 0x476   :  { %4055 = vmatpush2.msra.mxu1 %v3798_v24 }
 0x477   :  { %4056 = vmatprep.subr.mxu1 %v3797_v7 }
 0x478   :  { %4057 = vmatpush2.msra.mxu1 %v3796_v56 }
 0x479   :  { %4058 = vmatprep.subr.mxu1 %v3795_v27 }
 0x47a   :  { %4059 = vmatpush2.msra.mxu1 %v3794_v55 }
 0x47b   :  { %4060 = vmatprep.subr.mxu1 %v3793_v28 }
 0x47c   :  { %4061 = vmatpush2.msra.mxu1 %v3792_v5 }
 0x47d   :  { %4062 = vmatprep.subr.mxu1 %v3791_v29 }
 0x47e   :  { %4063 = vmatpush2.msra.mxu1 %v3790_v45 }
 0x4b1   :  { %v3494_v60 = vpop.f32.mrf.mxu0 }
 0x4b2   :  { %v3495_v2 = vadd.f32 %v3494_v60, %v9282_v31 }
 0x4b3   :  { %v3496_v38 = vpop.f32.mrf.mxu0 }
 0x4b4   :  { %v3497_v43 = vadd.f32 %v3496_v38, %v9282_v31 }
 0x4b5   :  { %v3500_v23 = vpop.f32.mrf.mxu0 }
 0x4b6   :  { %v3501_v61 = vadd.f32 %v3500_v23, %v9621_v46 }
 0x4b7   :  { %v3502_v35 = vpop.f32.mrf.mxu0 }
 0x4b8   :  { %v3503_v26 = vadd.f32 %v3502_v35, %v9621_v46 }
 0x4b9   :  { %v3506_v13 = vpop.f32.mrf.mxu0  ;;  %v3583_v59 = vpop.f32.mrf.mxu1 }
 0x4ba   :  { %v3584_v44 = vadd.f32 %v3583_v59, %v3495_v2  ;;  %v3507_v52 = vadd.f32 %v3506_v13, %v9663_v53 }
 0x4bb   :  { %v3585_v22 = vpop.f32.mrf.mxu1  ;;  %v3508_v62 = vpop.f32.mrf.mxu0 }
 0x4bc   :  { %v3586_v54 = vadd.f32 %v3585_v22, %v3497_v43  ;;  %v3610_v6 = vmax.f32 %v3584_v44, 0.0  ;;  %v3509_v19 = vadd.f32 %v3508_v62, %v9663_v53 }
 0x4bd   :  { %v3512_v57 = vpop.f32.mrf.mxu0 }
 0x4be   :  { %v3611_v14 = vmax.f32 %v3586_v54, 0.0  ;;  %v3589_v37 = vpop.f32.mrf.mxu1  ;;  %v3513_v46 = vadd.f32 %v3512_v57, %v9687_v63 }
 0x4bf   :  { %v3590_v15 = vadd.f32 %v3589_v37, %v3501_v61  ;;  %v3514_v11 = vpop.f32.mrf.mxu0 }
 0x4c0   :  { %v3591_v50 = vpop.f32.mrf.mxu1  ;;  %4064 = vmatprep.mubr.f32.mxu1 %v3611_v14  ;;  %v3515_v0 = vadd.f32 %v3514_v11, %v9687_v63 }
 0x4c1   :  { %v3592_v10 = vadd.f32 %v3591_v50, %v3503_v26  ;;  %4065 = vmatmul.mubr.f32.vlgmr.msra.gmra.mxu1 %v3610_v6  ;;  %v3616_v42 = vmax.f32 %v3590_v15, 0.0 }
 0x4c2   :  { %v3595_v31 = vpop.f32.mrf.mxu1 }
 0x4c3   :  { %v3617_v39 = vmax.f32 %v3592_v10, 0.0  ;;  %v3596_v58 = vadd.f32 %v3595_v31, %v3507_v52 }
 0x4c4   :  { %v3597_v9 = vpop.f32.mrf.mxu1 }
 0x4c5   :  { %v3598_v17 = vadd.f32 %v3597_v9, %v3509_v19  ;;  %4070 = vmatprep.mubr.f32.mxu1 %v3617_v39  ;;  %v3622_v25 = vmax.f32 %v3596_v58, 0.0 }
 0x4c6   :  { %v3601_v36 = vpop.f32.mrf.mxu1  ;;  %4071 = vmatmul.mubr.f32.gmra.mxu1 %v3616_v42 }
 0x4c7   :  { %v3623_v51 = vmax.f32 %v3598_v17, 0.0  ;;  %v3602_v3 = vadd.f32 %v3601_v36, %v3513_v46 }
 0x4c8   :  { %v3603_v34 = vpop.f32.mrf.mxu1 }
 0x4c9   :  { %v3604_v20 = vadd.f32 %v3603_v34, %v3515_v0  ;;  %4076 = vmatprep.mubr.f32.mxu1 %v3623_v51  ;;  %v3628_v18 = vmax.f32 %v3602_v3, 0.0 }
 0x4ca   :  { %4077 = vmatmul.mubr.f32.gmra.mxu1 %v3622_v25 }
 0x4cb   :  { %v3629_v53 = vmax.f32 %v3604_v20, 0.0 }
 0x4cd   :  { %4082 = vmatprep.mubr.f32.mxu1 %v3629_v53 }
 0x4ce   :  { %4083 = vmatmul.mubr.f32.gmra.mxu1 %v3628_v18 }
 0x4fa   :  { %v3888_v47 = vpop.f32.mrf.mxu1 }
 0x4fc   :  { %v3890_v12 = vpop.f32.mrf.mxu1  ;;  %v3977_v63 = vpop.f32.mrf.mxu0 }
 0x4fd   :  { %v3978_v16 = vadd.f32 %v3977_v63, %v3888_v47 }
 0x4fe   :  { %v3894_v8 = vpop.f32.mrf.mxu1  ;;  %v3979_v32 = vpop.f32.mrf.mxu0 }
 0x4ff   :  { %v3980_v49 = vadd.f32 %v3979_v32, %v3890_v12 }
 0x500   :  { %v3896_v1 = vpop.f32.mrf.mxu1  ;;  %v3983_v7 = vpop.f32.mrf.mxu0 }
 0x501   :  { %v3984_v27 = vadd.f32 %v3983_v7, %v3894_v8 }
 0x502   :  { %v9926_v21 = vpop.f32.mrf.mxu1  ;;  %v3985_v55 = vpop.f32.mrf.mxu0 }
 0x503   :  { %v3986_v5 = vadd.f32 %v3985_v55, %v3896_v1 }
 0x504   :  { %v9928_v4 = vpop.f32.mrf.mxu1  ;;  %v3989_v60 = vpop.f32.mrf.mxu0 }
 0x505   :  { %v3990_v35 = vadd.f32 %v3989_v60, %v9926_v21 }
 0x506   :  { %v9930_v48 = vpop.f32.mrf.mxu1  ;;  %v3991_v23 = vpop.f32.mrf.mxu0 }
 0x507   :  { %v3992_v13 = vadd.f32 %v3991_v23, %v9928_v4 }
 0x508   :  { %v9932_v41 = vpop.f32.mrf.mxu1  ;;  %v3995_v36 = vpop.f32.mrf.mxu0 }
 0x509   :  { %v3996_v51 = vadd.f32 %v3995_v36, %v9930_v48 }
 0x50a   :  { %v3997_v20 = vpop.f32.mrf.mxu0 }
 0x50b   :  { %v3998_v47 = vadd.f32 %v3997_v20, %v9932_v41 }
 0x581   :  { %v4066_v40 = vpop.f32.mrf.mxu1 }
 0x582   :  { %v9934_v33 = vadd.f32 %v4066_v40, %v3978_v16 }
 0x583   :  { %v4068_v30 = vpop.f32.mrf.mxu1 }
 0x584   :  { %v9936_v24 = vadd.f32 %v4068_v30, %v3980_v49  ;;  %4387 = vrot.lane.b32.xlu0 %v9934_v33, %s7109_s5 }
 0x586   :  { %4389 = vrot.lane.b32.xlu1 %v9936_v24, %s7109_s5  ;;  %v4072_v56 = vpop.f32.mrf.mxu1 }
 0x587   :  { %v9988_v29 = vadd.f32 %v4072_v56, %v3984_v27  ;;  %v5179_v27 = vld [vmem:[%s10947_s6 + $0x8] sm:$0xff] }
 0x588   :  { %4209 = vrot.lane.b32.xlu0 %v9934_v33, %s7089_s12  ;;  %v4074_v28 = vpop.f32.mrf.mxu1  ;;  %5407 = vmatprep.mubr.f32.mxu0 %v5179_v27 }
 0x589   :  { %v9992_v45 = vadd.f32 %v4074_v28, %v3986_v5 }
 0x58a   :  { %4211 = vrot.lane.b32.xlu1 %v9936_v24, %s7089_s12  ;;  %v4078_v38 = vpop.f32.mrf.mxu1 }
 0x58b   :  { %v10046_v59 = vadd.f32 %v4078_v38, %v3990_v35 }
 0x58c   :  { %4342 = vrot.lane.b32.xlu0 %v9934_v33, %s7110_s26  ;;  %v4080_v2 = vpop.f32.mrf.mxu1 }
 0x58d   :  { %v10050_v43 = vadd.f32 %v4080_v2, %v3992_v13 }
 0x58e   :  { %4344 = vrot.lane.b32.xlu1 %v9936_v24, %s7110_s26  ;;  %v4084_v0 = vpop.f32.mrf.mxu1 }
 0x58f   :  { %v10159_v3 = vadd.f32 %v4084_v0, %v3996_v51 }
 0x590   :  { %4165 = vrot.lane.b32.xlu0 %v9934_v33, %s7090_s13  ;;  %v4086_v18 = vpop.f32.mrf.mxu1 }
 0x591   :  { %v10174_v8 = vadd.f32 %v4086_v18, %v3998_v47 }
 0x592   :  { %4167 = vrot.lane.b32.xlu1 %v9936_v24, %s7090_s13 }
 0x594   :  { %4297 = vrot.lane.b32.xlu0 %v9934_v33, %s7111_s27 }
 0x596   :  { %4299 = vrot.lane.b32.xlu1 %v9936_v24, %s7111_s27 }
 0x598   :  { %4121 = vrot.lane.b32.xlu0 %v9934_v33, %s7091_s14 }
 0x59a   :  { %4123 = vrot.lane.b32.xlu1 %v9936_v24, %s7091_s14 }
 0x59c   :  { %4253 = vrot.lane.b32.xlu0 %v9934_v33, %s7088_s30 }
 0x59e   :  { %4255 = vrot.lane.b32.xlu1 %v9936_v24, %s7088_s30 }
 0x5a0   :  { %4745 = vrot.lane.b32.xlu0 %v9934_v33, %s7112_s15 }
 0x5a2   :  { %4747 = vrot.lane.b32.xlu1 %v9936_v24, %s7112_s15 }
 0x5a4   :  { %4567 = vrot.lane.b32.xlu0 %v9934_v33, %s7113_s16 }
 0x5a6   :  { %4569 = vrot.lane.b32.xlu1 %v9936_v24, %s7113_s16 }
 0x5a8   :  { %5105 = vrot.lane.b32.xlu0 %v9934_v33, %s7114_s17 }
 0x5aa   :  { %5107 = vrot.lane.b32.xlu1 %v9936_v24, %s7114_s17 }
 0x5ac   :  { %4925 = vrot.lane.b32.xlu0 %v9934_v33, %s7115_s3 }
 0x5ae   :  { %4927 = vrot.lane.b32.xlu1 %v9936_v24, %s7115_s3 }
 0x5b0   :  { %4701 = vrot.lane.b32.xlu0 %v9934_v33, %s7086_s2 }
 0x5b2   :  { %4703 = vrot.lane.b32.xlu1 %v9936_v24, %s7086_s2 }
 0x5b4   :  { %4522 = vrot.lane.b32.xlu0 %v9934_v33, %s7116_s18 }
 0x5b6   :  { %4524 = vrot.lane.b32.xlu1 %v9936_v24, %s7116_s18 }
 0x5b8   :  { %4391 = vrot.lane.b32.xlu0 %v9988_v29, %s7109_s5 }
 0x5ba   :  { %4393 = vrot.lane.b32.xlu1 %v9992_v45, %s7109_s5 }
 0x5bc   :  { %4213 = vrot.lane.b32.xlu0 %v9988_v29, %s7089_s12 }
 0x5be   :  { %4215 = vrot.lane.b32.xlu1 %v9992_v45, %s7089_s12 }
 0x5c0   :  { %4346 = vrot.lane.b32.xlu0 %v9988_v29, %s7110_s26 }
 0x5c2   :  { %4348 = vrot.lane.b32.xlu1 %v9992_v45, %s7110_s26 }
 0x5c4   :  { %4169 = vrot.lane.b32.xlu0 %v9988_v29, %s7090_s13 }
 0x5c6   :  { %4171 = vrot.lane.b32.xlu1 %v9992_v45, %s7090_s13 }
 0x5c8   :  { %4301 = vrot.lane.b32.xlu0 %v9988_v29, %s7111_s27 }
 0x5ca   :  { %4303 = vrot.lane.b32.xlu1 %v9992_v45, %s7111_s27 }
 0x5cc   :  { %4125 = vrot.lane.b32.xlu0 %v9988_v29, %s7091_s14 }
 0x5ce   :  { %4127 = vrot.lane.b32.xlu1 %v9992_v45, %s7091_s14 }
 0x5d0   :  { %4257 = vrot.lane.b32.xlu0 %v9988_v29, %s7088_s30 }
 0x5d2   :  { %4259 = vrot.lane.b32.xlu1 %v9992_v45, %s7088_s30 }
 0x5d4   :  { %4749 = vrot.lane.b32.xlu0 %v9988_v29, %s7112_s15 }
 0x5d6   :  { %4751 = vrot.lane.b32.xlu1 %v9992_v45, %s7112_s15 }
 0x5d8   :  { %4571 = vrot.lane.b32.xlu0 %v9988_v29, %s7113_s16 }
 0x5da   :  { %4573 = vrot.lane.b32.xlu1 %v9992_v45, %s7113_s16 }
 0x5dc   :  { %5109 = vrot.lane.b32.xlu0 %v9988_v29, %s7114_s17 }
 0x5de   :  { %5111 = vrot.lane.b32.xlu1 %v9992_v45, %s7114_s17 }
 0x5e0   :  { %4929 = vrot.lane.b32.xlu0 %v9988_v29, %s7115_s3 }
 0x5e2   :  { %4931 = vrot.lane.b32.xlu1 %v9992_v45, %s7115_s3 }
 0x5e4   :  { %4705 = vrot.lane.b32.xlu0 %v9988_v29, %s7086_s2 }
 0x5e6   :  { %4707 = vrot.lane.b32.xlu1 %v9992_v45, %s7086_s2 }
 0x5e8   :  { %4526 = vrot.lane.b32.xlu0 %v9988_v29, %s7116_s18 }
 0x5ea   :  { %4528 = vrot.lane.b32.xlu1 %v9992_v45, %s7116_s18 }
 0x5ec   :  { %4395 = vrot.lane.b32.xlu0 %v10046_v59, %s7109_s5 }
 0x5ee   :  { %4397 = vrot.lane.b32.xlu1 %v10050_v43, %s7109_s5 }
 0x5f0   :  { %4217 = vrot.lane.b32.xlu0 %v10046_v59, %s7089_s12 }
 0x5f2   :  { %4219 = vrot.lane.b32.xlu1 %v10050_v43, %s7089_s12 }
 0x5f4   :  { %4350 = vrot.lane.b32.xlu0 %v10046_v59, %s7110_s26 }
 0x5f6   :  { %4352 = vrot.lane.b32.xlu1 %v10050_v43, %s7110_s26  ;;  %v10064_v44 = vpop.permute.xlu0 %4387 }
 0x5f8   :  { %v10066_v22 = vpop.permute.xlu1 %4389  ;;  %4173 = vrot.lane.b32.xlu0 %v10046_v59, %s7090_s13 }
 0x5fa   :  { %4175 = vrot.lane.b32.xlu1 %v10050_v43, %s7090_s13  ;;  %v10072_v62 = vpop.permute.xlu0 %4209 }
 0x5fc   :  { %v10074_v54 = vpop.permute.xlu1 %4211  ;;  %4305 = vrot.lane.b32.xlu0 %v10046_v59, %s7111_s27 }
 0x5fe   :  { %4307 = vrot.lane.b32.xlu1 %v10050_v43, %s7111_s27  ;;  %v10080_v61 = vpop.permute.xlu0 %4342 }
 0x600   :  { %v10082_v14 = vpop.permute.xlu1 %4344  ;;  %4129 = vrot.lane.b32.xlu0 %v10046_v59, %s7091_s14 }
 0x602   :  { %4131 = vrot.lane.b32.xlu1 %v10050_v43, %s7091_s14  ;;  %v10088_v37 = vpop.permute.xlu0 %4165 }
 0x604   :  { %v10090_v26 = vpop.permute.xlu1 %4167  ;;  %4261 = vrot.lane.b32.xlu0 %v10046_v59, %s7088_s30 }
 0x606   :  { %4263 = vrot.lane.b32.xlu1 %v10050_v43, %s7088_s30  ;;  %v10096_v6 = vpop.permute.xlu0 %4297 }
 0x608   :  { %v10098_v57 = vpop.permute.xlu1 %4299  ;;  %4753 = vrot.lane.b32.xlu0 %v10046_v59, %s7112_s15 }
 0x60a   :  { %4755 = vrot.lane.b32.xlu1 %v10050_v43, %s7112_s15  ;;  %v10104_v15 = vpop.permute.xlu0 %4121 }
 0x60c   :  { %v10106_v50 = vpop.permute.xlu1 %4123  ;;  %4575 = vrot.lane.b32.xlu0 %v10046_v59, %s7113_s16 }
 0x60e   :  { %4577 = vrot.lane.b32.xlu1 %v10050_v43, %s7113_s16  ;;  %v10112_v10 = vpop.permute.xlu0 %4253 }
 0x610   :  { %v10114_v52 = vpop.permute.xlu1 %4255  ;;  %5113 = vrot.lane.b32.xlu0 %v10046_v59, %s7114_s17 }
 0x612   :  { %5115 = vrot.lane.b32.xlu1 %v10050_v43, %s7114_s17  ;;  %v10120_v31 = vpop.permute.xlu0 %4745 }
 0x613   :  { %11218 = vst [vmem:[#allocation44_spill] sm:$0xff] %v10120_v31 }
 0x614   :  { %v10122_v19 = vpop.permute.xlu1 %4747  ;;  %4933 = vrot.lane.b32.xlu0 %v10046_v59, %s7115_s3 }
 0x615   :  { %11219 = vst [vmem:[#allocation18_spill] sm:$0xff] %v10122_v19 }
 0x616   :  { %4935 = vrot.lane.b32.xlu1 %v10050_v43, %s7115_s3  ;;  %v10128_v39 = vpop.permute.xlu0 %4567 }
 0x617   :  { %11220 = vst [vmem:[#allocation31_spill] sm:$0xff] %v10128_v39 }
 0x618   :  { %v10130_v42 = vpop.permute.xlu1 %4569  ;;  %4709 = vrot.lane.b32.xlu0 %v10046_v59, %s7086_s2 }
 0x619   :  { %11221 = vst [vmem:[#allocation19_spill] sm:$0xff] %v10130_v42 }
 0x61a   :  { %4711 = vrot.lane.b32.xlu1 %v10050_v43, %s7086_s2  ;;  %v10136_v11 = vpop.permute.xlu0 %5105 }
 0x61b   :  { %11222 = vst [vmem:[#allocation33_spill] sm:$0xff] %v10136_v11 }
 0x61c   :  { %v10138_v58 = vpop.permute.xlu1 %5107  ;;  %4530 = vrot.lane.b32.xlu0 %v10046_v59, %s7116_s18 }
 0x61d   :  { %11223 = vst [vmem:[#allocation12_spill] sm:$0xff] %v10138_v58 }
 0x61e   :  { %4532 = vrot.lane.b32.xlu1 %v10050_v43, %s7116_s18  ;;  %v10144_v9 = vpop.permute.xlu0 %4925 }
 0x61f   :  { %11224 = vst [vmem:[#allocation20_spill] sm:$0xff] %v10144_v9 }
 0x620   :  { %v10146_v17 = vpop.permute.xlu1 %4927  ;;  %5068 = vrot.lane.b32.xlu0 %v10046_v59, %s7117_s19 }
 0x621   :  { %11225 = vst [vmem:[#allocation45_spill] sm:$0xff] %v10146_v17 }
 0x622   :  { %5070 = vrot.lane.b32.xlu1 %v10050_v43, %s7117_s19  ;;  %v10152_v46 = vpop.permute.xlu0 %4701 }
 0x623   :  { %11226 = vst [vmem:[#allocation47_spill] sm:$0xff] %v10152_v46 }
 0x624   :  { %v10155_v25 = vpop.permute.xlu1 %4703  ;;  %4888 = vrot.lane.b32.xlu0 %v10046_v59, %s7118_s25 }
 0x625   :  { %11227 = vst [vmem:[#allocation48_spill] sm:$0xff] %v10155_v25 }
 0x626   :  { %4890 = vrot.lane.b32.xlu1 %v10050_v43, %s7118_s25  ;;  %v10163_v34 = vpop.permute.xlu0 %4522 }
 0x627   :  { %11228 = vst [vmem:[#allocation21_spill] sm:$0xff] %v10163_v34 }
 0x628   :  { %v10165_v53 = vpop.permute.xlu1 %4524  ;;  %4399 = vrot.lane.b32.xlu0 %v10159_v3, %s7109_s5 }
 0x629   :  { %11229 = vst [vmem:[#allocation34_spill] sm:$0xff] %v10165_v53 }
 0x62a   :  { %5066 = vrot.lane.b32.xlu1 %v9992_v45, %s7117_s19  ;;  %v10172_v12 = vpop.permute.xlu0 %4391 }
 0x62c   :  { %v10176_v1 = vpop.permute.xlu1 %4393  ;;  %4221 = vrot.lane.b32.xlu0 %v10159_v3, %s7089_s12 }
 0x62e   :  { %v10180_v21 = vpop.permute.xlu0 %4213  ;;  %4401 = vrot.lane.b32.xlu1 %v10174_v8, %s7109_s5 }
 0x630   :  { %v10184_v4 = vpop.permute.xlu1 %4215  ;;  %4354 = vrot.lane.b32.xlu0 %v10159_v3, %s7110_s26 }
 0x632   :  { %v10188_v63 = vpop.permute.xlu0 %4346  ;;  %4223 = vrot.lane.b32.xlu1 %v10174_v8, %s7089_s12 }
 0x634   :  { %v10192_v48 = vpop.permute.xlu1 %4348  ;;  %4177 = vrot.lane.b32.xlu0 %v10159_v3, %s7090_s13 }
 0x636   :  { %v10196_v32 = vpop.permute.xlu0 %4169  ;;  %4356 = vrot.lane.b32.xlu1 %v10174_v8, %s7110_s26 }
 0x638   :  { %v10200_v41 = vpop.permute.xlu1 %4171  ;;  %4309 = vrot.lane.b32.xlu0 %v10159_v3, %s7111_s27 }
 0x63a   :  { %v10204_v16 = vpop.permute.xlu0 %4301  ;;  %4179 = vrot.lane.b32.xlu1 %v10174_v8, %s7090_s13 }
 0x63c   :  { %v10208_v40 = vpop.permute.xlu1 %4303  ;;  %4133 = vrot.lane.b32.xlu0 %v10159_v3, %s7091_s14 }
 0x63e   :  { %v10212_v49 = vpop.permute.xlu0 %4125  ;;  %4311 = vrot.lane.b32.xlu1 %v10174_v8, %s7111_s27 }
 0x640   :  { %v10216_v30 = vpop.permute.xlu1 %4127  ;;  %4265 = vrot.lane.b32.xlu0 %v10159_v3, %s7088_s30 }
 0x642   :  { %v10220_v7 = vpop.permute.xlu0 %4257  ;;  %4135 = vrot.lane.b32.xlu1 %v10174_v8, %s7091_s14  ;;  %s7119_s14 = smov 113  }
 0x644   :  { %v10224_v56 = vpop.permute.xlu1 %4259  ;;  %4757 = vrot.lane.b32.xlu0 %v10159_v3, %s7112_s15 }
 0x646   :  { %v10231_v55 = vpop.permute.xlu0 %4749  ;;  %4267 = vrot.lane.b32.xlu1 %v10174_v8, %s7088_s30 }
 0x648   :  { %v10235_v28 = vpop.permute.xlu1 %4751  ;;  %4579 = vrot.lane.b32.xlu0 %v10159_v3, %s7113_s16 }
 0x64a   :  { %v10239_v5 = vpop.permute.xlu0 %4571  ;;  %4759 = vrot.lane.b32.xlu1 %v10174_v8, %s7112_s15 }
 0x64b   :  { %11230 = vst [vmem:[#allocation22_spill] sm:$0xff] %v10239_v5 }
 0x64c   :  { %v10243_v60 = vpop.permute.xlu1 %4573  ;;  %5117 = vrot.lane.b32.xlu0 %v10159_v3, %s7114_s17 }
 0x64d   :  { %11231 = vst [vmem:[#allocation35_spill] sm:$0xff] %v10243_v60 }
 0x64e   :  { %v10247_v38 = vpop.permute.xlu0 %5109  ;;  %4581 = vrot.lane.b32.xlu1 %v10174_v8, %s7113_s16 }
 0x64f   :  { %11232 = vst [vmem:[#allocation13_spill] sm:$0xff] %v10247_v38 }
 0x650   :  { %v10251_v23 = vpop.permute.xlu1 %5111  ;;  %4937 = vrot.lane.b32.xlu0 %v10159_v3, %s7115_s3 }
 0x651   :  { %11233 = vst [vmem:[#allocation23_spill] sm:$0xff] %v10251_v23 }
 0x652   :  { %v10255_v35 = vpop.permute.xlu0 %4929  ;;  %5119 = vrot.lane.b32.xlu1 %v10174_v8, %s7114_s17  ;;  %s7128_s17 = smov 120  }
 0x653   :  { %11234 = vst [vmem:[#allocation50_spill] sm:$0xff] %v10255_v35 }
 0x654   :  { %v10259_v2 = vpop.permute.xlu1 %4931  ;;  %4713 = vrot.lane.b32.xlu0 %v10159_v3, %s7086_s2 }
 0x655   :  { %11235 = vst [vmem:[#allocation51_spill] sm:$0xff] %v10259_v2 }
 0x656   :  { %v10263_v13 = vpop.permute.xlu0 %4705  ;;  %4939 = vrot.lane.b32.xlu1 %v10174_v8, %s7115_s3  ;;  %s7124_s3 = smov 84  }
 0x657   :  { %11236 = vst [vmem:[#allocation24_spill] sm:$0xff] %v10263_v13 }
 0x658   :  { %v10267_v36 = vpop.permute.xlu1 %4707  ;;  %4534 = vrot.lane.b32.xlu0 %v10159_v3, %s7116_s18 }
 0x659   :  { %11237 = vst [vmem:[#allocation36_spill] sm:$0xff] %v10267_v36 }
 0x65a   :  { %v10271_v0 = vpop.permute.xlu0 %4526  ;;  %4715 = vrot.lane.b32.xlu1 %v10174_v8, %s7086_s2  ;;  %s11240_s2 = smov 103  }
 0x65b   :  { %11238 = vst [vmem:[#allocation25_spill] sm:$0xff] %v10271_v0 }
 0x65c   :  { %v10275_v51 = vpop.permute.xlu1 %4528  ;;  %5072 = vrot.lane.b32.xlu0 %v10159_v3, %s7117_s19 }
 0x65d   :  { %11239 = vst [vmem:[#allocation37_spill] sm:$0xff] %v10275_v51 }
 0x65e   :  { %v10279_v20 = vpop.permute.xlu0 %4395  ;;  %4536 = vrot.lane.b32.xlu1 %v10174_v8, %s7116_s18 }
 0x660   :  { %v10283_v18 = vpop.permute.xlu1 %4397  ;;  %4892 = vrot.lane.b32.xlu0 %v10159_v3, %s7118_s25 }
 0x662   :  { %v10287_v47 = vpop.permute.xlu0 %4217  ;;  %5074 = vrot.lane.b32.xlu1 %v10174_v8, %s7117_s19 }
 0x664   :  { %v10291_v27 = vpop.permute.xlu1 %4219  ;;  %4669 = vrot.lane.b32.xlu0 %v10159_v3, %s11240_s2 }
 0x666   :  { %v10295_v34 = vpop.permute.xlu0 %4350  ;;  %4894 = vrot.lane.b32.xlu1 %v10174_v8, %s7118_s25 }
 0x668   :  { %v10299_v53 = vpop.permute.xlu1 %4352  ;;  %4489 = vrot.lane.b32.xlu0 %v10159_v3, %s7119_s14 }
 0x66a   :  { %v10303_v46 = vpop.permute.xlu0 %4173  ;;  %4671 = vrot.lane.b32.xlu1 %v10174_v8, %s11240_s2 }
 0x66c   :  { %v10307_v25 = vpop.permute.xlu1 %4175  ;;  %5064 = vrot.lane.b32.xlu0 %v9988_v29, %s7117_s19 }
 0x66e   :  { %v10311_v0 = vpop.permute.xlu0 %4305  ;;  %4491 = vrot.lane.b32.xlu1 %v10174_v8, %s7119_s14 }
 0x670   :  { %v10315_v51 = vpop.permute.xlu1 %4307  ;;  %4665 = vrot.lane.b32.xlu0 %v10046_v59, %s11240_s2 }
 0x672   :  { %v10319_v13 = vpop.permute.xlu0 %4129  ;;  %4667 = vrot.lane.b32.xlu1 %v10050_v43, %s11240_s2 }
 0x674   :  { %v10323_v36 = vpop.permute.xlu1 %4131  ;;  %4884 = vrot.lane.b32.xlu0 %v9988_v29, %s7118_s25 }
 0x676   :  { %v10327_v9 = vpop.permute.xlu0 %4261  ;;  %4886 = vrot.lane.b32.xlu1 %v9992_v45, %s7118_s25 }
 0x678   :  { %v10331_v17 = vpop.permute.xlu1 %4263  ;;  %4485 = vrot.lane.b32.xlu0 %v10046_v59, %s7119_s14 }
 0x67a   :  { %v10335_v11 = vpop.permute.xlu0 %4753  ;;  %4487 = vrot.lane.b32.xlu1 %v10050_v43, %s7119_s14 }
 0x67c   :  { %v10339_v58 = vpop.permute.xlu1 %4755  ;;  %5060 = vrot.lane.b32.xlu0 %v9934_v33, %s7117_s19 }
 0x67e   :  { %v10343_v35 = vpop.permute.xlu0 %4575  ;;  %5062 = vrot.lane.b32.xlu1 %v9936_v24, %s7117_s19 }
 0x680   :  { %v10347_v2 = vpop.permute.xlu1 %4577  ;;  %4661 = vrot.lane.b32.xlu0 %v9988_v29, %s11240_s2 }
 0x682   :  { %v10351_v38 = vpop.permute.xlu0 %5113  ;;  %4663 = vrot.lane.b32.xlu1 %v9992_v45, %s11240_s2 }
 0x683   :  { %11241 = vst [vmem:[#allocation15_spill] sm:$0xff] %v10351_v38 }
 0x684   :  { %v10355_v23 = vpop.permute.xlu1 %5115  ;;  %4880 = vrot.lane.b32.xlu0 %v9934_v33, %s7118_s25 }
 0x685   :  { %11242 = vst [vmem:[#allocation26_spill] sm:$0xff] %v10355_v23 }
 0x686   :  { %v10359_v39 = vpop.permute.xlu0 %4933  ;;  %4882 = vrot.lane.b32.xlu1 %v9936_v24, %s7118_s25 }
 0x687   :  { %11243 = vst [vmem:[#allocation52_spill] sm:$0xff] %v10359_v39 }
 0x688   :  { %v10363_v42 = vpop.permute.xlu1 %4935  ;;  %4481 = vrot.lane.b32.xlu0 %v9988_v29, %s7119_s14 }
 0x689   :  { %11244 = vst [vmem:[#allocation28_spill] sm:$0xff] %v10363_v42 }
 0x68a   :  { %v10367_v31 = vpop.permute.xlu0 %4709  ;;  %4483 = vrot.lane.b32.xlu1 %v9992_v45, %s7119_s14 }
 0x68b   :  { %11245 = vst [vmem:[#allocation38_spill] sm:$0xff] %v10367_v31 }
 0x68c   :  { %v10371_v38 = vpop.permute.xlu1 %4711  ;;  %5027 = vrot.lane.b32.xlu0 %v10159_v3, %s7120_s28 }
 0x68d   :  { %11246 = vst [vmem:[#allocation30_spill] sm:$0xff] %v10371_v38 }
 0x68e   :  { %v10375_v39 = vpop.permute.xlu0 %4530  ;;  %5029 = vrot.lane.b32.xlu1 %v10174_v8, %s7120_s28 }
 0x68f   :  { %11247 = vst [vmem:[#allocation39_spill] sm:$0xff] %v10375_v39 }
 0x690   :  { %v10379_v42 = vpop.permute.xlu1 %4532  ;;  %4657 = vrot.lane.b32.xlu0 %v9934_v33, %s11240_s2 }
 0x691   :  { %11248 = vst [vmem:[#allocation17_spill] sm:$0xff] %v10379_v42 }
 0x692   :  { %v10383_v31 = vpop.permute.xlu0 %5068  ;;  %4659 = vrot.lane.b32.xlu1 %v9936_v24, %s11240_s2 }
 0x693   :  { %11249 = vst [vmem:[#allocation32_spill] sm:$0xff] %v10383_v31 }
 0x694   :  { %v10387_v38 = vpop.permute.xlu1 %5070  ;;  %4847 = vrot.lane.b32.xlu0 %v10159_v3, %s7121_s20 }
 0x695   :  { %11250 = vst [vmem:[#allocation54_spill] sm:$0xff] %v10387_v38 }
 0x696   :  { %v10391_v39 = vpop.permute.xlu0 %4888  ;;  %4849 = vrot.lane.b32.xlu1 %v10174_v8, %s7121_s20 }
 0x697   :  { %11251 = vst [vmem:[#allocation40_spill] sm:$0xff] %v10391_v39 }
 0x698   :  { %v10395_v42 = vpop.permute.xlu1 %4890  ;;  %4477 = vrot.lane.b32.xlu0 %v9934_v33, %s7119_s14 }
 0x699   :  { %11252 = vst [vmem:[#allocation41_spill] sm:$0xff] %v10395_v42 }
 0x69a   :  { %v4400_v31 = vpop.permute.xlu0 %4399  ;;  %4479 = vrot.lane.b32.xlu1 %v9936_v24, %s7119_s14  ;;  %s7125_s14 = smov 94  }
 0x69c   :  { %v10401_v23 = vpop.permute.xlu1 %5066  ;;  %5023 = vrot.lane.b32.xlu0 %v10046_v59, %s7120_s28 }
 0x69d   :  { %11253 = vst [vmem:[#allocation6_spill] sm:$0xff] %v10401_v23 }
 0x69e   :  { %v4222_v38 = vpop.permute.xlu0 %4221  ;;  %5025 = vrot.lane.b32.xlu1 %v10050_v43, %s7120_s28 }
 0x6a0   :  { %4624 = vrot.lane.b32.xlu0 %v10159_v3, %s7122_s21  ;;  %v4402_v39 = vpop.permute.xlu1 %4401 }
 0x6a1   :  { %v4407_v42 = vsel %vm4403_vm0, %v4400_v31, %v4402_v39  ;;  %v4406_v31 = vsel %vm4403_vm0, %v10279_v20, %v10283_v18  ;;  %v4227_v39 = vsel %vm729_vm6, %v10287_v47, %v10291_v27  ;;  %v4404_v20 = vsel %vm4403_vm0, %v10064_v44, %v10066_v22  ;;  %v5185_v47 = vld [vmem:[%s10947_s6 + $0x38] sm:$0xff] }
 0x6a2   :  { %v4355_v19 = vpop.permute.xlu0 %4354  ;;  %4626 = vrot.lane.b32.xlu1 %v10174_v8, %s7122_s21  ;;  %6647 = vmatprep.subr.mxu0 %v4407_v42  ;;  %v4225_v18 = vsel %vm729_vm6, %v10072_v62, %v10074_v54  ;;  %v4361_v44 = vsel %vm4358_vm1, %v10295_v34, %v10299_v53  ;;  %v4360_v54 = vsel %vm4358_vm1, %v10188_v63, %v10192_v48 }
 0x6a3   :  { %v4586_v27 = vsel %vm4583_vm12, %v10343_v35, %v10347_v2  ;;  %v11264_v35 = vld [vmem:[#allocation18_spill] sm:$0xff]  ;;  %v11265_v2 = vld [vmem:[#allocation44_spill] sm:$0xff] }
 0x6a4   :  { %4843 = vrot.lane.b32.xlu0 %v10046_v59, %s7121_s20  ;;  %v4224_v23 = vpop.permute.xlu1 %4223 }
 0x6a5   :  { %v4228_v5 = vsel %vm729_vm6, %v4222_v38, %v4224_v23  ;;  %v4405_v38 = vsel %vm4403_vm0, %v10172_v12, %v10176_v1  ;;  %vm5121_vm0 = vcmask 662528  }
 0x6a6   :  { %v4178_v60 = vpop.permute.xlu0 %4177  ;;  %4845 = vrot.lane.b32.xlu1 %v10050_v43, %s7121_s20  ;;  %6648 = vmatpush3.msra.mxu0 %v4228_v5  ;;  %v4226_v5 = vsel %vm729_vm6, %v10180_v21, %v10184_v4  ;;  %vm11255_vm6 = vmmov %vm11254_vm7 }
 0x6a7   :  { %6649 = vmatprep.subr.mxu0 %v4406_v31  ;;  %v4183_v22 = vsel %vm11255_vm6, %v10303_v46, %v10307_v25  ;;  %vm11256_vm8 = vmmov %vm11255_vm6  ;;  %v4359_v46 = vsel %vm4358_vm1, %v10080_v61, %v10082_v14  ;;  %v4316_v61 = vsel %vm4313_vm15, %v10311_v0, %v10315_v51  ;;  %v4139_v14 = vsel %vm11259_vm11, %v10319_v13, %v10323_v36 }
 0x6a8   :  { %4444 = vrot.lane.b32.xlu0 %v10159_v3, %s7123_s24  ;;  %6650 = vmatpush3.msra.mxu0 %v4227_v39  ;;  %v4357_v42 = vpop.permute.xlu1 %4356  ;;  %vm11257_vm14 = vmmov %vm11255_vm6  ;;  %v4314_v13 = vsel %vm4313_vm15, %v10096_v6, %v10098_v57  ;;  %v4137_v36 = vsel %vm11261_vm13, %v10104_v15, %v10106_v50  ;;  %v4271_v6 = vsel %vm822_vm5, %v10327_v9, %v10331_v17  ;;  %v5178_v17 = vld [vmem:[%s10947_s6] sm:$0xff]  ;;  %vm4896_vm6 = vcmask 752640  }
 0x6a9   :  { %6651 = vmatprep.subr.mxu0 %v4405_v38  ;;  %v4362_v1 = vsel %vm4358_vm1, %v4355_v19, %v4357_v42  ;;  %v4182_v19 = vsel %vm11256_vm8, %v10196_v32, %v10200_v41  ;;  %v4181_v25 = vsel %vm11257_vm14, %v10088_v37, %v10090_v26  ;;  %v4315_v26 = vsel %vm4313_vm15, %v10204_v16, %v10208_v40  ;;  %v11263_v42 = vld [vmem:[#allocation22_spill] sm:$0xff] }
 0x6aa   :  { %v4310_v23 = vpop.permute.xlu0 %4309  ;;  %4446 = vrot.lane.b32.xlu1 %v10174_v8, %s7123_s24  ;;  %6652 = vmatpush3.msra.mxu0 %v4226_v5  ;;  %v4138_v41 = vsel %vm11260_vm10, %v10212_v49, %v10216_v30  ;;  %v4270_v15 = vsel %vm822_vm5, %v10220_v7, %v10224_v56  ;;  %v4269_v9 = vsel %vm822_vm5, %v10112_v10, %v10114_v52  ;;  %v5186_v52 = vld [vmem:[%s10947_s6 + $0x40] sm:$0xff]  ;;  %vm4538_vm1 = vcmask 867328  }
 0x6ab   :  { %6653 = vmatprep.subr.mxu0 %v4404_v20  ;;  %v4764_v51 = vsel %vm4761_vm2, %v10335_v11, %v10339_v58  ;;  %v4763_v11 = vsel %vm4761_vm2, %v10231_v55, %v10235_v28  ;;  %v11262_v58 = vld [vmem:[#allocation35_spill] sm:$0xff]  ;;  %v5193_v20 = vld [vmem:[%s10947_s6 + $0x78] sm:$0xff]  ;;  %v11266_v55 = vld [vmem:[#allocation26_spill] sm:$0xff]  ;;  %vm5031_vm8 = vcmask 678912   ;;  %vm4851_vm14 = vcmask 760832  }
 0x6ac   :  { %5019 = vrot.lane.b32.xlu0 %v9988_v29, %s7120_s28  ;;  %6654 = vmatpush3.msra.mxu0 %v4225_v18  ;;  %v4180_v12 = vpop.permute.xlu1 %4179  ;;  %v4585_v38 = vsel %vm4583_vm12, %v11263_v42, %v11262_v58  ;;  %v11267_v28 = vld [vmem:[#allocation15_spill] sm:$0xff]  ;;  %vm4806_vm11 = vcmask 769024   ;;  %vm5330_vm10 = vcmask 261120   ;;  %vm11297_vm13 = vcmask 654336  }
 0x6ad   :  { %v4184_v21 = vsel %vm11254_vm7, %v4178_v60, %v4180_v12  ;;  %6655 = vmatprep.subr.mxu0 %v4362_v1  ;;  %v5124_v18 = vsel %vm5121_vm0, %v11267_v28, %v11266_v55  ;;  %v5192_v1 = vld [vmem:[%s10947_s6 + $0x70] sm:$0xff]  ;;  %vm5076_vm7 = vcmask 670720   ;;  %v11289_v58 = vld [vmem:[#allocation47_spill] sm:$0xff] }
 0x6ae   :  { %v4134_v4 = vpop.permute.xlu0 %4133  ;;  %5021 = vrot.lane.b32.xlu1 %v9992_v45, %s7120_s28  ;;  %6656 = vmatpush3.msra.mxu0 %v4184_v21  ;;  %v11268_v21 = vld [vmem:[#allocation19_spill] sm:$0xff]  ;;  %v11293_v55 = vld [vmem:[#allocation32_spill] sm:$0xff] }
 0x6af   :  { %6657 = vmatprep.subr.mxu0 %v4361_v44 }
 0x6b0   :  { %4620 = vrot.lane.b32.xlu0 %v10046_v59, %s7122_s21  ;;  %6658 = vmatpush3.msra.mxu0 %v4183_v22  ;;  %v4312_v62 = vpop.permute.xlu1 %4311  ;;  %v11270_v22 = vld [vmem:[#allocation28_spill] sm:$0xff] }
 0x6b1   :  { %6659 = vmatprep.subr.mxu0 %v4360_v54  ;;  %v4317_v63 = vsel %vm4313_vm15, %v4310_v23, %v4312_v62  ;;  %v4762_v23 = vsel %vm4761_vm2, %v11265_v2, %v11264_v35  ;;  %v11271_v62 = vld [vmem:[#allocation52_spill] sm:$0xff]  ;;  %v11291_v35 = vld [vmem:[#allocation21_spill] sm:$0xff]  ;;  %vm4448_vm15 = vcmask 932864  }
 0x6b2   :  { %v4266_v34 = vpop.permute.xlu0 %4265  ;;  %4622 = vrot.lane.b32.xlu1 %v10050_v43, %s7122_s21  ;;  %6660 = vmatpush3.msra.mxu0 %v4182_v19 }
 0x6b3   :  { %6661 = vmatprep.subr.mxu0 %v4359_v46  ;;  %v11272_v46 = vld [vmem:[#allocation23_spill] sm:$0xff] }
 0x6b4   :  { %4839 = vrot.lane.b32.xlu0 %v9988_v29, %s7121_s20  ;;  %6662 = vmatpush3.msra.mxu0 %v4181_v25  ;;  %v4136_v53 = vpop.permute.xlu1 %4135  ;;  %v11273_v25 = vld [vmem:[#allocation13_spill] sm:$0xff] }
 0x6b5   :  { %v4140_v48 = vsel %vm11258_vm9, %v4134_v4, %v4136_v53  ;;  %6663 = vmatprep.subr.mxu0 %v4317_v63  ;;  %v11269_v4 = vld [vmem:[#allocation31_spill] sm:$0xff]  ;;  %v5123_v53 = vsel %vm5121_vm0, %v11273_v25, %v11272_v46  ;;  %vm4986_vm9 = vcmask 687104  }
 0x6b6   :  { %v4758_v32 = vpop.permute.xlu0 %4757  ;;  %4841 = vrot.lane.b32.xlu1 %v9992_v45, %s7121_s20  ;;  %6664 = vmatpush3.msra.mxu0 %v4140_v48  ;;  %v4584_v44 = vsel %vm4583_vm12, %v11269_v4, %v11268_v21  ;;  %v11274_v63 = vld [vmem:[#allocation51_spill] sm:$0xff]  ;;  %v11275_v48 = vld [vmem:[#allocation50_spill] sm:$0xff] }
 0x6b7   :  { %6665 = vmatprep.subr.mxu0 %v4316_v61  ;;  %v5200_v61 = vld [vmem:[%s10947_s6 + $0xb0] sm:$0xff] }
 0x6b8   :  { %4440 = vrot.lane.b32.xlu0 %v10046_v59, %s7123_s24  ;;  %6666 = vmatpush3.msra.mxu0 %v4139_v14  ;;  %v4268_v37 = vpop.permute.xlu1 %4267 }
 0x6b9   :  { %6667 = vmatprep.subr.mxu0 %v4315_v26  ;;  %v4272_v40 = vsel %vm822_vm5, %v4266_v34, %v4268_v37  ;;  %vm4941_vm5 = vcmask 744448   ;;  %v11276_v37 = vld [vmem:[#allocation12_spill] sm:$0xff]  ;;  %v11277_v26 = vld [vmem:[#allocation33_spill] sm:$0xff] }
 0x6ba   :  { %v4580_v60 = vpop.permute.xlu0 %4579  ;;  %4442 = vrot.lane.b32.xlu1 %v10050_v43, %s7123_s24  ;;  %6668 = vmatpush3.msra.mxu0 %v4138_v41  ;;  %v4944_v54 = vsel %vm4941_vm5, %v11271_v62, %v11270_v22  ;;  %v5122_v41 = vsel %vm5121_vm0, %v11277_v26, %v11276_v37  ;;  %v11296_v22 = vld [vmem:[#allocation6_spill] sm:$0xff] }
 0x6bb   :  { %6669 = vmatprep.subr.mxu0 %v4314_v13  ;;  %v11278_v13 = vld [vmem:[#allocation45_spill] sm:$0xff] }
 0x6bc   :  { %5015 = vrot.lane.b32.xlu0 %v9934_v33, %s7120_s28  ;;  %6670 = vmatpush3.msra.mxu0 %v4137_v36  ;;  %v4760_v16 = vpop.permute.xlu1 %4759  ;;  %v11279_v36 = vld [vmem:[#allocation20_spill] sm:$0xff] }
 0x6bd   :  { %6671 = vmatprep.subr.mxu0 %v4272_v40  ;;  %v4765_v7 = vsel %vm4761_vm2, %v4758_v32, %v4760_v16  ;;  %v4943_v32 = vsel %vm4941_vm5, %v11275_v48, %v11274_v63  ;;  %v4942_v16 = vsel %vm4941_vm5, %v11279_v36, %v11278_v13  ;;  %v5183_v63 = vld [vmem:[%s10947_s6 + $0x28] sm:$0xff]  ;;  %vm11298_vm2 = vmmov %vm11297_vm13 }
 0x6be   :  { %v5118_v49 = vpop.permute.xlu0 %5117  ;;  %5017 = vrot.lane.b32.xlu1 %v9936_v24, %s7120_s28  ;;  %6672 = vmatpush3.msra.mxu0 %v10159_v3 }
 0x6bf   :  { %6673 = vmatprep.subr.mxu0 %v4271_v6  ;;  %v5181_v6 = vld [vmem:[%s10947_s6 + $0x18] sm:$0xff]  ;;  %5577 = vmatprep.mubr.f32.mxu1 %v5183_v63 }
 0x6c0   :  { %4616 = vrot.lane.b32.xlu0 %v9988_v29, %s7122_s21  ;;  %6674 = vmatpush3.msra.mxu0 %v10046_v59  ;;  %v4582_v57 = vpop.permute.xlu1 %4581 }
 0x6c1   :  { %6675 = vmatprep.subr.mxu0 %v4270_v15  ;;  %v4587_v56 = vsel %vm4583_vm12, %v4580_v60, %v4582_v57  ;;  %v5199_v60 = vld [vmem:[%s10947_s6 + $0xa8] sm:$0xff]  ;;  %v11280_v15 = vld [vmem:[#allocation30_spill] sm:$0xff]  ;;  %vm11299_vm12 = vmmov %vm11298_vm2 }
 0x6c2   :  { %v4938_v50 = vpop.permute.xlu0 %4937  ;;  %4618 = vrot.lane.b32.xlu1 %v9992_v45, %s7122_s21  ;;  %6676 = vmatpush3.msra.mxu0 %v9988_v29 }
 0x6c3   :  { %6677 = vmatprep.subr.mxu0 %v4269_v9 }
 0x6c4   :  { %4835 = vrot.lane.b32.xlu0 %v9934_v33, %s7121_s20  ;;  %6678 = vmatpush3.msra.mxu0 %v9934_v33  ;;  %v5120_v30 = vpop.permute.xlu1 %5119 }
 0x6c5   :  { %5408 = vmatmul.mubr.f32.vlgmr.msra.gmra.mxu0 %v5178_v17  ;;  %6691 = vmatprep.subr.mxu0 %v4765_v7  ;;  %v5125_v10 = vsel %vm5121_vm0, %v5118_v49, %v5120_v30  ;;  %v11282_v30 = vld [vmem:[#allocation17_spill] sm:$0xff]  ;;  %v11283_v7 = vld [vmem:[#allocation39_spill] sm:$0xff]  ;;  %vm11300_vm0 = vmmov %vm11298_vm2 }
 0x6c6   :  { %v4714_v0 = vpop.permute.xlu0 %4713  ;;  %4837 = vrot.lane.b32.xlu1 %v9936_v24, %s7121_s20  ;;  %6692 = vmatpush3.msra.mxu0 %v4587_v56  ;;  %v4541_v56 = vsel %vm4538_vm1, %v11283_v7, %v11282_v30 }
 0x6c7   :  { %6735 = vmatprep.subr.mxu1 %v5125_v10  ;;  %6693 = vmatprep.subr.mxu0 %v4764_v51 }
 0x6c8   :  { %4436 = vrot.lane.b32.xlu0 %v9988_v29, %s7123_s24  ;;  %5412 = vmatprep.mubr.f32.mxu0 %v5186_v52  ;;  %v4940_v31 = vpop.permute.xlu1 %4939  ;;  %v11284_v52 = vld [vmem:[#allocation36_spill] sm:$0xff] }
 0x6c9   :  { %6694 = vmatpush3.msra.mxu0 %v4586_v27  ;;  %v4945_v39 = vsel %vm4941_vm5, %v4938_v50, %v4940_v31  ;;  %v11281_v50 = vld [vmem:[#allocation38_spill] sm:$0xff]  ;;  %v11287_v27 = vld [vmem:[#allocation25_spill] sm:$0xff]  ;;  %vm6575_vm5 = vcmask 13312  }
 0x6ca   :  { %5413 = vmatmul.mubr.f32.gmra.mxu0 %v5185_v47  ;;  %6695 = vmatprep.subr.mxu0 %v4763_v11  ;;  %v4535_v5 = vpop.permute.xlu0 %4534  ;;  %v4719_v9 = vsel %vm1008_vm3, %v11281_v50, %v11280_v15  ;;  %v11286_v47 = vld [vmem:[#allocation37_spill] sm:$0xff]  ;;  %v11288_v11 = vld [vmem:[#allocation48_spill] sm:$0xff] }
 0x6cb   :  { %4438 = vrot.lane.b32.xlu1 %v9992_v45, %s7123_s24  ;;  %6696 = vmatpush3.msra.mxu0 %v4585_v38  ;;  %v4540_v31 = vsel %vm4538_vm1, %v11287_v27, %v11286_v47  ;;  %v4717_v42 = vsel %vm1008_vm3, %v11289_v58, %v11288_v11 }
 0x6cc   :  { %6736 = vmatpush3.msra.mxu1 %v4945_v39  ;;  %6697 = vmatprep.subr.mxu0 %v4762_v23  ;;  %v4716_v12 = vpop.permute.xlu1 %4715 }
 0x6cd   :  { %6737 = vmatprep.subr.mxu1 %v5124_v18  ;;  %4982 = vrot.lane.b32.xlu0 %v10159_v3, %s7124_s3  ;;  %v4720_v34 = vsel %vm1008_vm3, %v4714_v0, %v4716_v12  ;;  %v11285_v0 = vld [vmem:[#allocation24_spill] sm:$0xff]  ;;  %v11294_v18 = vld [vmem:[#allocation41_spill] sm:$0xff] }
 0x6ce   :  { %5417 = vmatprep.mubr.f32.mxu0 %v5193_v20  ;;  %6698 = vmatpush3.msra.mxu0 %v4584_v44  ;;  %v5073_v19 = vpop.permute.xlu0 %5072  ;;  %v4718_v51 = vsel %vm1008_vm3, %v11285_v0, %v11284_v52  ;;  %v11292_v20 = vld [vmem:[#allocation54_spill] sm:$0xff]  ;;  %v11295_v12 = vld [vmem:[#allocation40_spill] sm:$0xff]  ;;  %vm4493_vm3 = vcmask 924672  }
 0x6cf   :  { %6738 = vmatpush3.msra.mxu1 %v4944_v54  ;;  %5418 = vmatmul.mubr.f32.gmra.mxu0 %v5192_v1  ;;  %v5079_v28 = vsel %vm5076_vm7, %v11293_v55, %v11292_v20  ;;  %v4899_v1 = vsel %vm4896_vm6, %v11295_v12, %v11294_v18 }
 0x6d0   :  { %6739 = vmatprep.subr.mxu1 %v5123_v53  ;;  %4984 = vrot.lane.b32.xlu1 %v10174_v8, %s7124_s3  ;;  %v4537_v14 = vpop.permute.xlu1 %4536 }
 0x6d1   :  { %6699 = vmatprep.subr.mxu0 %v4720_v34  ;;  %6740 = vmatpush3.msra.mxu1 %v4943_v32  ;;  %v4542_v40 = vsel %vm4538_vm1, %v4535_v5, %v4537_v14  ;;  %v11290_v5 = vld [vmem:[#allocation34_spill] sm:$0xff] }
 0x6d2   :  { %6741 = vmatprep.subr.mxu1 %v5122_v41  ;;  %4612 = vrot.lane.b32.xlu0 %v9934_v33, %s7122_s21  ;;  %v4893_v49 = vpop.permute.xlu0 %4892  ;;  %v4539_v2 = vsel %vm4538_vm1, %v11291_v35, %v11290_v5  ;;  %vm6573_vm1 = vcmask 15360  }
 0x6d3   :  { %5422 = vmatprep.mubr.f32.mxu0 %v5200_v61  ;;  %6742 = vmatpush3.msra.mxu1 %v4942_v16 }
 0x6d4   :  { %5423 = vmatmul.mubr.f32.gmra.mxu0 %v5199_v60  ;;  %4614 = vrot.lane.b32.xlu1 %v9936_v24, %s7122_s21  ;;  %v5075_v57 = vpop.permute.xlu1 %5074  ;;  %s7126_s21 = smov 80  }
 0x6d5   :  { %6700 = vmatpush3.msra.mxu0 %v4542_v40  ;;  %v5080_v17 = vsel %vm5076_vm7, %v5073_v19, %v5075_v57  ;;  %5492 = vmatprep.mubr.f32.mxu0 %v5181_v6 }
 0x6d6   :  { %6701 = vmatprep.subr.mxu0 %v4719_v9  ;;  %4802 = vrot.lane.b32.xlu0 %v10159_v3, %s7125_s14  ;;  %v4670_v10 = vpop.permute.xlu0 %4669 }
 0x6d7   :  { %6702 = vmatpush3.msra.mxu0 %v4541_v56  ;;  %6743 = vmatprep.subr.mxu1 %v5080_v17 }
 0x6d8   :  { %6703 = vmatprep.subr.mxu0 %v4718_v51  ;;  %4804 = vrot.lane.b32.xlu1 %v10174_v8, %s7125_s14  ;;  %v4895_v39 = vpop.permute.xlu1 %4894 }
 0x6d9   :  { %6704 = vmatpush3.msra.mxu0 %v4540_v31  ;;  %v4900_v38 = vsel %vm4896_vm6, %v4893_v49, %v4895_v39 }
 0x6da   :  { %6705 = vmatprep.subr.mxu0 %v4717_v42  ;;  %4432 = vrot.lane.b32.xlu0 %v9934_v33, %s7123_s24  ;;  %v4490_v23 = vpop.permute.xlu0 %4489 }
 0x6db   :  { %6706 = vmatpush3.msra.mxu0 %v4539_v2  ;;  %6744 = vmatpush3.msra.mxu1 %v4900_v38 }
 0x6dc   :  { %4434 = vrot.lane.b32.xlu1 %v9936_v24, %s7123_s24  ;;  %6745 = vmatprep.subr.mxu1 %v5079_v28  ;;  %v4672_v21 = vpop.permute.xlu1 %4671 }
 0x6dd   :  { %6746 = vmatpush3.msra.mxu1 %v4899_v1  ;;  %v4676_v4 = vsel %vm915_vm4, %v4670_v10, %v4672_v21 }
 0x6de   :  { %4978 = vrot.lane.b32.xlu0 %v10046_v59, %s7124_s3  ;;  %v5065_v44 = vpop.permute.xlu0 %5064  ;;  %6707 = vmatprep.subr.mxu0 %v4676_v4 }
 0x6df   :  { %v5078_v62 = vsel %vm5076_vm7, %v5065_v44, %v11296_v22 }
 0x6e0   :  { %4980 = vrot.lane.b32.xlu1 %v10050_v43, %s7124_s3  ;;  %6747 = vmatprep.subr.mxu1 %v5078_v62  ;;  %v4492_v54 = vpop.permute.xlu1 %4491 }
 0x6e1   :  { %v4497_v19 = vsel %vm4493_vm3, %v4490_v23, %v4492_v54 }
 0x6e2   :  { %4798 = vrot.lane.b32.xlu0 %v10046_v59, %s7125_s14  ;;  %v4666_v34 = vpop.permute.xlu0 %4665  ;;  %6708 = vmatpush3.msra.mxu0 %v4497_v19 }
 0x6e4   :  { %4800 = vrot.lane.b32.xlu1 %v10050_v43, %s7125_s14  ;;  %v4668_v46 = vpop.permute.xlu1 %4667 }
 0x6e5   :  { %v4675_v25 = vsel %vm915_vm4, %v4666_v34, %v4668_v46 }
 0x6e6   :  { %4974 = vrot.lane.b32.xlu0 %v9988_v29, %s7124_s3  ;;  %v4885_v53 = vpop.permute.xlu0 %4884  ;;  %6709 = vmatprep.subr.mxu0 %v4675_v25 }
 0x6e8   :  { %4976 = vrot.lane.b32.xlu1 %v9992_v45, %s7124_s3  ;;  %v4887_v48 = vpop.permute.xlu1 %4886 }
 0x6e9   :  { %v4898_v32 = vsel %vm4896_vm6, %v4885_v53, %v4887_v48 }
 0x6ea   :  { %4794 = vrot.lane.b32.xlu0 %v9988_v29, %s7125_s14  ;;  %v4486_v61 = vpop.permute.xlu0 %4485  ;;  %6748 = vmatpush3.msra.mxu1 %v4898_v32 }
 0x6ec   :  { %4796 = vrot.lane.b32.xlu1 %v9992_v45, %s7125_s14  ;;  %v4488_v14 = vpop.permute.xlu1 %4487 }
 0x6ed   :  { %v4496_v37 = vsel %vm4493_vm3, %v4486_v61, %v4488_v14 }
 0x6ee   :  { %4970 = vrot.lane.b32.xlu0 %v9934_v33, %s7124_s3  ;;  %v5061_v26 = vpop.permute.xlu0 %5060  ;;  %6710 = vmatpush3.msra.mxu0 %v4496_v37 }
 0x6f0   :  { %4972 = vrot.lane.b32.xlu1 %v9936_v24, %s7124_s3  ;;  %v5063_v41 = vpop.permute.xlu1 %5062  ;;  %s7129_s3 = smov 118  }
 0x6f1   :  { %v5077_v60 = vsel %vm5076_vm7, %v5061_v26, %v5063_v41 }
 0x6f2   :  { %4790 = vrot.lane.b32.xlu0 %v9934_v33, %s7125_s14  ;;  %v4662_v13 = vpop.permute.xlu0 %4661  ;;  %6749 = vmatprep.subr.mxu1 %v5077_v60 }
 0x6f4   :  { %4792 = vrot.lane.b32.xlu1 %v9936_v24, %s7125_s14  ;;  %v4664_v36 = vpop.permute.xlu1 %4663 }
 0x6f5   :  { %v4674_v16 = vsel %vm915_vm4, %v4662_v13, %v4664_v36 }
 0x6f6   :  { %5162 = vrot.lane.b32.xlu0 %v10159_v3, %s7126_s21  ;;  %v4881_v40 = vpop.permute.xlu0 %4880  ;;  %6711 = vmatprep.subr.mxu0 %v4674_v16 }
 0x6f8   :  { %5164 = vrot.lane.b32.xlu1 %v10174_v8, %s7126_s21  ;;  %v4883_v49 = vpop.permute.xlu1 %4882 }
 0x6f9   :  { %v4897_v6 = vsel %vm4896_vm6, %v4881_v40, %v4883_v49 }
 0x6fa   :  { %5158 = vrot.lane.b32.xlu0 %v10046_v59, %s7126_s21  ;;  %v4482_v57 = vpop.permute.xlu0 %4481  ;;  %6750 = vmatpush3.msra.mxu1 %v4897_v6 }
 0x6fc   :  { %5160 = vrot.lane.b32.xlu1 %v10050_v43, %s7126_s21  ;;  %v4484_v15 = vpop.permute.xlu1 %4483  ;;  %v5306_v43 = vld [vmem:[%s10948_s7] sm:$0xff] }
 0x6fd   :  { %v4495_v50 = vsel %vm4493_vm3, %v4482_v57, %v4484_v15 }
 0x6fe   :  { %5154 = vrot.lane.b32.xlu0 %v9988_v29, %s7126_s21  ;;  %v5028_v9 = vpop.permute.xlu0 %5027  ;;  %6712 = vmatpush3.msra.mxu0 %v4495_v50  ;;  %v5307_v29 = vld [vmem:[%s10948_s7 + $0x8] sm:$0xff]  ;;  %v5180_v50 = vld [vmem:[%s10947_s6 + $0x10] sm:$0xff] }
 0x700   :  { %5156 = vrot.lane.b32.xlu1 %v9992_v45, %s7126_s21  ;;  %v5030_v3 = vpop.permute.xlu1 %5029 }
 0x701   :  { %v5035_v8 = vsel %vm5031_vm8, %v5028_v9, %v5030_v3  ;;  %v5188_v3 = vld [vmem:[%s10947_s6 + $0x50] sm:$0xff] }
 0x702   :  { %5150 = vrot.lane.b32.xlu0 %v9934_v33, %s7126_s21  ;;  %v4658_v59 = vpop.permute.xlu0 %4657  ;;  %6751 = vmatprep.subr.mxu1 %v5035_v8  ;;  %v5308_v33 = vld [vmem:[%s10948_s7 + $0x10] sm:$0xff] }
 0x704   :  { %5152 = vrot.lane.b32.xlu1 %v9936_v24, %s7126_s21  ;;  %v4660_v17 = vpop.permute.xlu1 %4659  ;;  %v5309_v24 = vld [vmem:[%s10948_s7 + $0x18] sm:$0xff] }
 0x705   :  { %v4673_v45 = vsel %vm915_vm4, %v4658_v59, %v4660_v17  ;;  %vm4628_vm4 = vcmask 850944  }
 0x706   :  { %5312 = vperm.xlu0 %7065, %v5306_v43   ;;  %v4848_v30 = vpop.permute.xlu0 %4847  ;;  %6713 = vmatprep.subr.mxu0 %v4673_v45  ;;  %v5187_v43 = vld [vmem:[%s10947_s6 + $0x48] sm:$0xff] }
 0x708   :  { %5317 = vperm.xlu1 %7066, %v5307_v29   ;;  %v4850_v7 = vpop.permute.xlu1 %4849  ;;  %v5195_v29 = vld [vmem:[%s10947_s6 + $0x88] sm:$0xff] }
 0x709   :  { %v4855_v56 = vsel %vm4851_vm14, %v4848_v30, %v4850_v7 }
 0x70a   :  { %5322 = vperm.xlu0 %7065, %v5308_v33   ;;  %v4478_v10 = vpop.permute.xlu0 %4477  ;;  %6752 = vmatpush3.msra.mxu1 %v4855_v56  ;;  %v5194_v33 = vld [vmem:[%s10947_s6 + $0x80] sm:$0xff] }
 0x70b   :  { %v5202_v56 = vld [vmem:[%s10947_s6 + $0xc0] sm:$0xff] }
 0x70c   :  { %5327 = vperm.xlu1 %7066, %v5309_v24   ;;  %v4480_v52 = vpop.permute.xlu1 %4479 }
 0x70d   :  { %v4494_v0 = vsel %vm4493_vm3, %v4478_v10, %v4480_v52  ;;  %v5201_v52 = vld [vmem:[%s10947_s6 + $0xb8] sm:$0xff] }
 0x70e   :  { %v5024_v51 = vpop.permute.xlu0 %5023  ;;  %6714 = vmatpush3.msra.mxu0 %v4494_v0 }
 0x710   :  { %v5026_v47 = vpop.permute.xlu1 %5025 }
 0x711   :  { %v5034_v27 = vsel %vm5031_vm8, %v5024_v51, %v5026_v47  ;;  %v5184_v51 = vld [vmem:[%s10947_s6 + $0x30] sm:$0xff] }
 0x712   :  { %v4625_v31 = vpop.permute.xlu0 %4624  ;;  %6753 = vmatprep.subr.mxu1 %v5034_v27 }
 0x714   :  { %v4627_v39 = vpop.permute.xlu1 %4626 }
 0x715   :  { %v4632_v11 = vsel %vm4628_vm4, %v4625_v31, %v4627_v39 }
 0x716   :  { %v4844_v58 = vpop.permute.xlu0 %4843  ;;  %6715 = vmatprep.subr.mxu0 %v4632_v11 }
 0x718   :  { %v4846_v42 = vpop.permute.xlu1 %4845 }
 0x719   :  { %v4854_v38 = vsel %vm4851_vm14, %v4844_v58, %v4846_v42 }
 0x71a   :  { %v4445_v5 = vpop.permute.xlu0 %4444  ;;  %6754 = vmatpush3.msra.mxu1 %v4854_v38 }
 0x71c   :  { %v4447_v35 = vpop.permute.xlu1 %4446 }
 0x71d   :  { %v4452_v2 = vsel %vm4448_vm15, %v4445_v5, %v4447_v35  ;;  %v5182_v5 = vld [vmem:[%s10947_s6 + $0x20] sm:$0xff] }
 0x71e   :  { %v5020_v23 = vpop.permute.xlu0 %5019  ;;  %6716 = vmatpush3.msra.mxu0 %v4452_v2  ;;  %v5190_v2 = vld [vmem:[%s10947_s6 + $0x60] sm:$0xff] }
 0x720   :  { %v5022_v20 = vpop.permute.xlu1 %5021 }
 0x721   :  { %v5033_v55 = vsel %vm5031_vm8, %v5020_v23, %v5022_v20 }
 0x722   :  { %v4621_v28 = vpop.permute.xlu0 %4620  ;;  %6755 = vmatprep.subr.mxu1 %v5033_v55  ;;  %v5189_v55 = vld [vmem:[%s10947_s6 + $0x58] sm:$0xff] }
 0x724   :  { %v4623_v18 = vpop.permute.xlu1 %4622 }
 0x725   :  { %v4631_v12 = vsel %vm4628_vm4, %v4621_v28, %v4623_v18  ;;  %v5197_v18 = vld [vmem:[%s10947_s6 + $0x98] sm:$0xff] }
 0x726   :  { %v4840_v1 = vpop.permute.xlu0 %4839  ;;  %6717 = vmatprep.subr.mxu0 %v4631_v12 }
 0x728   :  { %v4842_v21 = vpop.permute.xlu1 %4841 }
 0x729   :  { %v4853_v4 = vsel %vm4851_vm14, %v4840_v1, %v4842_v21  ;;  %v5196_v21 = vld [vmem:[%s10947_s6 + $0x90] sm:$0xff] }
 0x72a   :  { %v4441_v44 = vpop.permute.xlu0 %4440  ;;  %6756 = vmatpush3.msra.mxu1 %v4853_v4 }
 0x72c   :  { %v4443_v22 = vpop.permute.xlu1 %4442 }
 0x72d   :  { %v4451_v62 = vsel %vm4448_vm15, %v4441_v44, %v4443_v22  ;;  %v5204_v44 = vld [vmem:[%s10947_s6 + $0xd0] sm:$0xff] }
 0x72e   :  { %v5016_v54 = vpop.permute.xlu0 %5015  ;;  %6718 = vmatpush3.msra.mxu0 %v4451_v62 }
 0x730   :  { %v5018_v19 = vpop.permute.xlu1 %5017 }
 0x731   :  { %v5032_v34 = vsel %vm5031_vm8, %v5016_v54, %v5018_v19  ;;  %v5203_v54 = vld [vmem:[%s10947_s6 + $0xc8] sm:$0xff] }
 0x732   :  { %v4617_v46 = vpop.permute.xlu0 %4616  ;;  %6757 = vmatprep.subr.mxu1 %v5032_v34 }
 0x734   :  { %v4619_v25 = vpop.permute.xlu1 %4618 }
 0x735   :  { %v4630_v53 = vsel %vm4628_vm4, %v4617_v46, %v4619_v25 }
 0x736   :  { %v4836_v63 = vpop.permute.xlu0 %4835  ;;  %6719 = vmatprep.subr.mxu0 %v4630_v53  ;;  %v5191_v53 = vld [vmem:[%s10947_s6 + $0x68] sm:$0xff] }
 0x738   :  { %v4838_v48 = vpop.permute.xlu1 %4837 }
 0x739   :  { %v4852_v32 = vsel %vm4851_vm14, %v4836_v63, %v4838_v48  ;;  %v5198_v63 = vld [vmem:[%s10947_s6 + $0xa0] sm:$0xff]  ;;  %v5205_v48 = vld [vmem:[%s10947_s6 + $0xd8] sm:$0xff] }
 0x73a   :  { %v4437_v61 = vpop.permute.xlu0 %4436  ;;  %6758 = vmatpush3.msra.mxu1 %v4852_v32  ;;  %v5702_v32 = vld [vmem:[%s10949_s8 + $0x78] sm:$0xff] }
 0x73d   :  { %v4439_v14 = vpop.permute.xlu1 %4438 }
 0x73e   :  { %v4450_v37 = vsel %vm4448_vm15, %v4437_v61, %v4439_v14  ;;  %v5701_v61 = vld [vmem:[%s10949_s8 + $0x70] sm:$0xff]  ;;  %v5700_v14 = vld [vmem:[%s10949_s8 + $0x68] sm:$0xff] }
 0x73f   :  { %v4983_v26 = vpop.permute.xlu0 %4982  ;;  %6720 = vmatpush3.msra.mxu0 %v4450_v37  ;;  %v5699_v37 = vld [vmem:[%s10949_s8 + $0x60] sm:$0xff] }
 0x742   :  { %v4985_v41 = vpop.permute.xlu1 %4984 }
 0x743   :  { %v4990_v60 = vsel %vm4986_vm9, %v4983_v26, %v4985_v41  ;;  %v5698_v26 = vld [vmem:[%s10949_s8 + $0x58] sm:$0xff]  ;;  %v5697_v41 = vld [vmem:[%s10949_s8 + $0x50] sm:$0xff] }
 0x744   :  { %v4613_v13 = vpop.permute.xlu0 %4612  ;;  %6759 = vmatprep.subr.mxu1 %v4990_v60  ;;  %v5696_v60 = vld [vmem:[%s10949_s8 + $0x48] sm:$0xff] }
 0x746   :  { %v4615_v36 = vpop.permute.xlu1 %4614 }
 0x747   :  { %v4629_v16 = vsel %vm4628_vm4, %v4613_v13, %v4615_v36  ;;  %v5695_v13 = vld [vmem:[%s10949_s8 + $0x40] sm:$0xff]  ;;  %v5694_v36 = vld [vmem:[%s10949_s8 + $0x38] sm:$0xff] }
 0x748   :  { %v4803_v40 = vpop.permute.xlu0 %4802  ;;  %6721 = vmatprep.subr.mxu0 %v4629_v16  ;;  %v5693_v16 = vld [vmem:[%s10949_s8 + $0x30] sm:$0xff] }
 0x74a   :  { %v4805_v49 = vpop.permute.xlu1 %4804 }
 0x74b   :  { %v4810_v6 = vsel %vm4806_vm11, %v4803_v40, %v4805_v49  ;;  %v5692_v40 = vld [vmem:[%s10949_s8 + $0x28] sm:$0xff]  ;;  %v5691_v49 = vld [vmem:[%s10949_s8 + $0x20] sm:$0xff] }
 0x74c   :  { %v4433_v57 = vpop.permute.xlu0 %4432  ;;  %6760 = vmatpush3.msra.mxu1 %v4810_v6  ;;  %v5690_v6 = vld [vmem:[%s10949_s8 + $0x18] sm:$0xff] }
 0x74e   :  { %v4435_v15 = vpop.permute.xlu1 %4434 }
 0x74f   :  { %v4449_v9 = vsel %vm4448_vm15, %v4433_v57, %v4435_v15  ;;  %v5689_v57 = vld [vmem:[%s10949_s8 + $0x10] sm:$0xff]  ;;  %v5688_v15 = vld [vmem:[%s10949_s8 + $0x8] sm:$0xff] }
 0x750   :  { %v4979_v8 = vpop.permute.xlu0 %4978  ;;  %6722 = vmatpush3.msra.mxu0 %v4449_v9 }
 0x751   :  { %5493 = vmatmul.mubr.f32.vlgmr.msra.gmra.mxu0 %v5180_v50  ;;  %v5687_v50 = vld [vmem:[%s10949_s8] sm:$0xff]  ;;  %s7127_s8 = smov 122  }
 0x752   :  { %v4981_v59 = vpop.permute.xlu1 %4980  ;;  %5497 = vmatprep.mubr.f32.mxu0 %v5188_v3 }
 0x753   :  { %v4989_v17 = vsel %vm4986_vm9, %v4979_v8, %v4981_v59 }
 0x754   :  { %v4799_v45 = vpop.permute.xlu0 %4798  ;;  %6761 = vmatprep.subr.mxu1 %v4989_v17 }
 0x755   :  { %5498 = vmatmul.mubr.f32.gmra.mxu0 %v5187_v43 }
 0x756   :  { %v4801_v30 = vpop.permute.xlu1 %4800  ;;  %5502 = vmatprep.mubr.f32.mxu0 %v5195_v29 }
 0x757   :  { %v4809_v7 = vsel %vm4806_vm11, %v4799_v45, %v4801_v30 }
 0x758   :  { %v4975_v24 = vpop.permute.xlu0 %4974  ;;  %6762 = vmatpush3.msra.mxu1 %v4809_v7 }
 0x759   :  { %5503 = vmatmul.mubr.f32.gmra.mxu0 %v5194_v33 }
 0x75a   :  { %v4977_v10 = vpop.permute.xlu1 %4976  ;;  %5507 = vmatprep.mubr.f32.mxu0 %v5202_v56 }
 0x75b   :  { %v4988_v0 = vsel %vm4986_vm9, %v4975_v24, %v4977_v10 }
 0x75c   :  { %v4795_v47 = vpop.permute.xlu0 %4794  ;;  %6763 = vmatprep.subr.mxu1 %v4988_v0 }
 0x75d   :  { %5508 = vmatmul.mubr.f32.gmra.mxu0 %v5201_v52 }
 0x75e   :  { %v4797_v27 = vpop.permute.xlu1 %4796  ;;  %6886 = vmatprep.mubr.msk.f32.mxu0 %vm5330_vm10, %v5184_v51 }
 0x75f   :  { %v4808_v31 = vsel %vm4806_vm11, %v4795_v47, %v4797_v27 }
 0x760   :  { %v4971_v39 = vpop.permute.xlu0 %4970  ;;  %6764 = vmatpush3.msra.mxu1 %v4808_v31 }
 0x762   :  { %v4973_v11 = vpop.permute.xlu1 %4972 }
 0x763   :  { %v4987_v58 = vsel %vm4986_vm9, %v4971_v39, %v4973_v11 }
 0x764   :  { %v4791_v42 = vpop.permute.xlu0 %4790  ;;  %6765 = vmatprep.subr.mxu1 %v4987_v58 }
 0x766   :  { %v4793_v38 = vpop.permute.xlu1 %4792 }
 0x767   :  { %v4807_v35 = vsel %vm4806_vm11, %v4791_v42, %v4793_v38 }
 0x768   :  { %v5163_v23 = vpop.permute.xlu0 %5162  ;;  %6766 = vmatpush3.msra.mxu1 %v4807_v35 }
 0x769   :  { %5578 = vmatmul.mubr.f32.vlgmr.msra.gmra.mxu1 %v5182_v5  ;;  %6892 = vmatprep.subr.mxu1 %v5702_v32 }
 0x76a   :  { %v5165_v20 = vpop.permute.xlu1 %5164  ;;  %5582 = vmatprep.mubr.f32.mxu1 %v5190_v2  ;;  %6893 = vmatpush3.msra.mxu1 %v5702_v32 }
 0x76b   :  { %v5169_v28 = vsel %vm11297_vm13, %v5163_v23, %v5165_v20  ;;  %6894 = vmatprep.subr.mxu1 %v5701_v61 }
 0x76c   :  { %v5159_v12 = vpop.permute.xlu0 %5158  ;;  %6878 = vmatprep.subr.mxu0 %v5169_v28  ;;  %6895 = vmatpush3.msra.mxu1 %v5701_v61 }
 0x76d   :  { %5583 = vmatmul.mubr.f32.gmra.mxu1 %v5189_v55  ;;  %6879 = vmatpush3.msra.mxu0 %v5169_v28 }
 0x76e   :  { %v5161_v1 = vpop.permute.xlu1 %5160  ;;  %5587 = vmatprep.mubr.f32.mxu1 %v5197_v18  ;;  %6896 = vmatprep.subr.mxu1 %v5700_v14 }
 0x76f   :  { %v5168_v4 = vsel %vm11298_vm2, %v5159_v12, %v5161_v1  ;;  %6897 = vmatpush3.msra.mxu1 %v5700_v14 }
 0x770   :  { %v5155_v22 = vpop.permute.xlu0 %5154  ;;  %6880 = vmatprep.subr.mxu0 %v5168_v4  ;;  %6898 = vmatprep.subr.mxu1 %v5699_v37 }
 0x771   :  { %5588 = vmatmul.mubr.f32.gmra.mxu1 %v5196_v21  ;;  %6881 = vmatpush3.msra.mxu0 %v5168_v4 }
 0x772   :  { %v5157_v62 = vpop.permute.xlu1 %5156  ;;  %5592 = vmatprep.mubr.f32.mxu1 %v5204_v44  ;;  %6899 = vmatpush3.msra.mxu1 %v5699_v37 }
 0x773   :  { %v5167_v19 = vsel %vm11299_vm12, %v5155_v22, %v5157_v62  ;;  %6900 = vmatprep.subr.mxu1 %v5698_v26 }
 0x774   :  { %6882 = vmatprep.subr.mxu0 %v5167_v19  ;;  %v5151_v34 = vpop.permute.xlu0 %5150  ;;  %6901 = vmatpush3.msra.mxu1 %v5698_v26 }
 0x775   :  { %5593 = vmatmul.mubr.f32.gmra.mxu1 %v5203_v54  ;;  %6883 = vmatpush3.msra.mxu0 %v5167_v19 }
 0x776   :  { %v5153_v46 = vpop.permute.xlu1 %5152  ;;  %6902 = vmatprep.subr.mxu1 %v5697_v41 }
 0x777   :  { %v5166_v25 = vsel %vm11300_vm0, %v5151_v34, %v5153_v46  ;;  %6903 = vmatpush3.msra.mxu1 %v5697_v41 }
 0x778   :  { %6884 = vmatprep.subr.mxu0 %v5166_v25  ;;  %6904 = vmatprep.subr.mxu1 %v5696_v60 }
 0x779   :  { %6885 = vmatpush3.msra.mxu0 %v5166_v25  ;;  %6905 = vmatpush3.msra.mxu1 %v5696_v60 }
 0x77a   :  { %6887 = vmatmul.mubr.msk.f32.vlgmr.msra.gmra.mxu0 %vm5330_vm10, %v5191_v53  ;;  %6906 = vmatprep.subr.mxu1 %v5695_v13 }
 0x77b   :  { %6889 = vmatprep.mubr.msk.f32.mxu0 %vm5330_vm10, %v5198_v63  ;;  %6907 = vmatpush3.msra.mxu1 %v5695_v13 }
 0x77c   :  { %6908 = vmatprep.subr.mxu1 %v5694_v36 }
 0x77d   :  { %6909 = vmatpush3.msra.mxu1 %v5694_v36 }
 0x77e   :  { %6890 = vmatmul.mubr.msk.f32.gmra.mxu0 %vm5330_vm10, %v5205_v48  ;;  %6910 = vmatprep.subr.mxu1 %v5693_v16 }
 0x77f   :  { %6911 = vmatpush3.msra.mxu1 %v5693_v16 }
 0x780   :  { %6912 = vmatprep.subr.mxu1 %v5692_v40 }
 0x781   :  { %6913 = vmatpush3.msra.mxu1 %v5692_v40  ;;  %v5313_v38 = vpop.permute.xlu0 %5312 }
 0x782   :  { %6914 = vmatprep.subr.mxu1 %v5691_v49 }
 0x783   :  { %6915 = vmatpush3.msra.mxu1 %v5691_v49  ;;  %v5318_v11 = vpop.permute.xlu1 %5317 }
 0x784   :  { %6916 = vmatprep.subr.mxu1 %v5690_v6 }
 0x785   :  { %6917 = vmatpush3.msra.mxu1 %v5690_v6  ;;  %v6679_v9 = vpop.f32.mrf.mxu0  ;;  %v5323_v19 = vpop.permute.xlu0 %5322 }
 0x786   :  { %6918 = vmatprep.subr.mxu1 %v5689_v57 }
 0x787   :  { %6919 = vmatpush3.msra.mxu1 %v5689_v57  ;;  %v6680_v3 = vpop.f32.mrf.mxu0  ;;  %v5328_v22 = vpop.permute.xlu1 %5327 }
 0x788   :  { %6920 = vmatprep.subr.mxu1 %v5688_v15  ;;  %v6681_v58 = vadd.f32 %v6680_v3, %v6679_v9 }
 0x789   :  { %6921 = vmatpush3.msra.mxu1 %v5688_v15 }
 0x78a   :  { %6922 = vmatprep.subr.mxu1 %v5687_v50  ;;  %v6682_v8 = vpop.f32.mrf.mxu0  ;;  %v5410_v18 = vadd.f32 %v6681_v58, %v5313_v38  ;;  %v5789_v38 = vld [vmem:[%s10950_s9 + $0x8] sm:$0x3f] }
 0x78b   :  { %6923 = vmatpush3.msra.mxu1 %v5687_v50 }
 0x78c   :  { %v6683_v59 = vpop.f32.mrf.mxu0 }
 0x78d   :  { %v6684_v39 = vadd.f32 %v6683_v59, %v6682_v8  ;;  %v6605_v8 = vld [vmem:[%s10950_s9 + $0x10] sm:$0xff] }
 0x78e   :  { %6938 = vmatprep.mubr.msk.f32.mxu0 %vm5330_vm10, %v6605_v8 }
 0x78f   :  { %v6685_v43 = vpop.f32.mrf.mxu0  ;;  %v5415_v20 = vadd.f32 %v6684_v39, %v5318_v11 }
 0x791   :  { %v6686_v17 = vpop.f32.mrf.mxu0 }
 0x792   :  { %v6687_v12 = vadd.f32 %v6686_v17, %v6685_v43  ;;  %v6615_v17 = vld [vmem:[%s10950_s9 + $0x30] sm:$0xff] }
 0x794   :  { %v6688_v29 = vpop.f32.mrf.mxu0  ;;  %v5420_v63 = vadd.f32 %v6687_v12, %v5323_v19  ;;  %v6616_v12 = vld [vmem:[%s10950_s9 + $0x38] sm:$0x3f] }
 0x795   :  { %v6624_v19 = vld [vmem:[%s10950_s9 + $0x58] sm:$0x3f] }
 0x796   :  { %v6689_v45 = vpop.f32.mrf.mxu0 }
 0x797   :  { %v6690_v55 = vadd.f32 %v6689_v45, %v6688_v29  ;;  %v6559_v29 = vld [vmem:[%s10951_s10] sm:$0xff]  ;;  %v6560_v45 = vld [vmem:[%s10951_s10 + $0x8] sm:$0x3f] }
 0x799   :  { %v5425_v34 = vadd.f32 %v6690_v55, %v5328_v22  ;;  %v6612_v55 = vld [vmem:[%s10950_s9 + $0x28] sm:$0x3f] }
 0x811   :  { %v6723_v30 = vpop.f32.mrf.mxu0 }
 0x813   :  { %v6724_v33 = vpop.f32.mrf.mxu0 }
 0x814   :  { %v6725_v35 = vadd.f32 %v6724_v33, %v6723_v30 }
 0x815   :  { %v6726_v7 = vpop.f32.mrf.mxu0 }
 0x816   :  { %v5495_v62 = vadd.f32 %v6725_v35, %v5410_v18 }
 0x817   :  { %v6727_v56 = vpop.f32.mrf.mxu0 }
 0x818   :  { %v6728_v5 = vadd.f32 %v6727_v56, %v6726_v7 }
 0x819   :  { %v6729_v24 = vpop.f32.mrf.mxu0 }
 0x81a   :  { %v5500_v4 = vadd.f32 %v6728_v5, %v5415_v20  ;;  %v6611_v5 = vld [vmem:[%s10950_s9 + $0x20] sm:$0xff] }
 0x81b   :  { %v6730_v0 = vpop.f32.mrf.mxu0 }
 0x81c   :  { %v6731_v54 = vadd.f32 %v6730_v0, %v6729_v24 }
 0x81d   :  { %v6732_v27 = vpop.f32.mrf.mxu0 }
 0x81e   :  { %v5505_v26 = vadd.f32 %v6731_v54, %v5420_v63  ;;  %v6623_v54 = vld [vmem:[%s10950_s9 + $0x50] sm:$0xff] }
 0x81f   :  { %v6733_v2 = vpop.f32.mrf.mxu0 }
 0x820   :  { %v6734_v44 = vadd.f32 %v6733_v2, %v6732_v27  ;;  %v6606_v27 = vld [vmem:[%s10950_s9 + $0x18] sm:$0x3f] }
 0x822   :  { %v5510_v61 = vadd.f32 %v6734_v44, %v5425_v34  ;;  %v6620_v44 = vld [vmem:[%s10950_s9 + $0x48] sm:$0x3f] }
 0x829   :  { %v6767_v10 = vpop.f32.mrf.mxu1 }
 0x82b   :  { %v6768_v52 = vpop.f32.mrf.mxu1 }
 0x82c   :  { %v6769_v1 = vadd.f32 %v6768_v52, %v6767_v10 }
 0x82d   :  { %v6770_v51 = vpop.f32.mrf.mxu1 }
 0x82e   :  { %v5580_v32 = vadd.f32 %v6769_v1, %v5495_v62 }
 0x82f   :  { %v6771_v47 = vpop.f32.mrf.mxu1 }
 0x830   :  { %v6772_v28 = vadd.f32 %v6771_v47, %v6770_v51 }
 0x831   :  { %v6773_v31 = vpop.f32.mrf.mxu1 }
 0x832   :  { %v5585_v25 = vadd.f32 %v6772_v28, %v5500_v4  ;;  %v6619_v4 = vld [vmem:[%s10950_s9 + $0x40] sm:$0xff] }
 0x833   :  { %v6774_v42 = vpop.f32.mrf.mxu1 }
 0x834   :  { %v6775_v48 = vadd.f32 %v6774_v42, %v6773_v31  ;;  %v5788_v31 = vld [vmem:[%s10950_s9] sm:$0xff] }
 0x835   :  { %v6776_v23 = vpop.f32.mrf.mxu1 }
 0x836   :  { %v5590_v16 = vadd.f32 %v6775_v48, %v5505_v26  ;;  %v6631_v48 = vld [vmem:[%s10950_s9 + $0x70] sm:$0xff] }
 0x837   :  { %v6777_v21 = vpop.f32.mrf.mxu1 }
 0x838   :  { %v6778_v46 = vadd.f32 %v6777_v21, %v6776_v23 }
 0x83a   :  { %v6888_v53 = vpop.f32.mrf.mxu0  ;;  %v5595_v60 = vadd.f32 %v6778_v46, %v5510_v61  ;;  %v6632_v61 = vld [vmem:[%s10950_s9 + $0x78] sm:$0x3f] }
 0x83b   :  { %v5670_v14 = vadd.f32 %v6888_v53, %v5585_v25  ;;  %v6627_v25 = vld [vmem:[%s10950_s9 + $0x60] sm:$0xff]  ;;  %v6628_v53 = vld [vmem:[%s10950_s9 + $0x68] sm:$0x3f] }
 0x83c   :  { %v5664_v37 = vpop.f32.mrf.mxu0 }
 0x83d   :  { %v5665_v41 = vadd.f32 %v5664_v37, %v5580_v32  ;;  %v5684_v40 = vmax.f32 %v5670_v14, 0.0 }
 0x83e   :  { %v6891_v13 = vpop.f32.mrf.mxu0 }
 0x83f   :  { %v5683_v36 = vmax.f32 %v5665_v41, 0.0  ;;  %v5680_v49 = vadd.f32 %v6891_v13, %v5595_v60 }
 0x840   :  { %v5674_v6 = vpop.f32.mrf.mxu0 }
 0x841   :  { %v5675_v57 = vadd.f32 %v5674_v6, %v5590_v16  ;;  %6924 = vmatprep.mubr.f32.mxu1 %v5683_v36  ;;  %v5686_v50 = vmax.f32 %v5680_v49, 0.0 }
 0x842   :  { %6925 = vmatmul.mubr.f32.vlgmr.msra.gmra.mxu1 %v5684_v40 }
 0x843   :  { %v5685_v15 = vmax.f32 %v5675_v57, 0.0 }
 0x845   :  { %6927 = vmatprep.mubr.f32.mxu1 %v5685_v15 }
 0x846   :  { %6928 = vmatmul.mubr.f32.gmra.mxu1 %v5686_v50 }
 0x847   :  { %6971 = vmatprep.mubr.msk.f32.mxu1 %vm5330_vm10, %v6615_v17 }
 0x902   :  { %v10827_v9 = vpop.f32.mrf.mxu1 }
 0x903   :  { %5976 = vrot.lane.b32.xlu1 %v10827_v9, %s7088_s30  ;;  %5799 = vrot.lane.b32.xlu0 %v10827_v9, %s7090_s13 }
 0x904   :  { %v10833_v3 = vpop.f32.mrf.mxu1 }
 0x906   :  { %v6929_v59 = vpop.f32.mrf.mxu1 }
 0x907   :  { %6074 = vrot.lane.b32.xlu0 %v10827_v9, %s7127_s8  ;;  %5797 = vrot.lane.b32.xlu1 %v10833_v3, %s7090_s13 }
 0x908   :  { %v5779_v43 = vpop.f32.mrf.mxu1 }
 0x90b   :  { %5974 = vrot.lane.b32.xlu1 %v10833_v3, %s7088_s30  ;;  %5803 = vrot.lane.b32.xlu0 %v6929_v59, %s7090_s13 }
 0x90f   :  { %5980 = vrot.lane.b32.xlu0 %v6929_v59, %s7088_s30  ;;  %5801 = vrot.lane.b32.xlu1 %v5779_v43, %s7090_s13 }
 0x913   :  { %6078 = vrot.lane.b32.xlu0 %v6929_v59, %s7127_s8  ;;  %6072 = vrot.lane.b32.xlu1 %v10833_v3, %s7127_s8 }
 0x917   :  { %6176 = vrot.lane.b32.xlu0 %v6929_v59, %s7128_s17  ;;  %6172 = vrot.lane.b32.xlu1 %v10827_v9, %s7128_s17 }
 0x91b   :  { %6274 = vrot.lane.b32.xlu0 %v6929_v59, %s7129_s3  ;;  %6170 = vrot.lane.b32.xlu1 %v10833_v3, %s7128_s17 }
 0x91f   :  { %6270 = vrot.lane.b32.xlu0 %v10827_v9, %s7129_s3  ;;  %5978 = vrot.lane.b32.xlu1 %v5779_v43, %s7088_s30 }
 0x923   :  { %6076 = vrot.lane.b32.xlu0 %v5779_v43, %s7127_s8  ;;  %6268 = vrot.lane.b32.xlu1 %v10833_v3, %s7129_s3 }
 0x927   :  { %6372 = vrot.lane.b32.xlu0 %v6929_v59, %s7110_s26  ;;  %6174 = vrot.lane.b32.xlu1 %v5779_v43, %s7128_s17 }
 0x92b   :  { %6272 = vrot.lane.b32.xlu0 %v5779_v43, %s7129_s3  ;;  %6368 = vrot.lane.b32.xlu1 %v10827_v9, %s7110_s26 }
 0x92f   :  { %6470 = vrot.lane.b32.xlu0 %v6929_v59, %s7123_s24  ;;  %6370 = vrot.lane.b32.xlu1 %v5779_v43, %s7110_s26 }
 0x933   :  { %6468 = vrot.lane.b32.xlu0 %v5779_v43, %s7123_s24  ;;  %6366 = vrot.lane.b32.xlu1 %v10833_v3, %s7110_s26 }
 0x937   :  { %6466 = vrot.lane.b32.xlu0 %v10827_v9, %s7123_s24  ;;  %6464 = vrot.lane.b32.xlu1 %v10833_v3, %s7123_s24 }
 0x93b   :  { %6563 = vperm.xlu0 %7065, %v6559_v29   ;;  %6568 = vperm.xlu1 %7066, %v6560_v45  }
 0x975   :  { %v5800_v30 = vpop.permute.xlu0 %5799  ;;  %v5977_v33 = vpop.permute.xlu1 %5976 }
 0x979   :  { %v6075_v7 = vpop.permute.xlu0 %6074  ;;  %v5798_v56 = vpop.permute.xlu1 %5797 }
 0x97d   :  { %v5804_v24 = vpop.permute.xlu0 %5803  ;;  %v5975_v10 = vpop.permute.xlu1 %5974 }
 0x97e   :  { %6930 = vmatprep.subr.mxu0 %v5804_v24 }
 0x97f   :  { %6931 = vmatpush3.msra.mxu0 %v5804_v24 }
 0x981   :  { %v5981_v52 = vpop.permute.xlu0 %5980  ;;  %v5802_v0 = vpop.permute.xlu1 %5801 }
 0x982   :  { %6932 = vmatprep.subr.mxu0 %v5802_v0 }
 0x983   :  { %6933 = vmatpush3.msra.mxu0 %v5802_v0 }
 0x984   :  { %6934 = vmatprep.subr.mxu0 %v5800_v30 }
 0x985   :  { %v6079_v51 = vpop.permute.xlu0 %6078  ;;  %6935 = vmatpush3.msra.mxu0 %v5800_v30  ;;  %v6073_v47 = vpop.permute.xlu1 %6072 }
 0x986   :  { %6936 = vmatprep.subr.mxu0 %v5798_v56  ;;  %6963 = vmatprep.subr.mxu1 %v6079_v51 }
 0x987   :  { %6937 = vmatpush3.msra.mxu0 %v5798_v56  ;;  %6964 = vmatpush3.msra.mxu1 %v6079_v51 }
 0x988   :  { %6941 = vmatprep.subr.mxu0 %v6929_v59  ;;  %6939 = vmatmul.mubr.msk.f32.vlgmr.msra.gmra.mxu0 %vm5330_vm10, %v6606_v27 }
 0x989   :  { %v6177_v39 = vpop.permute.xlu0 %6176  ;;  %6942 = vmatpush3.msra.mxu0 %v6929_v59  ;;  %v6173_v11 = vpop.permute.xlu1 %6172  ;;  %6949 = vmatprep.mubr.msk.f32.mxu0 %vm5330_vm10, %v5788_v31 }
 0x98a   :  { %6943 = vmatprep.subr.mxu0 %v5779_v43 }
 0x98b   :  { %6944 = vmatpush3.msra.mxu0 %v5779_v43 }
 0x98c   :  { %6945 = vmatprep.subr.mxu0 %v10827_v9 }
 0x98d   :  { %v6275_v58 = vpop.permute.xlu0 %6274  ;;  %6946 = vmatpush3.msra.mxu0 %v10827_v9  ;;  %v6171_v42 = vpop.permute.xlu1 %6170 }
 0x98e   :  { %6947 = vmatprep.subr.mxu0 %v10833_v3 }
 0x98f   :  { %6948 = vmatpush3.msra.mxu0 %v10833_v3 }
 0x990   :  { %6950 = vmatmul.mubr.msk.f32.vlgmr.msra.gmra.mxu0 %vm5330_vm10, %v5789_v38  ;;  %6952 = vmatprep.subr.mxu0 %v5981_v52 }
 0x991   :  { %v6271_v35 = vpop.permute.xlu0 %6270  ;;  %6953 = vmatpush3.msra.mxu0 %v5981_v52  ;;  %v5979_v2 = vpop.permute.xlu1 %5978  ;;  %6960 = vmatprep.mubr.msk.f32.mxu0 %vm5330_vm10, %v6611_v5 }
 0x992   :  { %6954 = vmatprep.subr.mxu0 %v5979_v2 }
 0x993   :  { %6955 = vmatpush3.msra.mxu0 %v5979_v2 }
 0x994   :  { %6956 = vmatprep.subr.mxu0 %v5977_v33 }
 0x995   :  { %v6077_v23 = vpop.permute.xlu0 %6076  ;;  %6957 = vmatpush3.msra.mxu0 %v5977_v33  ;;  %v6269_v20 = vpop.permute.xlu1 %6268 }
 0x996   :  { %6958 = vmatprep.subr.mxu0 %v5975_v10  ;;  %6965 = vmatprep.subr.mxu1 %v6077_v23 }
 0x997   :  { %6959 = vmatpush3.msra.mxu0 %v5975_v10  ;;  %6966 = vmatpush3.msra.mxu1 %v6077_v23 }
 0x998   :  { %6961 = vmatmul.mubr.msk.f32.vlgmr.msra.gmra.mxu0 %vm5330_vm10, %v6612_v55  ;;  %6967 = vmatprep.subr.mxu1 %v6075_v7 }
 0x999   :  { %6974 = vmatprep.subr.mxu0 %v6177_v39  ;;  %6968 = vmatpush3.msra.mxu1 %v6075_v7  ;;  %v6373_v28 = vpop.permute.xlu0 %6372  ;;  %v6175_v18 = vpop.permute.xlu1 %6174 }
 0x99a   :  { %6975 = vmatpush3.msra.mxu0 %v6177_v39  ;;  %6969 = vmatprep.subr.mxu1 %v6073_v47 }
 0x99b   :  { %6976 = vmatprep.subr.mxu0 %v6175_v18  ;;  %6970 = vmatpush3.msra.mxu1 %v6073_v47 }
 0x99c   :  { %6977 = vmatpush3.msra.mxu0 %v6175_v18  ;;  %6972 = vmatmul.mubr.msk.f32.vlgmr.msra.gmra.mxu1 %vm5330_vm10, %v6616_v12 }
 0x99d   :  { %6978 = vmatprep.subr.mxu0 %v6173_v11  ;;  %6985 = vmatprep.subr.mxu1 %v6275_v58  ;;  %v6273_v1 = vpop.permute.xlu0 %6272  ;;  %v6369_v21 = vpop.permute.xlu1 %6368 }
 0x99e   :  { %6979 = vmatpush3.msra.mxu0 %v6173_v11  ;;  %6986 = vmatpush3.msra.mxu1 %v6275_v58 }
 0x99f   :  { %6980 = vmatprep.subr.mxu0 %v6171_v42  ;;  %6987 = vmatprep.subr.mxu1 %v6273_v1 }
 0x9a0   :  { %6981 = vmatpush3.msra.mxu0 %v6171_v42  ;;  %6982 = vmatprep.mubr.msk.f32.mxu0 %vm5330_vm10, %v6619_v4 }
 0x9a1   :  { %6988 = vmatpush3.msra.mxu1 %v6273_v1  ;;  %6983 = vmatmul.mubr.msk.f32.vlgmr.msra.gmra.mxu0 %vm5330_vm10, %v6620_v44  ;;  %v6471_v22 = vpop.permute.xlu0 %6470  ;;  %v6371_v62 = vpop.permute.xlu1 %6370 }
 0x9a2   :  { %6989 = vmatprep.subr.mxu1 %v6271_v35  ;;  %6996 = vmatprep.subr.mxu0 %v6373_v28 }
 0x9a3   :  { %6990 = vmatpush3.msra.mxu1 %v6271_v35  ;;  %6997 = vmatpush3.msra.mxu0 %v6373_v28 }
 0x9a4   :  { %6991 = vmatprep.subr.mxu1 %v6269_v20  ;;  %6998 = vmatprep.subr.mxu0 %v6371_v62 }
 0x9a5   :  { %6992 = vmatpush3.msra.mxu1 %v6269_v20  ;;  %6993 = vmatprep.mubr.msk.f32.mxu1 %vm5330_vm10, %v6623_v54  ;;  %v6469_v34 = vpop.permute.xlu0 %6468  ;;  %v6367_v46 = vpop.permute.xlu1 %6366 }
 0x9a6   :  { %6999 = vmatpush3.msra.mxu0 %v6371_v62  ;;  %6994 = vmatmul.mubr.msk.f32.vlgmr.msra.gmra.mxu1 %vm5330_vm10, %v6624_v19 }
 0x9a7   :  { %7000 = vmatprep.subr.mxu0 %v6369_v21  ;;  %7007 = vmatprep.subr.mxu1 %v6471_v22 }
 0x9a8   :  { %7001 = vmatpush3.msra.mxu0 %v6369_v21  ;;  %7008 = vmatpush3.msra.mxu1 %v6471_v22 }
 0x9a9   :  { %7002 = vmatprep.subr.mxu0 %v6367_v46  ;;  %7009 = vmatprep.subr.mxu1 %v6469_v34  ;;  %v6467_v63 = vpop.permute.xlu0 %6466  ;;  %v6465_v32 = vpop.permute.xlu1 %6464 }
 0x9aa   :  { %7003 = vmatpush3.msra.mxu0 %v6367_v46  ;;  %7004 = vmatprep.mubr.msk.f32.mxu0 %vm5330_vm10, %v6627_v25 }
 0x9ab   :  { %7010 = vmatpush3.msra.mxu1 %v6469_v34  ;;  %7005 = vmatmul.mubr.msk.f32.vlgmr.msra.gmra.mxu0 %vm5330_vm10, %v6628_v53 }
 0x9ac   :  { %7011 = vmatprep.subr.mxu1 %v6467_v63  ;;  %7015 = vmatprep.mubr.msk.f32.mxu1 %vm5330_vm10, %v6631_v48 }
 0x9ad   :  { %7012 = vmatpush3.msra.mxu1 %v6467_v63 }
 0x9ae   :  { %7013 = vmatprep.subr.mxu1 %v6465_v32 }
 0x9af   :  { %7014 = vmatpush3.msra.mxu1 %v6465_v32 }
 0x9b0   :  { %7016 = vmatmul.mubr.msk.f32.vlgmr.msra.gmra.mxu1 %vm5330_vm10, %v6632_v61 }
 0x9b6   :  { %v6569_v52 = vpop.permute.xlu1 %6568  ;;  %v6564_v27 = vpop.permute.xlu0 %6563 }
 0xa48   :  { %v6940_v14 = vpop.f32.mrf.mxu0 }
 0xa4a   :  { %v5881_v37 = vpop.f32.mrf.mxu0 }
 0xa50   :  { %v6951_v26 = vpop.f32.mrf.mxu0 }
 0xa51   :  { %v5968_v16 = vadd.f32 %v6951_v26, %v6940_v14 }
 0xa52   :  { %v5962_v41 = vpop.f32.mrf.mxu0 }
 0xa53   :  { %v5963_v6 = vadd.f32 %v5962_v41, %v5881_v37 }
 0xa58   :  { %v6962_v60 = vpop.f32.mrf.mxu0 }
 0xa59   :  { %v6068_v57 = vadd.f32 %v6962_v60, %v5968_v16 }
 0xa5a   :  { %v6058_v36 = vpop.f32.mrf.mxu0 }
 0xa5b   :  { %v6067_v50 = vadd.f32 %v6058_v36, %v5963_v6 }
 0xa5c   :  { %v6973_v13 = vpop.f32.mrf.mxu1 }
 0xa5d   :  { %v6166_v9 = vadd.f32 %v6973_v13, %v6068_v57 }
 0xa5e   :  { %v6156_v49 = vpop.f32.mrf.mxu1 }
 0xa5f   :  { %v6165_v8 = vadd.f32 %v6156_v49, %v6067_v50 }
 0xa61   :  { %v6984_v40 = vpop.f32.mrf.mxu0 }
 0xa62   :  { %v6264_v59 = vadd.f32 %v6984_v40, %v6166_v9 }
 0xa63   :  { %v6254_v3 = vpop.f32.mrf.mxu0 }
 0xa64   :  { %v6263_v29 = vadd.f32 %v6254_v3, %v6165_v8 }
 0xa66   :  { %v6995_v15 = vpop.f32.mrf.mxu1 }
 0xa67   :  { %v6362_v45 = vadd.f32 %v6995_v15, %v6264_v59 }
 0xa68   :  { %v6352_v17 = vpop.f32.mrf.mxu1 }
 0xa69   :  { %v6361_v33 = vadd.f32 %v6352_v17, %v6263_v29 }
 0xa6b   :  { %v7006_v43 = vpop.f32.mrf.mxu0 }
 0xa6c   :  { %v6460_v7 = vadd.f32 %v7006_v43, %v6362_v45 }
 0xa6d   :  { %v6450_v30 = vpop.f32.mrf.mxu0 }
 0xa6e   :  { %v6459_v24 = vadd.f32 %v6450_v30, %v6361_v33 }
 0xa70   :  { %v7017_v56 = vpop.f32.mrf.mxu1 }
 0xa71   :  { %v6558_v10 = vadd.f32 %v7017_v56, %v6460_v7 }
 0xa72   :  { %v6548_v0 = vpop.f32.mrf.mxu1 }
 0xa73   :  { %v6572_v51 = vadd.f32 %v6569_v52, %v6558_v10  ;;  %v6557_v47 = vadd.f32 %v6548_v0, %v6459_v24 }
 0xa75   :  { %6576 = vst.msk [vmem:[%s10952_s11 + $0x8] sm:$0x3f] %vm6575_vm5, %v6572_v51  ;;  %v6571_v31 = vadd.f32 %v6564_v27, %v6557_v47 }
 0xa77   :  { %6574 = vst.msk [vmem:[%s10952_s11] sm:$0xff] %vm6573_vm1, %v6571_v31 }

</bundles_post_ra>
